<compile_context>
chip_gen: v6e
topology: v6e:2x2x1
jax: 0.10.0
libtpu: 0.0.40
codegen_flags: <defaults>
</compile_context>

<pallas_src>
import functools

import jax
import jax.numpy as jnp
from jax import lax
from jax.experimental import pallas as pl
from jax.experimental.pallas import tpu as pltpu


def _round_up(x, m):
    return ((x + m - 1) // m) * m


def _tessl_kernel(inv_temp, n_views, batch_size, has_lw, *refs):
    """One (anchor-row tile, anchor view) step of the TE-SSL / SupCon loss.

    refs (in order): anchor [tile_a, d_p] bf16, contrast^T [d_p, c_p] bf16,
    mask slice [tile_a, bsz_p] bf16, (time-weight slice [tile_a, bsz_p] bf16,)
    per-row constants [tile_a, 128] f32, output [8, 128] f32 (accumulated over v).
    """
    if has_lw:
        anchor_ref, ct_ref, mask_ref, lw_ref, rowc_ref, o_ref = refs
    else:
        anchor_ref, ct_ref, mask_ref, rowc_ref, o_ref = refs
        lw_ref = None

    i = pl.program_id(0)          # row tile within the bsz period
    v = pl.program_id(1)          # anchor view
    tile_a = mask_ref.shape[0]
    bsz_p = mask_ref.shape[1]

    # Canonical [M,K]@[K,N] MXU contraction, bf16 operands, f32 accumulation.
    logits = jnp.dot(anchor_ref[...], ct_ref[...],
                     preferred_element_type=jnp.float32) * inv_temp     # [tile_a, c_p]

    mx = jnp.max(logits, axis=1, keepdims=True)                          # incl. self term
    ls = logits - mx                                                     # shifted, <= 0
    e = jnp.exp(ls)                                                      # [tile_a, c_p]

    # Self-contrast knock-out restricted to one [tile_a, bsz_p] window: the self column of
    # anchor row (v, i*tile_a + l) is column (i*tile_a + l) of view-slab v.
    col = lax.broadcasted_iota(jnp.int32, (tile_a, bsz_p), 1)
    row = lax.broadcasted_iota(jnp.int32, (tile_a, bsz_p), 0)
    self_pat = col == (row + i * tile_a)
    pad_pat = col >= batch_size                                          # padded contrast cols

    l_vsum = None   # sum over views of shifted logits, self column knocked out
    e_keep = None   # sum over views of exp,            self + padded columns knocked out
    for w in range(n_views):                                             # static, 128-aligned slabs
        sl = slice(w * bsz_p, (w + 1) * bsz_p)
        knock = jnp.logical_and(self_pat, v == w)
        ls_w = jnp.where(knock, 0.0, ls[:, sl])
        e_w = jnp.where(jnp.logical_or(knock, pad_pat), 0.0, e[:, sl])
        l_vsum = ls_w if l_vsum is None else l_vsum + ls_w
        e_keep = e_w if e_keep is None else e_keep + e_w

    rowc = rowc_ref[...]                                                 # [tile_a, 128] f32
    inv_cnt = rowc[:, 0:1]      # 1 / positive-pair count (guarded in the wrapper)
    msum = rowc[:, 1:2]         # sum of positive-pair weights (diagonal removed)

    mask_row = mask_ref[...].astype(jnp.float32)                         # [tile_a, bsz_p]
    numer = jnp.sum(l_vsum * mask_row, axis=1, keepdims=True)            # sum(mask * logits)

    if has_lw:
        lw_row = lw_ref[...].astype(jnp.float32)
        denom = jnp.sum(e_keep * lw_row, axis=1, keepdims=True)
    else:
        denom = jnp.sum(e_keep, axis=1, keepdims=True)
    # Guard: padded anchor rows (msum == 0) would otherwise hit log(0); their guarded log
    # times msum == 0 contributes exactly nothing.  (Genuinely non-positive denominators —
    # possible with negative time weights — would NaN in the torch reference; documented.)
    denom = jnp.maximum(denom, 1e-30)

    # Fused: sum(mask*log_prob) = sum(mask*logits) - (sum mask) * log(denom).
    mean_lp = (numer - msum * jnp.log(denom)) * inv_cnt                  # [tile_a, 1]
    partial = jnp.sum(mean_lp)

    @pl.when(v == 0)
    def _init():
        o_ref[...] = jnp.zeros_like(o_ref)
    o_ref[...] += partial


def tessl_loss(features, labels=None, mask=None, times=None, *,
               temperature=0.07, contrast_mode='all', base_temperature=0.07,
               alpha=1.0, beta=0.5, compare_time_with_self=False,
               table_dtype=jnp.bfloat16):
    """JAX/Pallas port of TESSL_Loss.forward."""
    if features.ndim < 3:
        raise ValueError('`features` needs to be [bsz, n_views, ...]')
    if features.ndim > 3:
        features = features.reshape(features.shape[0], features.shape[1], -1)
    batch_size = features.shape[0]

    # ---------------- mask / time-weight construction (tiny [bsz, bsz] glue) ---------------
    if labels is not None and mask is not None:
        raise ValueError('Cannot define both `labels` and `mask`')
    elif times is not None and labels is None:
        raise ValueError('Cannot define "times" without defining "labels"')
    elif labels is None and mask is None:
        mask = jnp.eye(batch_size, dtype=jnp.float32)
    elif labels is not None:
        labels = labels.reshape(-1, 1)
        if labels.shape[0] != batch_size:
            raise ValueError('Num of labels does not match num of features')
        mask = (labels == labels.T).astype(jnp.float32)
    else:
        mask = mask.astype(jnp.float32)

    all_weights = None
    if times is not None:
        a = jnp.tile(times.reshape(1, -1), (batch_size, 1))
        b = jnp.tile(times.reshape(-1, 1), (1, batch_size))
        deltas = jnp.abs(a - b)
        inverted_mask = (~(labels == labels.T)).astype(jnp.float32)
        if compare_time_with_self:
            _min = jnp.min(deltas + inverted_mask * 1e10)
            _max = jnp.min(deltas - inverted_mask * 1e10)  # bug-compatible with the torch code
        else:
            eye = jnp.eye(batch_size, dtype=jnp.float32)
            _mask = (inverted_mask + eye) * 1e10
            _min = jnp.min(deltas * mask + _mask)
            _max = jnp.max(deltas * mask - _mask)
        m = (alpha - beta) / (_min - _max)
        b_ = (beta - alpha) / (_min - _max) * _min + alpha
        all_weights = m * deltas + b_
        mask = all_weights * mask

    contrast_count = features.shape[1]
    if contrast_mode == 'one':
        anchor_count = 1
    elif contrast_mode == 'all':
        anchor_count = contrast_count
    else:
        raise ValueError('Unknown mode: {}'.format(contrast_mode))
    D = features.shape[2]

    # ---------------------------- padding / tiling geometry --------------------------------
    bsz_p = _round_up(batch_size, 128)               # lane-dense per-view contrast width
    d_p = _round_up(D, 128)
    c_p = contrast_count * bsz_p
    # Anchor-row tile: biggest that keeps the f32 [tile_a, C_p] temporaries + resident
    # contrast block comfortably under the scoped-VMEM budget (cap helps v7x's 64 MiB VMEM).
    tile_a = 128
    if bsz_p % 256 == 0 and (4 * 256 * c_p * 4 + c_p * d_p * 2) <= (24 << 20):
        tile_a = 256
    nblk = bsz_p // tile_a

    # ------------- features: one bf16 copy per role, MXU-canonical orientation -------------
    fp = jnp.pad(features.astype(jnp.bfloat16),
                 ((0, bsz_p - batch_size), (0, 0), (0, d_p - D)))        # [bsz_p, V, d_p]
    contrast = jnp.transpose(fp, (1, 0, 2)).reshape(c_p, d_p)            # views stacked on rows
    ct = jnp.transpose(contrast)                                         # [d_p, c_p]  (K, N)
    anchor = contrast if anchor_count == contrast_count else fp[:, 0, :]

    # ------------- bf16 weight tables (bsz-periodic) + f32 per-row statistics --------------
    mask_q16 = mask.astype(table_dtype)
    mask_q = mask_q16.astype(jnp.float32)            # quantized values, used for exact stats
    mask_sm = jnp.zeros((bsz_p, bsz_p), table_dtype)
    mask_sm = mask_sm.at[:batch_size, :batch_size].set(mask_q16)

    has_lw = times is not None
    if has_lw:
        lw_q16 = all_weights.astype(table_dtype)
        lw_sm = jnp.zeros((bsz_p, bsz_p), table_dtype)
        lw_sm = lw_sm.at[:batch_size, :batch_size].set(lw_q16)

    row_sum = jnp.sum(mask_q, axis=1)
    diag_w = jnp.diagonal(mask_q)
    msum = contrast_count * row_sum - diag_w                             # sum of positive weights
    nnz = jnp.sum((mask_q != 0).astype(jnp.float32), axis=1)
    diag_nz = (diag_w != 0).astype(jnp.float32)
    cnt = contrast_count * nnz - diag_nz
    cnt = jnp.where(cnt < 1e-6, 1.0, cnt)

    rowc = jnp.zeros((bsz_p, 128), jnp.float32)
    rowc = rowc.at[:, 0].set(1.0)                                        # padded rows: 1/cnt = 1
    rowc = rowc.at[:batch_size, 0].set(1.0 / cnt)
    rowc = rowc.at[:batch_size, 1].set(msum)

    kernel = functools.partial(_tessl_kernel, float(1.0 / temperature),
                               int(contrast_count), int(batch_size), bool(has_lw))

    # Conservative VMEM budget: resident contrast block (<=2 buffers), pipelined blocks (x2),
    # ~3 f32 [tile_a, C_p] and a handful of [tile_a, bsz_p] live temporaries, 4 MiB headroom.
    vmem_need = (2 * d_p * c_p * 2
                 + 2 * (tile_a * d_p * 2 + (2 if has_lw else 1) * tile_a * bsz_p * 2
                        + tile_a * 128 * 4 + 8 * 128 * 4)
                 + 3 * tile_a * c_p * 4 + 8 * tile_a * bsz_p * 4)
    vmem_limit = int(min(max(vmem_need + (4 << 20), 32 << 20), 96 << 20))

    def _run(single_buffer_features):
        ct_kwargs = {}
        if single_buffer_features:
            # Constant-index resident block: double-buffering it only wastes VMEM.
            ct_kwargs['pipeline_mode'] = pl.Buffered(buffer_count=1)
        in_specs = [
            pl.BlockSpec((tile_a, d_p), lambda i, v: (v * nblk + i, 0)),   # anchor tile
            pl.BlockSpec((d_p, c_p), lambda i, v: (0, 0), **ct_kwargs),    # contrast^T, resident
            pl.BlockSpec((tile_a, bsz_p), lambda i, v: (i, 0)),            # mask slice (reused over v)
        ]
        operands = [anchor, ct, mask_sm]
        if has_lw:
            in_specs.append(pl.BlockSpec((tile_a, bsz_p), lambda i, v: (i, 0)))  # time-weight slice
            operands.append(lw_sm)
        in_specs.append(pl.BlockSpec((tile_a, 128), lambda i, v: (i, 0)))        # per-row constants
        operands.append(rowc)
        return pl.pallas_call(
            kernel,
            out_shape=jax.ShapeDtypeStruct((nblk * 8, 128), jnp.float32),
            grid_spec=pltpu.PrefetchScalarGridSpec(
                num_scalar_prefetch=0,
                grid=(nblk, anchor_count),      # view axis innermost: table reuse + accumulation
                in_specs=in_specs,
                out_specs=pl.BlockSpec((8, 128), lambda i, v: (i, 0)),
            ),
            compiler_params=pltpu.CompilerParams(
                dimension_semantics=("parallel", "arbitrary"),
                vmem_limit_bytes=vmem_limit),
        )(*operands)

    try:
        out = _run(True)
    except Exception:
        # pl.Buffered(1) not supported by this JAX / Mosaic build: fall back to default buffering.
        out = _run(False)

    total = jnp.sum(out[::8, 0])
    n_rows = float(batch_size * anchor_count)
    return -(temperature / base_temperature) * total / n_rows


def _tessl_loss_ref(features, labels=None, mask=None, times=None, *, temperature=0.07,
                    base_temperature=0.07, alpha=1.0, beta=0.5, weights_dtype=None):
    """Pure-JAX reference (contrast_mode='all') mirroring the torch module.
    `weights_dtype` optionally rounds the weight tables the way the kernel stores them."""
    bsz, n_views, _ = features.shape
    if labels is None and mask is None:
        mask = jnp.eye(bsz, dtype=jnp.float32)
    elif labels is not None:
        labels = labels.reshape(-1, 1)
        mask = (labels == labels.T).astype(jnp.float32)
    else:
        mask = mask.astype(jnp.float32)
    all_weights = jnp.ones((bsz, bsz), jnp.float32)
    if times is not None:
        a = jnp.tile(times.reshape(1, -1), (bsz, 1))
        b = jnp.tile(times.reshape(-1, 1), (1, bsz))
        deltas = jnp.abs(a - b)
        inverted_mask = (~(labels == labels.T)).astype(jnp.float32)
        eye = jnp.eye(bsz, dtype=jnp.float32)
        _mask = (inverted_mask + eye) * 1e10
        _min = jnp.min(deltas * mask + _mask)
        _max = jnp.max(deltas * mask - _mask)
        m = (alpha - beta) / (_min - _max)
        b_ = (beta - alpha) / (_min - _max) * _min + alpha
        all_weights = m * deltas + b_
        mask = all_weights * mask
    if weights_dtype is not None:
        mask = mask.astype(weights_dtype).astype(jnp.float32)
        all_weights = all_weights.astype(weights_dtype).astype(jnp.float32)

    cf = jnp.concatenate([features[:, v, :] for v in range(n_views)], axis=0)
    logits0 = jnp.dot(cf, cf.T) / temperature
    logits = logits0 - jnp.max(logits0, axis=1, keepdims=True)
    N = bsz * n_views
    mask_full = jnp.tile(mask, (n_views, n_views))
    logits_mask = 1.0 - jnp.eye(N, dtype=jnp.float32)
    mask_full = mask_full * logits_mask
    log_prob_mask = jnp.tile(all_weights, (n_views, n_views)) * logits_mask
    exp_logits = jnp.exp(logits) * log_prob_mask
    log_prob = logits - jnp.log(jnp.sum(exp_logits, axis=1, keepdims=True))
    pos = jnp.sum((mask_full != 0).astype(jnp.float32), axis=1)
    pos = jnp.where(pos < 1e-6, 1.0, pos)
    mean_lp = jnp.sum(mask_full * log_prob, axis=1) / pos
    loss = -(temperature / base_temperature) * mean_lp
    return jnp.mean(loss)


if __name__ == "__main__":
    key = jax.random.PRNGKey(0)
    k_feat, k_time = jax.random.split(key)

    bsz, n_views, D = 8, 2, 32
    features = jax.random.normal(k_feat, (bsz, n_views, D), dtype=jnp.float32)
    features = features / jnp.linalg.norm(features, axis=-1, keepdims=True)
    labels = jnp.array([0, 0, 1, 1, 2, 2, 3, 3], dtype=jnp.int32)
    times = jax.random.uniform(k_time, (bsz,), dtype=jnp.float32, minval=0.0, maxval=10.0)

    # Precision-matched reference: bf16-rounded features (the kernel feeds bf16 MXU operands
    # with f32 accumulation) and bf16-rounded weight tables (how the kernel stores them).
    features_bf = features.astype(jnp.bfloat16).astype(jnp.float32)

    # --- TE-SSL path (labels + times) ---
    loss_t = jax.block_until_ready(tessl_loss(features, labels=labels, times=times))
    ref_t_q = _tessl_loss_ref(features_bf, labels=labels, times=times, weights_dtype=jnp.bfloat16)
    ref_t_f32 = _tessl_loss_ref(features, labels=labels, times=times)
    assert jnp.isfinite(loss_t), "TE-SSL loss is not finite"
    assert jnp.allclose(loss_t, ref_t_q, rtol=3e-3, atol=3e-3), (loss_t, ref_t_q)
    assert jnp.allclose(loss_t, ref_t_f32, rtol=5e-2, atol=5e-2), (loss_t, ref_t_f32)

    # --- SupCon path (labels only, no times) ---
    loss_s = jax.block_until_ready(tessl_loss(features, labels=labels))
    ref_s_q = _tessl_loss_ref(features_bf, labels=labels, weights_dtype=jnp.bfloat16)
    ref_s_f32 = _tessl_loss_ref(features, labels=labels)
    assert jnp.isfinite(loss_s), "SupCon loss is not finite"
    assert jnp.allclose(loss_s, ref_s_q, rtol=3e-3, atol=3e-3), (loss_s, ref_s_q)
    assert jnp.allclose(loss_s, ref_s_f32, rtol=5e-2, atol=5e-2), (loss_s, ref_s_f32)

    print("KERNEL_OK")
</pallas_src>

<mosaic_0001>
module attributes {stable_mosaic.version = 11 : i64} {
  func.func @_tessl_kernel(%arg0: i32, %arg1: i32, %arg2: memref<128x128xbf16, #tpu.memory_space<vmem>>, %arg3: memref<128x256xbf16, #tpu.memory_space<vmem>>, %arg4: memref<128x128xbf16, #tpu.memory_space<vmem>>, %arg5: memref<128x128xbf16, #tpu.memory_space<vmem>>, %arg6: memref<128x128xf32, #tpu.memory_space<vmem>>, %arg7: memref<8x128xf32, #tpu.memory_space<vmem>>) attributes {dimension_semantics = [#tpu.dimension_semantics<parallel>, #tpu.dimension_semantics<arbitrary>], iteration_bounds = array<i64: 1, 2>, scalar_prefetch = 0 : i64, scratch_operands = 0 : i64, tpu.core_type = #tpu.core_type<tc>, window_params = [{transform_indices = @transform_0, window_bounds = array<i64: 128, 128>}, {pipeline_mode = #tpu.pipeline_mode<synchronous>, transform_indices = @transform_1, window_bounds = array<i64: 128, 256>}, {transform_indices = @transform_2, window_bounds = array<i64: 128, 128>}, {transform_indices = @transform_3, window_bounds = array<i64: 128, 128>}, {transform_indices = @transform_4, window_bounds = array<i64: 128, 128>}, {transform_indices = @transform_5, window_bounds = array<i64: 8, 128>}]} {
    %c0 = arith.constant 0 : index
    %c0_0 = arith.constant 0 : index
    %0 = vector.load %arg2[%c0, %c0_0] : memref<128x128xbf16, #tpu.memory_space<vmem>>, vector<128x128xbf16>
    %c0_1 = arith.constant 0 : index
    %c0_2 = arith.constant 0 : index
    %1 = vector.load %arg3[%c0_1, %c0_2] : memref<128x256xbf16, #tpu.memory_space<vmem>>, vector<128x256xbf16>
    %cst = arith.constant dense<0.000000e+00> : vector<128x256xf32>
    %2 = tpu.matmul %0, %1, %cst {dimension_numbers = #tpu.dot_dimension_numbers<[1], [0], [0], [1], [0, 0, 1, 1], [], []>} : vector<128x128xbf16>, vector<128x256xbf16>, vector<128x256xf32> -> vector<128x256xf32>
    %cst_3 = arith.constant 14.2857141 : f32
    %3 = vector.broadcast %cst_3 : f32 to vector<128x256xf32>
    %4 = arith.mulf %2, %3 : vector<128x256xf32>
    %cst_4 = arith.constant dense<0xFF800000> : vector<128xf32>
    %5 = vector.multi_reduction <maximumf>, %4, %cst_4 [1] : vector<128x256xf32> to vector<128xf32>
    %6 = vector.shape_cast %5 : vector<128xf32> to vector<128x1xf32>
    %7 = vector.broadcast %6 : vector<128x1xf32> to vector<128x256xf32>
    %8 = arith.subf %4, %7 : vector<128x256xf32>
    %9 = math.exp %8 : vector<128x256xf32>
    %10 = tpu.iota {dimensions = array<i32: 1>} : vector<128x128xi32>
    %11 = tpu.iota {dimensions = array<i32: 0>} : vector<128x128xi32>
    %c128_i32 = arith.constant 128 : i32
    %12 = arith.muli %arg0, %c128_i32 : i32
    %13 = vector.broadcast %12 : i32 to vector<128x128xi32>
    %14 = arith.addi %11, %13 : vector<128x128xi32>
    %15 = arith.cmpi eq, %10, %14 : vector<128x128xi32>
    %c8_i32 = arith.constant 8 : i32
    %16 = vector.broadcast %c8_i32 : i32 to vector<128x128xi32>
    %17 = arith.cmpi sge, %10, %16 : vector<128x128xi32>
    %c0_i32 = arith.constant 0 : i32
    %18 = arith.cmpi eq, %arg1, %c0_i32 : i32
    %19 = vector.broadcast %18 : i1 to vector<128x128xi1>
    %20 = arith.andi %15, %19 : vector<128x128xi1>
    %21 = vector.extract_strided_slice %8 {offsets = [0, 0], sizes = [128, 128], strides = [1, 1]} : vector<128x256xf32> to vector<128x128xf32>
    %cst_5 = arith.constant 0.000000e+00 : f32
    %22 = vector.broadcast %cst_5 : f32 to vector<128x128xf32>
    %23 = arith.select %20, %22, %21 : vector<128x128xi1>, vector<128x128xf32>
    %24 = arith.ori %20, %17 : vector<128x128xi1>
    %25 = vector.extract_strided_slice %9 {offsets = [0, 0], sizes = [128, 128], strides = [1, 1]} : vector<128x256xf32> to vector<128x128xf32>
    %cst_6 = arith.constant 0.000000e+00 : f32
    %26 = vector.broadcast %cst_6 : f32 to vector<128x128xf32>
    %27 = arith.select %24, %26, %25 : vector<128x128xi1>, vector<128x128xf32>
    %c1_i32 = arith.constant 1 : i32
    %28 = arith.cmpi eq, %arg1, %c1_i32 : i32
    %29 = vector.broadcast %28 : i1 to vector<128x128xi1>
    %30 = arith.andi %15, %29 : vector<128x128xi1>
    %31 = vector.extract_strided_slice %8 {offsets = [0, 128], sizes = [128, 128], strides = [1, 1]} : vector<128x256xf32> to vector<128x128xf32>
    %cst_7 = arith.constant 0.000000e+00 : f32
    %32 = vector.broadcast %cst_7 : f32 to vector<128x128xf32>
    %33 = arith.select %30, %32, %31 : vector<128x128xi1>, vector<128x128xf32>
    %34 = arith.ori %30, %17 : vector<128x128xi1>
    %35 = vector.extract_strided_slice %9 {offsets = [0, 128], sizes = [128, 128], strides = [1, 1]} : vector<128x256xf32> to vector<128x128xf32>
    %cst_8 = arith.constant 0.000000e+00 : f32
    %36 = vector.broadcast %cst_8 : f32 to vector<128x128xf32>
    %37 = arith.select %34, %36, %35 : vector<128x128xi1>, vector<128x128xf32>
    %38 = arith.addf %23, %33 : vector<128x128xf32>
    %39 = arith.addf %27, %37 : vector<128x128xf32>
    %c0_9 = arith.constant 0 : index
    %c0_10 = arith.constant 0 : index
    %40 = vector.load %arg6[%c0_9, %c0_10] : memref<128x128xf32, #tpu.memory_space<vmem>>, vector<128x128xf32>
    %41 = vector.extract_strided_slice %40 {offsets = [0, 0], sizes = [128, 1], strides = [1, 1]} : vector<128x128xf32> to vector<128x1xf32>
    %42 = vector.extract_strided_slice %40 {offsets = [0, 1], sizes = [128, 1], strides = [1, 1]} : vector<128x128xf32> to vector<128x1xf32>
    %c0_11 = arith.constant 0 : index
    %c0_12 = arith.constant 0 : index
    %43 = vector.load %arg4[%c0_11, %c0_12] : memref<128x128xbf16, #tpu.memory_space<vmem>>, vector<128x128xbf16>
    %44 = arith.extf %43 : vector<128x128xbf16> to vector<128x128xf32>
    %45 = arith.mulf %38, %44 : vector<128x128xf32>
    %cst_13 = arith.constant dense<0.000000e+00> : vector<128xf32>
    %46 = vector.multi_reduction <add>, %45, %cst_13 [1] : vector<128x128xf32> to vector<128xf32>
    %47 = vector.shape_cast %46 : vector<128xf32> to vector<128x1xf32>
    %c0_14 = arith.constant 0 : index
    %c0_15 = arith.constant 0 : index
    %48 = vector.load %arg5[%c0_14, %c0_15] : memref<128x128xbf16, #tpu.memory_space<vmem>>, vector<128x128xbf16>
    %49 = arith.extf %48 : vector<128x128xbf16> to vector<128x128xf32>
    %50 = arith.mulf %39, %49 : vector<128x128xf32>
    %cst_16 = arith.constant dense<0.000000e+00> : vector<128xf32>
    %51 = vector.multi_reduction <add>, %50, %cst_16 [1] : vector<128x128xf32> to vector<128xf32>
    %52 = vector.shape_cast %51 : vector<128xf32> to vector<128x1xf32>
    %cst_17 = arith.constant 1.000000e-30 : f32
    %53 = vector.broadcast %cst_17 : f32 to vector<128x1xf32>
    %54 = arith.maximumf %52, %53 : vector<128x1xf32>
    %55 = math.log %54 : vector<128x1xf32>
    %56 = arith.mulf %42, %55 : vector<128x1xf32>
    %57 = arith.subf %47, %56 : vector<128x1xf32>
    %58 = arith.mulf %57, %41 : vector<128x1xf32>
    %59 = vector.shape_cast %58 : vector<128x1xf32> to vector<1x128x1xf32>
    %cst_18 = arith.constant dense<0.000000e+00> : vector<1xf32>
    %60 = vector.multi_reduction <add>, %59, %cst_18 [1, 2] : vector<1x128x1xf32> to vector<1xf32>
    %61 = vector.shape_cast %60 : vector<1xf32> to vector<1x1x1xf32>
    %62 = vector.extract %61[0, 0, 0] : f32 from vector<1x1x1xf32>
    %c0_i32_19 = arith.constant 0 : i32
    %63 = arith.cmpi eq, %arg1, %c0_i32_19 : i32
    %64 = arith.extui %63 : i1 to i32
    %c0_i32_20 = arith.constant 0 : i32
    %65 = arith.cmpi ne, %64, %c0_i32_20 : i32
    scf.if %65 {
      %cst_25 = arith.constant 0.000000e+00 : f32
      %70 = vector.broadcast %cst_25 : f32 to vector<8x128xf32>
      %c0_26 = arith.constant 0 : index
      %c0_27 = arith.constant 0 : index
      %71 = vector.load %arg7[%c0_26, %c0_27] : memref<8x128xf32, #tpu.memory_space<vmem>>, vector<8x128xf32>
      tpu.vector_store %arg7[%c0_26, %c0_27], %70 {strides = array<i32>} : memref<8x128xf32, #tpu.memory_space<vmem>>, vector<8x128xf32>,
    } else {
    }
    %c0_21 = arith.constant 0 : index
    %c0_22 = arith.constant 0 : index
    %66 = vector.load %arg7[%c0_21, %c0_22] : memref<8x128xf32, #tpu.memory_space<vmem>>, vector<8x128xf32>
    %67 = vector.broadcast %62 : f32 to vector<8x128xf32>
    %68 = arith.addf %66, %67 : vector<8x128xf32>
    %c0_23 = arith.constant 0 : index
    %c0_24 = arith.constant 0 : index
    %69 = vector.load %arg7[%c0_23, %c0_24] : memref<8x128xf32, #tpu.memory_space<vmem>>, vector<8x128xf32>
    tpu.vector_store %arg7[%c0_23, %c0_24], %68 {strides = array<i32>} : memref<8x128xf32, #tpu.memory_space<vmem>>, vector<8x128xf32>,
    return
  }
  func.func @transform_0(%arg0: i32, %arg1: i32) -> (i32, i32) {
    %c1_i32 = arith.constant 1 : i32
    %0 = arith.muli %arg1, %c1_i32 : i32
    %1 = arith.addi %0, %arg0 : i32
    %c0_i32 = arith.constant 0 : i32
    %c0_i32_0 = arith.constant 0 : i32
    return %1, %c0_i32 : i32, i32
  }
  func.func @transform_1(%arg0: i32, %arg1: i32) -> (i32, i32) {
    %c0_i32 = arith.constant 0 : i32
    %c0_i32_0 = arith.constant 0 : i32
    %c0_i32_1 = arith.constant 0 : i32
    return %c0_i32, %c0_i32_0 : i32, i32
  }
  func.func @transform_2(%arg0: i32, %arg1: i32) -> (i32, i32) {
    %c0_i32 = arith.constant 0 : i32
    %c0_i32_0 = arith.constant 0 : i32
    return %arg0, %c0_i32 : i32, i32
  }
  func.func @transform_3(%arg0: i32, %arg1: i32) -> (i32, i32) {
    %c0_i32 = arith.constant 0 : i32
    %c0_i32_0 = arith.constant 0 : i32
    return %arg0, %c0_i32 : i32, i32
  }
  func.func @transform_4(%arg0: i32, %arg1: i32) -> (i32, i32) {
    %c0_i32 = arith.constant 0 : i32
    %c0_i32_0 = arith.constant 0 : i32
    return %arg0, %c0_i32 : i32, i32
  }
  func.func @transform_5(%arg0: i32, %arg1: i32) -> (i32, i32) {
    %c0_i32 = arith.constant 0 : i32
    %c0_i32_0 = arith.constant 0 : i32
    return %arg0, %c0_i32 : i32, i32
  }
}

module attributes {stable_mosaic.version = 11 : i64} {
  func.func @_tessl_kernel(%arg0: i32, %arg1: i32, %arg2: memref<128x128xbf16, #tpu.memory_space<vmem>>, %arg3: memref<128x256xbf16, #tpu.memory_space<vmem>>, %arg4: memref<128x128xbf16, #tpu.memory_space<vmem>>, %arg5: memref<128x128xbf16, #tpu.memory_space<vmem>>, %arg6: memref<128x128xf32, #tpu.memory_space<vmem>>, %arg7: memref<8x128xf32, #tpu.memory_space<vmem>>) attributes {dimension_semantics = [#tpu.dimension_semantics<parallel>, #tpu.dimension_semantics<arbitrary>], iteration_bounds = array<i64: 1, 2>, scalar_prefetch = 0 : i64, scratch_operands = 0 : i64, tpu.core_type = #tpu.core_type<tc>, window_params = [{transform_indices = @transform_0, window_bounds = array<i64: 128, 128>}, {pipeline_mode = #tpu.pipeline_mode<synchronous>, transform_indices = @transform_1, window_bounds = array<i64: 128, 256>}, {transform_indices = @transform_2, window_bounds = array<i64: 128, 128>}, {transform_indices = @transform_3, window_bounds = array<i64: 128, 128>}, {transform_indices = @transform_4, window_bounds = array<i64: 128, 128>}, {transform_indices = @transform_5, window_bounds = array<i64: 8, 128>}]} {
    %c0 = arith.constant 0 : index
    %c0_0 = arith.constant 0 : index
    %0 = vector.load %arg2[%c0, %c0_0] : memref<128x128xbf16, #tpu.memory_space<vmem>>, vector<128x128xbf16>
    %c0_1 = arith.constant 0 : index
    %c0_2 = arith.constant 0 : index
    %1 = vector.load %arg3[%c0_1, %c0_2] : memref<128x256xbf16, #tpu.memory_space<vmem>>, vector<128x256xbf16>
    %cst = arith.constant dense<0.000000e+00> : vector<128x256xf32>
    %2 = tpu.matmul %0, %1, %cst {dimension_numbers = #tpu.dot_dimension_numbers<[1], [0], [0], [1], [0, 0, 1, 1], [], []>} : vector<128x128xbf16>, vector<128x256xbf16>, vector<128x256xf32> -> vector<128x256xf32>
    %cst_3 = arith.constant 14.2857141 : f32
    %3 = vector.broadcast %cst_3 : f32 to vector<128x256xf32>
    %4 = arith.mulf %2, %3 : vector<128x256xf32>
    %cst_4 = arith.constant dense<0xFF800000> : vector<128xf32>
    %5 = vector.multi_reduction <maximumf>, %4, %cst_4 [1] : vector<128x256xf32> to vector<128xf32>
    %6 = vector.shape_cast %5 : vector<128xf32> to vector<128x1xf32>
    %7 = vector.broadcast %6 : vector<128x1xf32> to vector<128x256xf32>
    %8 = arith.subf %4, %7 : vector<128x256xf32>
    %9 = math.exp %8 : vector<128x256xf32>
    %10 = tpu.iota {dimensions = array<i32: 1>} : vector<128x128xi32>
    %11 = tpu.iota {dimensions = array<i32: 0>} : vector<128x128xi32>
    %c128_i32 = arith.constant 128 : i32
    %12 = arith.muli %arg0, %c128_i32 : i32
    %13 = vector.broadcast %12 : i32 to vector<128x128xi32>
    %14 = arith.addi %11, %13 : vector<128x128xi32>
    %15 = arith.cmpi eq, %10, %14 : vector<128x128xi32>
    %c8_i32 = arith.constant 8 : i32
    %16 = vector.broadcast %c8_i32 : i32 to vector<128x128xi32>
    %17 = arith.cmpi sge, %10, %16 : vector<128x128xi32>
    %c0_i32 = arith.constant 0 : i32
    %18 = arith.cmpi eq, %arg1, %c0_i32 : i32
    %19 = vector.broadcast %18 : i1 to vector<128x128xi1>
    %20 = arith.andi %15, %19 : vector<128x128xi1>
    %21 = vector.extract_strided_slice %8 {offsets = [0, 0], sizes = [128, 128], strides = [1, 1]} : vector<128x256xf32> to vector<128x128xf32>
    %cst_5 = arith.constant 0.000000e+00 : f32
    %22 = vector.broadcast %cst_5 : f32 to vector<128x128xf32>
    %23 = arith.select %20, %22, %21 : vector<128x128xi1>, vector<128x128xf32>
    %24 = arith.ori %20, %17 : vector<128x128xi1>
    %25 = vector.extract_strided_slice %9 {offsets = [0, 0], sizes = [128, 128], strides = [1, 1]} : vector<128x256xf32> to vector<128x128xf32>
    %cst_6 = arith.constant 0.000000e+00 : f32
    %26 = vector.broadcast %cst_6 : f32 to vector<128x128xf32>
    %27 = arith.select %24, %26, %25 : vector<128x128xi1>, vector<128x128xf32>
    %c1_i32 = arith.constant 1 : i32
    %28 = arith.cmpi eq, %arg1, %c1_i32 : i32
    %29 = vector.broadcast %28 : i1 to vector<128x128xi1>
    %30 = arith.andi %15, %29 : vector<128x128xi1>
    %31 = vector.extract_strided_slice %8 {offsets = [0, 128], sizes = [128, 128], strides = [1, 1]} : vector<128x256xf32> to vector<128x128xf32>
    %cst_7 = arith.constant 0.000000e+00 : f32
    %32 = vector.broadcast %cst_7 : f32 to vector<128x128xf32>
    %33 = arith.select %30, %32, %31 : vector<128x128xi1>, vector<128x128xf32>
    %34 = arith.ori %30, %17 : vector<128x128xi1>
    %35 = vector.extract_strided_slice %9 {offsets = [0, 128], sizes = [128, 128], strides = [1, 1]} : vector<128x256xf32> to vector<128x128xf32>
    %cst_8 = arith.constant 0.000000e+00 : f32
    %36 = vector.broadcast %cst_8 : f32 to vector<128x128xf32>
    %37 = arith.select %34, %36, %35 : vector<128x128xi1>, vector<128x128xf32>
    %38 = arith.addf %23, %33 : vector<128x128xf32>
    %39 = arith.addf %27, %37 : vector<128x128xf32>
    %c0_9 = arith.constant 0 : index
    %c0_10 = arith.constant 0 : index
    %40 = vector.load %arg6[%c0_9, %c0_10] : memref<128x128xf32, #tpu.memory_space<vmem>>, vector<128x128xf32>
    %41 = vector.extract_strided_slice %40 {offsets = [0, 0], sizes = [128, 1], strides = [1, 1]} : vector<128x128xf32> to vector<128x1xf32>
    %42 = vector.extract_strided_slice %40 {offsets = [0, 1], sizes = [128, 1], strides = [1, 1]} : vector<128x128xf32> to vector<128x1xf32>
    %c0_11 = arith.constant 0 : index
    %c0_12 = arith.constant 0 : index
    %43 = vector.load %arg4[%c0_11, %c0_12] : memref<128x128xbf16, #tpu.memory_space<vmem>>, vector<128x128xbf16>
    %44 = arith.extf %43 : vector<128x128xbf16> to vector<128x128xf32>
    %45 = arith.mulf %38, %44 : vector<128x128xf32>
    %cst_13 = arith.constant dense<0.000000e+00> : vector<128xf32>
    %46 = vector.multi_reduction <add>, %45, %cst_13 [1] : vector<128x128xf32> to vector<128xf32>
    %47 = vector.shape_cast %46 : vector<128xf32> to vector<128x1xf32>
    %c0_14 = arith.constant 0 : index
    %c0_15 = arith.constant 0 : index
    %48 = vector.load %arg5[%c0_14, %c0_15] : memref<128x128xbf16, #tpu.memory_space<vmem>>, vector<128x128xbf16>
    %49 = arith.extf %48 : vector<128x128xbf16> to vector<128x128xf32>
    %50 = arith.mulf %39, %49 : vector<128x128xf32>
    %cst_16 = arith.constant dense<0.000000e+00> : vector<128xf32>
    %51 = vector.multi_reduction <add>, %50, %cst_16 [1] : vector<128x128xf32> to vector<128xf32>
    %52 = vector.shape_cast %51 : vector<128xf32> to vector<128x1xf32>
    %cst_17 = arith.constant 1.000000e-30 : f32
    %53 = vector.broadcast %cst_17 : f32 to vector<128x1xf32>
    %54 = arith.maximumf %52, %53 : vector<128x1xf32>
    %55 = math.log %54 : vector<128x1xf32>
    %56 = arith.mulf %42, %55 : vector<128x1xf32>
    %57 = arith.subf %47, %56 : vector<128x1xf32>
    %58 = arith.mulf %57, %41 : vector<128x1xf32>
    %59 = vector.shape_cast %58 : vector<128x1xf32> to vector<1x128x1xf32>
    %cst_18 = arith.constant dense<0.000000e+00> : vector<1xf32>
    %60 = vector.multi_reduction <add>, %59, %cst_18 [1, 2] : vector<1x128x1xf32> to vector<1xf32>
    %61 = vector.shape_cast %60 : vector<1xf32> to vector<1x1x1xf32>
    %62 = vector.extract %61[0, 0, 0] : f32 from vector<1x1x1xf32>
    %c0_i32_19 = arith.constant 0 : i32
    %63 = arith.cmpi eq, %arg1, %c0_i32_19 : i32
    %64 = arith.extui %63 : i1 to i32
    %c0_i32_20 = arith.constant 0 : i32
    %65 = arith.cmpi ne, %64, %c0_i32_20 : i32
    scf.if %65 {
      %cst_25 = arith.constant 0.000000e+00 : f32
      %70 = vector.broadcast %cst_25 : f32 to vector<8x128xf32>
      %c0_26 = arith.constant 0 : index
      %c0_27 = arith.constant 0 : index
      %71 = vector.load %arg7[%c0_26, %c0_27] : memref<8x128xf32, #tpu.memory_space<vmem>>, vector<8x128xf32>
      tpu.vector_store %arg7[%c0_26, %c0_27], %70 {strides = array<i32>} : memref<8x128xf32, #tpu.memory_space<vmem>>, vector<8x128xf32>,
    } else {
    }
    %c0_21 = arith.constant 0 : index
    %c0_22 = arith.constant 0 : index
    %66 = vector.load %arg7[%c0_21, %c0_22] : memref<8x128xf32, #tpu.memory_space<vmem>>, vector<8x128xf32>
    %67 = vector.broadcast %62 : f32 to vector<8x128xf32>
    %68 = arith.addf %66, %67 : vector<8x128xf32>
    %c0_23 = arith.constant 0 : index
    %c0_24 = arith.constant 0 : index
    %69 = vector.load %arg7[%c0_23, %c0_24] : memref<8x128xf32, #tpu.memory_space<vmem>>, vector<8x128xf32>
    tpu.vector_store %arg7[%c0_23, %c0_24], %68 {strides = array<i32>} : memref<8x128xf32, #tpu.memory_space<vmem>>, vector<8x128xf32>,
    return
  }
  func.func @transform_0(%arg0: i32, %arg1: i32) -> (i32, i32) {
    %c1_i32 = arith.constant 1 : i32
    %0 = arith.muli %arg1, %c1_i32 : i32
    %1 = arith.addi %0, %arg0 : i32
    %c0_i32 = arith.constant 0 : i32
    %c0_i32_0 = arith.constant 0 : i32
    return %1, %c0_i32 : i32, i32
  }
  func.func @transform_1(%arg0: i32, %arg1: i32) -> (i32, i32) {
    %c0_i32 = arith.constant 0 : i32
    %c0_i32_0 = arith.constant 0 : i32
    %c0_i32_1 = arith.constant 0 : i32
    return %c0_i32, %c0_i32_0 : i32, i32
  }
  func.func @transform_2(%arg0: i32, %arg1: i32) -> (i32, i32) {
    %c0_i32 = arith.constant 0 : i32
    %c0_i32_0 = arith.constant 0 : i32
    return %arg0, %c0_i32 : i32, i32
  }
  func.func @transform_3(%arg0: i32, %arg1: i32) -> (i32, i32) {
    %c0_i32 = arith.constant 0 : i32
    %c0_i32_0 = arith.constant 0 : i32
    return %arg0, %c0_i32 : i32, i32
  }
  func.func @transform_4(%arg0: i32, %arg1: i32) -> (i32, i32) {
    %c0_i32 = arith.constant 0 : i32
    %c0_i32_0 = arith.constant 0 : i32
    return %arg0, %c0_i32 : i32, i32
  }
  func.func @transform_5(%arg0: i32, %arg1: i32) -> (i32, i32) {
    %c0_i32 = arith.constant 0 : i32
    %c0_i32_0 = arith.constant 0 : i32
    return %arg0, %c0_i32 : i32, i32
  }
}

</mosaic_0001>

<bundles_post_ra>
// kernel: tpu_custom_call.1
= control target key start
LH: loop header
LB: loop body
LE: loop exit
PB: predicated region body
PF: predicated region fallthrough
CT: control target
= control target key end

     0   :  { %10 = vsyncpa [#allocation3], 0  ;;  %s3625_s0 = inlined_call_operand.hbm [shape: bf16[256,128], index: 0, kind: input, shape index: {}]   ;;  %s3626_s1 = inlined_call_operand.hbm [shape: bf16[128,256], index: 1, kind: input, shape index: {}]   ;;  %s3627_s2 = inlined_call_operand.hbm [shape: bf16[128,128], index: 2, kind: input, shape index: {}]   ;;  %s3628_s3 = inlined_call_operand.hbm [shape: bf16[128,128], index: 3, kind: input, shape index: {}]   ;;  %s3629_s4 = inlined_call_operand.hbm [shape: f32[128,128], index: 4, kind: input, shape index: {}]   ;;  %s3630_s5 = inlined_call_operand.hbm [shape: f32[8,128], index: 5, kind: output, shape index: {}]  }
   0x1   :  { %12 = vsyncpa [#allocation3 + $0x1], 0 }
   0x2   :  { %13 = vsyncpa [#allocation6], 0 }
   0x3   :  { %14 = vsyncpa [#allocation9], 0 }
   0x4   :  { %15 = vsyncpa [#allocation4], 0  ;;  %s2225_s18 = smov 0   ;;  %s2227_s19 = smov 0  }
   0x5   :  { %s2229_s20 = smov 0   ;;  %s2231_s21 = smov 0  }
   0x6   :  { %s2233_s22 = smov 0   ;;  %s2235_s23 = smov 0  }
   0x7 LB: > { %s3631_s24 = sadd.s32 4294967295, %s2179_s23   ;;  %p55_p0 = scmp.ne.s32.totalorder %s2163_s19, %s2159_s18  ;;  %s2179_s23 = sphi %s2235_s23, %s21_s23   ;;  %s2175_s22 = sphi %s2233_s22, %s3928_s22   ;;  %s2171_s21 = sphi %s2231_s21, %s3927_s21   ;;  %s2167_s20 = sphi %s2229_s20, %s3926_s20   ;;  %s2163_s19 = sphi %s2227_s19, %s3925_s19   ;;  %s2159_s18 = sphi %s2225_s18, %s3924_s18  }
   0x8   : > { %p2257_p1 = scmp.eq.s32.totalorder %s3631_s24, 0  ;;  %p1575_p2 = scmp.ge.s32.totalorder %s2179_s23, 1 }
   0x9   : > { %p191_p3 = scmp.lt.s32.totalorder %s2179_s23, 3  ;;  %s2181_s28 = smov [#allocation5]  }
   0xa   : > { %p2265_p4 = por %p2257_p1, %p55_p0  ;;  %s203_s29 = sshll.u32 %s2181_s28, 4  ;;  %s204_s29 = int_to_ptr.vmem [resolvable:$true] %s203_s29 }
   0xb   : > { %p2269_p5 = pnand %p1575_p2, %p191_p3  ;;  %s2182_s6 = smov [#allocation8]  }
   0xc   : > { %s235_s7 = sshll.u32 %s2182_s6, 4  ;;  %s1972_s8 = scalar_lea.vmem %s204_s29, 2048  ;;  %s236_s7 = int_to_ptr.vmem [resolvable:$true] %s235_s7 }
   0xd   : > { %p1738_p6 = pneg %p2269_p5  ;;  %p1973_p9 = scmp.ne.s32.totalorder %s204_s29, %s1972_s8 }
   0xe   : > { %p1980_p12 = scmp.lt.s32.totalorder %s204_s29, %s204_s29  ;;  %p1981_p13 = scmp.lt.s32.totalorder %s1972_s8, %s1972_s8 }
   0xf   : > { %p2277_p7 = pnand %p1738_p6, %p2257_p1 }
  0x10   : > { %p1982_p0 = por %p1981_p13, %p1980_p12 }
  0x11   : > { %p1963_p8 = pneg %p2277_p7 }
  0x13   : > { %p1975_p10 = pnand %p1973_p9, %p1963_p8 }
  0x15   : > { %p1976_p11 = pneg %p1975_p10 }
  0x17   : > { %p1983_p2 = pnand %p1982_p0, %p1976_p11 }
  0x19   : > { %1986 = shalt.err (!%p1983_p2)
}
  0x1a   : > { %s2183_s9 = smov 128   ;;  %s2184_s10 = smov 8  }
  0x1b   : > { %1741 = dma.hbm_to_vmem [thread:$0]  (!%p2277_p7), %s3626_s1, 2048, %s204_s29, [#allocation6], %s2183_s9, %s2183_s9, %s2184_s10  }
  0x1c   : > { %s2185_s13 = smov [#allocation7]   ;;  %s1998_s15 = scalar_lea.vmem %s236_s7, 1024 }
  0x1d   : > { %s219_s14 = sshll.u32 %s2185_s13, 4  ;;  %p1999_p3 = scmp.ne.s32.totalorder %s236_s7, %s1998_s15  ;;  %s220_s14 = int_to_ptr.vmem [resolvable:$true] %s219_s14 }
  0x1e   : > { %p2006_p10 = scmp.lt.s32.totalorder %s236_s7, %s236_s7  ;;  %p2007_p11 = scmp.lt.s32.totalorder %s1998_s15, %s1998_s15 }
  0x1f   : > { %p2001_p6 = pnand %p1999_p3, %p1963_p8 }
  0x20   : > { %p2008_p12 = por %p2007_p11, %p2006_p10 }
  0x21   : > { %p2002_p9 = pneg %p2001_p6 }
  0x23   : > { %p2009_p13 = pnand %p2008_p12, %p2002_p9 }
  0x25   : > { %2012 = shalt.err (!%p2009_p13)
}
  0x26   : > { %s2186_s16 = smov 64   ;;  %s2187_s17 = smov 4  }
  0x27   : > { %1747 = dma.hbm_to_vmem [thread:$0]  (!%p2277_p7), %s3628_s3, 1024, %s236_s7, [#allocation9], %s2186_s16, %s2186_s16, %s2187_s17  }
  0x28   : > { %s2024_s29 = scalar_lea.vmem %s220_s14, 1024  ;;  %p2032_p6 = scmp.lt.s32.totalorder %s220_s14, %s220_s14 }
  0x29   : > { %p2025_p0 = scmp.ne.s32.totalorder %s220_s14, %s2024_s29  ;;  %p2033_p9 = scmp.lt.s32.totalorder %s2024_s29, %s2024_s29 }
  0x2b   : > { %p2027_p2 = pnand %p2025_p0, %p1963_p8  ;;  %p2034_p10 = por %p2033_p9, %p2032_p6 }
  0x2d   : > { %p2028_p3 = pneg %p2027_p2 }
  0x2f   : > { %p2035_p11 = pnand %p2034_p10, %p2028_p3 }
  0x31   : > { %2038 = shalt.err (!%p2035_p11)
}
  0x32   : > { %1744 = dma.hbm_to_vmem [thread:$0]  (!%p2277_p7), %s3627_s2, 1024, %s220_s14, [#allocation6], %s2186_s16, %s2186_s16, %s2187_s17  }
  0x33   : > { %s2188_s7 = smov [#allocation10]  }
  0x34   : > { %s251_s11 = sshll.u32 %s2188_s7, 4  ;;  %s252_s11 = int_to_ptr.vmem [resolvable:$true] %s251_s11 }
  0x35   : > { %s2050_s12 = scalar_lea.vmem %s252_s11, 2048  ;;  %p2058_p2 = scmp.lt.s32.totalorder %s252_s11, %s252_s11 }
  0x36   : > { %p2051_p12 = scmp.ne.s32.totalorder %s252_s11, %s2050_s12  ;;  %p2059_p3 = scmp.lt.s32.totalorder %s2050_s12, %s2050_s12 }
  0x38   : > { %p2053_p13 = pnand %p2051_p12, %p1963_p8  ;;  %p2060_p6 = por %p2059_p3, %p2058_p2 }
  0x3a   : > { %p2054_p0 = pneg %p2053_p13 }
  0x3c   : > { %p2061_p9 = pnand %p2060_p6, %p2054_p0 }
  0x3e   : > { %2064 = shalt.err (!%p2061_p9)
}
  0x3f   : > { %1750 = dma.hbm_to_vmem [thread:$0]  (!%p2277_p7), %s3629_s4, 2048, %s252_s11, [#allocation9], %s2183_s9, %s2183_s9, %s2184_s10  }
  0x40   : > { %s30_s15 = sadd.s32 1, %s2175_s22  ;;  %s42_s18 = sadd.s32 1, %s2167_s20 }
  0x41   : > { %p31_p8 = scmp.ge.s32.totalorder %s30_s15, 2  ;;  %p49_p10 = scmp.ne.s32.totalorder %s2167_s20, %s2163_s19 }
  0x42   : > { %p50_p11 = scmp.eq.s32.totalorder %s2179_s23, 0  ;;  %p1759_p12 = scmp.lt.s32.totalorder %s2179_s23, 2 }
  0x43   : > { %s3930_s15 = smov (%p31_p8, %s30_s15), 0  ;;  %s265_s30 = sand.u32 1, %s2167_s20  }
  0x44   : > { %p51_p13 = por %p50_p11, %p49_p10  ;;  %s39_s28 = ssub.s32 %s2175_s22, %s3930_s15 }
  0x45   : > { %p40_p0 = scmp.eq.s32.totalorder %s39_s28, 0  ;;  %s1581_s29 = sshll.u32 %s265_s30, 6 }
  0x46   : > { %s1619_s6 = sshll.u32 %s2175_s22, 10  ;;  %s269_s11 = scalar_lea.vmem [#allocation2], %s1581_s29 }
  0x47   : > { %s2340_s8 = scalar_select %p40_p0, %s2167_s20, %s42_s18  }
  0x48   : > { %s276_s10 = scalar_lea.hbm %s3625_s0, %s1619_s6  ;;  %s277_s12 = sshll.u32 %s269_s11, 4  ;;  %s278_s12 = int_to_ptr.vmem [resolvable:$true] %s277_s12 }
  0x49   : > { %p2347_p7 = pnand %p1759_p12, %p51_p13  ;;  %s266_s14 = scalar_lea.sflag [#allocation3], %s265_s30 }
  0x4a   : > { %s2078_s28 = scalar_lea.vmem %s278_s12, 1024  ;;  %s2189_s18 = smov [#allocation2]  }
  0x4b   : > { %p2067_p2 = pneg %p2347_p7  ;;  %p2079_p3 = scmp.ne.s32.totalorder %s278_s12, %s2078_s28 }
  0x4c   : > { %s2083_s24 = sshll.u32 %s2189_s18, 4  ;;  %s2084_s24 = int_to_ptr.vmem [resolvable:$false] %s2083_s24 }
  0x4d   : > { %p2081_p6 = pnand %p2079_p3, %p2067_p2  ;;  %s2085_s6 = scalar_lea.vmem %s2084_s24, 2048 }
  0x4e   : > { %p2086_p8 = scmp.lt.s32.totalorder %s278_s12, %s2084_s24  ;;  %p2087_p10 = scmp.lt.s32.totalorder %s2085_s6, %s2078_s28 }
  0x4f   : > { %p2082_p9 = pneg %p2081_p6 }
  0x50   : > { %p2088_p11 = por %p2087_p10, %p2086_p8 }
  0x52   : > { %p2089_p0 = pnand %p2088_p11, %p2082_p9 }
  0x54   : > { %2092 = shalt.err (!%p2089_p0)
}
  0x55   : > { %1754 = dma.hbm_to_vmem [thread:$0]  (!%p2347_p7), %s276_s10, 1024, %s278_s12, %s266_s14, %s2186_s16, %s2186_s16, %s2187_s17  }
  0x56   : > { %289 = sbr.rel (%p2269_p5) target bundleno = 1200 (0x4b0), region = 40 }
  0x5b   : > { %s291_s30 = sand.u32 1, %s2163_s19  }
  0x5c   : > { %s1585_s29 = sshll.u32 %s291_s30, 6  ;;  %s292_s7 = scalar_lea.sflag [#allocation3], %s291_s30 }
  0x5d   : > { %s2361_s9 = scalar_lea.vmem [#allocation2], %s1585_s29 }
  0x5e   : > { %2142 = dma.done.wait (%p2265_p4), %s292_s7, 1024  }
  0x5f   : > { %2144 = vsyncadd (%p2265_p4), %s292_s7, 4294966272 }
  0x60   : > { %2146 = dma.done.wait (%p2257_p1), [#allocation6], 3072  }
  0x61   : > { %2148 = vsyncadd (%p2257_p1), [#allocation6], 4294964224 }
  0x62   : > { %2150 = dma.done.wait (%p2257_p1), [#allocation9], 3072  }
  0x63   : > { %2152 = vsyncadd (%p2257_p1), [#allocation9], 4294964224  ;;  %v2190_v0 = vmov 0   ;;  %v1827_v1 = vld [vmem:[#allocation5 + $0x74] ss:$8 sps:$4 sm:$0xff]   ;;  %v1011_v12 = vld [vmem:[#allocation10 + $0x8] sm:$0xff] }
  0x64   : > { %531 = vmatprep.mubr.bf16.mxu0 %v2190_v0  ;;  %571 = vmatprep.mubr.bf16.mxu1 %v2190_v0  ;;  %v1829_v2 = vld [vmem:[#allocation5 + $0x70] ss:$8 sps:$4 sm:$0xff]   ;;  %v1830_v3 = vld [vmem:[#allocation5 + $0x64] ss:$8 sps:$4 sm:$0xff]   ;;  %v1832_v4 = vld [vmem:[#allocation5 + $0x60] ss:$8 sps:$4 sm:$0xff]  }
  0x65   : > { %499 = vmatprep.subr.bf16.mxu0 %v1827_v1  ;;  %1698 = vmatprep.subr.bf16.mxu1 %v1827_v1  ;;  %v1833_v5 = vld [vmem:[#allocation5 + $0x54] ss:$8 sps:$4 sm:$0xff]   ;;  %v1835_v6 = vld [vmem:[#allocation5 + $0x50] ss:$8 sps:$4 sm:$0xff]   ;;  %v1836_v7 = vld [vmem:[#allocation5 + $0x44] ss:$8 sps:$4 sm:$0xff]  }
  0x66   : > { %500 = vmatpush1.bf16.msra.mxu0 %v1829_v2  ;;  %1706 = vmatpush1.bf16.msra.mxu1 %v1829_v2  ;;  %v1838_v8 = vld [vmem:[#allocation5 + $0x40] ss:$8 sps:$4 sm:$0xff]   ;;  %v1839_v9 = vld [vmem:[#allocation5 + $0x34] ss:$8 sps:$4 sm:$0xff]   ;;  %v1841_v10 = vld [vmem:[#allocation5 + $0x30] ss:$8 sps:$4 sm:$0xff]  }
  0x67   : > { %501 = vmatprep.subr.bf16.mxu0 %v1830_v3  ;;  %1699 = vmatprep.subr.bf16.mxu1 %v1830_v3  ;;  %v1842_v11 = vld [vmem:[#allocation5 + $0x24] ss:$8 sps:$4 sm:$0xff]   ;;  %v1844_v13 = vld [vmem:[#allocation5 + $0x20] ss:$8 sps:$4 sm:$0xff]   ;;  %v1845_v15 = vld [vmem:[#allocation5 + $0x14] ss:$8 sps:$4 sm:$0xff]  }
  0x68   : > { %v1010_v14 = vld [vmem:[#allocation10] sm:$0xff]  ;;  %s2191_s24 = smov 1   ;;  %v1012_v16 = vld [vmem:[#allocation10 + $0x10] sm:$0xff]  ;;  %v1013_v17 = vld [vmem:[#allocation10 + $0x18] sm:$0xff]  ;;  %p842_p1 = scmp.eq.s32.totalorder %s2171_s21, 0 }
  0x69   : > { %1284 = vrot.lane.b32.xlu0 %v1011_v12, %s2191_s24  ;;  %1282 = vrot.lane.b32.xlu1 %v1010_v14, %s2191_s24  ;;  %v1847_v18 = vld [vmem:[#allocation5 + $0x10] ss:$8 sps:$4 sm:$0xff]   ;;  %v1848_v19 = vld [vmem:[#allocation5 + $0x4] ss:$8 sps:$4 sm:$0xff]   ;;  %v1850_v21 = vld [vmem:[#allocation5] ss:$8 sps:$4 sm:$0xff]  }
  0x6a   : > { %502 = vmatpush1.bf16.msra.mxu0 %v1832_v4  ;;  %1707 = vmatpush1.bf16.msra.mxu1 %v1832_v4  ;;  %v1014_v20 = vld [vmem:[#allocation10 + $0x20] sm:$0xff]  ;;  %v1853_v24 = vld [vmem:[%s2361_s9 + $0x8] sm:$0xff]   ;;  %v1855_v26 = vld [vmem:[%s2361_s9 + $0x10] sm:$0xff]   ;;  %p910_p4 = scmp.eq.s32.totalorder %s2171_s21, 1  ;;  %s2192_s27 = smov 127  }
  0x6b   : > { %503 = vmatprep.subr.bf16.mxu0 %v1833_v5  ;;  %1700 = vmatprep.subr.bf16.mxu1 %v1833_v5  ;;  %v1851_v22 = vld [vmem:[%s2361_s9] sm:$0xff]   ;;  %v1854_v25 = vld [vmem:[%s2361_s9 + $0x28] sm:$0xff]   ;;  %v1856_v27 = vld [vmem:[%s2361_s9 + $0x30] sm:$0xff]   ;;  %s843_s25 = scalar_select %p842_p1, 1, 0 }
  0x6c   : > { %v1852_v23 = vld [vmem:[%s2361_s9 + $0x20] sm:$0xff]   ;;  %v1857_v28 = vld [vmem:[%s2361_s9 + $0x18] sm:$0xff]   ;;  %s911_s26 = scalar_select %p910_p4, 1, 0 }
  0x6d   : > { %1286 = vrot.lane.b32.xlu0 %v1012_v16, %s2191_s24  ;;  %1288 = vrot.lane.b32.xlu1 %v1013_v17, %s2191_s24  ;;  %v1858_v29 = vld [vmem:[%s2361_s9 + $0x38] sm:$0xff]   ;;  %p1614_p5 = scmp.ne.s32.totalorder %s2171_s21, 0 }
  0x6e   : > { %504 = vmatpush1.bf16.msra.mxu0 %v1835_v6  ;;  %1708 = vmatpush1.bf16.msra.mxu1 %v1835_v6 }
  0x6f   : > { %505 = vmatprep.subr.bf16.mxu0 %v1836_v7  ;;  %1701 = vmatprep.subr.bf16.mxu1 %v1836_v7 }
  0x71   : > { %1290 = vrot.lane.b32.xlu0 %v1014_v20, %s2191_s24 }
  0x72   : > { %506 = vmatpush1.bf16.msra.mxu0 %v1838_v8  ;;  %1709 = vmatpush1.bf16.msra.mxu1 %v1838_v8 }
  0x73   : > { %507 = vmatprep.subr.bf16.mxu0 %v1839_v9  ;;  %1702 = vmatprep.subr.bf16.mxu1 %v1839_v9 }
  0x76   : > { %508 = vmatpush1.bf16.msra.mxu0 %v1841_v10  ;;  %1710 = vmatpush1.bf16.msra.mxu1 %v1841_v10 }
  0x77   : > { %509 = vmatprep.subr.bf16.mxu0 %v1842_v11  ;;  %1703 = vmatprep.subr.bf16.mxu1 %v1842_v11 }
  0x7a   : > { %510 = vmatpush1.bf16.msra.mxu0 %v1844_v13  ;;  %1711 = vmatpush1.bf16.msra.mxu1 %v1844_v13 }
  0x7b   : > { %511 = vmatprep.subr.bf16.mxu0 %v1845_v15  ;;  %1704 = vmatprep.subr.bf16.mxu1 %v1845_v15 }
  0x7e   : > { %512 = vmatpush1.bf16.msra.mxu0 %v1847_v18  ;;  %1712 = vmatpush1.bf16.msra.mxu1 %v1847_v18 }
  0x7f   : > { %513 = vmatprep.subr.bf16.mxu0 %v1848_v19  ;;  %1705 = vmatprep.subr.bf16.mxu1 %v1848_v19 }
  0x82   : > { %514 = vmatpush1.bf16.msra.mxu0 %v1850_v21  ;;  %1713 = vmatpush1.bf16.msra.mxu1 %v1850_v21 }
  0x85   : > { %532 = vmatmul.mubr.bf16.vlgmr.msra.gmra.mxu0 %v1851_v22  ;;  %572 = vmatmul.mubr.bf16.vlgmr.msra.gmra.mxu1 %v1852_v23 }
  0x86   : > { %541 = vmatprep.mubr.bf16.mxu0 %v2190_v0  ;;  %581 = vmatprep.mubr.bf16.mxu1 %v2190_v0 }
  0x8d   : > { %542 = vmatmul.mubr.bf16.gmra.mxu0 %v1853_v24  ;;  %582 = vmatmul.mubr.bf16.gmra.mxu1 %v1854_v25 }
  0x8e   : > { %551 = vmatprep.mubr.bf16.mxu0 %v2190_v0  ;;  %591 = vmatprep.mubr.bf16.mxu1 %v2190_v0 }
  0x95   : > { %552 = vmatmul.mubr.bf16.gmra.mxu0 %v1855_v26  ;;  %592 = vmatmul.mubr.bf16.gmra.mxu1 %v1856_v27 }
  0x96   : > { %561 = vmatprep.mubr.bf16.mxu0 %v2190_v0  ;;  %601 = vmatprep.mubr.bf16.mxu1 %v2190_v0 }
  0x9d   : > { %562 = vmatmul.mubr.bf16.gmra.mxu0 %v1857_v28  ;;  %602 = vmatmul.mubr.bf16.gmra.mxu1 %v1858_v29 }
 0x145   : > { %v533_v30 = vpop.f32.mrf.mxu0  ;;  %v573_v31 = vpop.f32.mrf.mxu1 }
 0x146   : > { %v2396_v34 = vmul.f32 14.285714, %v533_v30  ;;  %v2400_v38 = vmul.f32 14.285714, %v573_v31 }
 0x147   : > { %v535_v32 = vpop.f32.mrf.mxu0  ;;  %v575_v33 = vpop.f32.mrf.mxu1 }
 0x148   : > { %v2398_v35 = vmul.f32 14.285714, %v535_v32  ;;  %v2402_v39 = vmul.f32 14.285714, %v575_v33 }
 0x149   : > { %v537_v36 = vpop.f32.mrf.mxu0  ;;  %v577_v37 = vpop.f32.mrf.mxu1 }
 0x14a   : > { %v644_v40 = vmax.f32 %v2396_v34, %v2398_v35  ;;  %v2406_v43 = vmul.f32 14.285714, %v577_v37  ;;  %v668_v49 = vmax.f32 %v2400_v38, %v2402_v39  ;;  %v2416_v52 = vmul.f32 14.285714, %v537_v36 }
 0x14b   : > { %v539_v41 = vpop.f32.mrf.mxu0  ;;  %v579_v42 = vpop.f32.mrf.mxu1 }
 0x14c   : > { %v2408_v44 = vmul.f32 14.285714, %v579_v42  ;;  %645 = vmax.xlane.f32.xlu0 %v644_v40  ;;  %v2410_v47 = vmul.f32 14.285714, %v539_v41 }
 0x14d   : > { %v543_v45 = vpop.f32.mrf.mxu0  ;;  %v583_v46 = vpop.f32.mrf.mxu1 }
 0x14e   : > { %v671_v48 = vmax.f32 %v2406_v43, %v2408_v44  ;;  %v2418_v53 = vmul.f32 14.285714, %v543_v45  ;;  %v2422_v57 = vmul.f32 14.285714, %v583_v46  ;;  %v647_v59 = vmax.f32 %v2416_v52, %v2410_v47 }
 0x14f   : > { %v545_v50 = vpop.f32.mrf.mxu0  ;;  %v585_v51 = vpop.f32.mrf.mxu1 }
 0x150   : > { %v2420_v54 = vmul.f32 14.285714, %v545_v50  ;;  %672 = vmax.xlane.f32.xlu1 %v671_v48  ;;  %669 = vmax.xlane.f32.xlu0 %v668_v49  ;;  %v2424_v58 = vmul.f32 14.285714, %v585_v51 }
 0x151   : > { %v547_v55 = vpop.f32.mrf.mxu0  ;;  %v587_v56 = vpop.f32.mrf.mxu1 }
 0x152   : > { %v650_v60 = vmax.f32 %v2418_v53, %v2420_v54  ;;  %v2430_v63 = vmul.f32 14.285714, %v547_v55  ;;  %v674_v4 = vmax.f32 %v2422_v57, %v2424_v58  ;;  %v2440_v8 = vmul.f32 14.285714, %v587_v56  ;;  %v1015_v56 = vld [vmem:[#allocation10 + $0x28] sm:$0xff] }
 0x153   : > { %v549_v61 = vpop.f32.mrf.mxu0  ;;  %v589_v62 = vpop.f32.mrf.mxu1 }
 0x154   : > { %v2432_v0 = vmul.f32 14.285714, %v549_v61  ;;  %648 = vmax.xlane.f32.xlu0 %v647_v59  ;;  %651 = vmax.xlane.f32.xlu1 %v650_v60  ;;  %v2434_v3 = vmul.f32 14.285714, %v589_v62  ;;  %v2493_v59 = vpop.permute.xlu0 %1284  ;;  %v788_v60 = vlaneseq }
 0x155   : > { %v553_v1 = vpop.f32.mrf.mxu0  ;;  %v593_v2 = vpop.f32.mrf.mxu1  ;;  %3674 = vst [vmem:[#allocation21_spill] sm:$0xff] %v2493_v59 }
 0x156   : > { %v653_v5 = vmax.f32 %v2430_v63, %v2432_v0  ;;  %v2442_v9 = vmul.f32 14.285714, %v553_v1  ;;  %v2446_v13 = vmul.f32 14.285714, %v593_v2  ;;  %v677_v15 = vmax.f32 %v2440_v8, %v2434_v3 }
 0x157   : > { %v555_v6 = vpop.f32.mrf.mxu0  ;;  %v595_v7 = vpop.f32.mrf.mxu1  ;;  %v2499_v62 = vand.u32 127, %v788_v60  ;;  %v2501_v1 = vshrl.u32 %v788_v60, 7  ;;  %v844_v2 = vstv %s843_s25 }
 0x158   : > { %v2444_v10 = vmul.f32 14.285714, %v555_v6  ;;  %675 = vmax.xlane.f32.xlu0 %v674_v4  ;;  %654 = vmax.xlane.f32.xlu1 %v653_v5  ;;  %v2448_v14 = vmul.f32 14.285714, %v595_v7  ;;  %v2497_v61 = vpop.permute.xlu0 %1286  ;;  %v2503_v4 = vpop.permute.xlu1 %1282  ;;  %v912_v5 = vstv %s911_s26  ;;  %vm2509_vm1 = vcmp.eq.s32.totalorder %v844_v2, 1 }
 0x159   : > { %v557_v11 = vpop.f32.mrf.mxu0  ;;  %v597_v12 = vpop.f32.mrf.mxu1  ;;  %3675 = vst [vmem:[#allocation22_spill] sm:$0xff] %v2497_v61  ;;  %3676 = vst [vmem:[#allocation23_spill] sm:$0xff] %v2501_v1  ;;  %vm825_vm0 = vcmp.eq.s32.totalorder %v2499_v62, %v2501_v1  ;;  %v3679_v7 = vmov 0  ;;  %vm2513_vm2 = vcmp.eq.s32.totalorder %v912_v5, 1  ;;  %v2572_v5 = vadd.s32 24, %v2501_v1 }
 0x15a   : > { %v656_v16 = vmax.f32 %v2442_v9, %v2444_v10  ;;  %v2454_v19 = vmul.f32 14.285714, %v557_v11  ;;  %v680_v25 = vmax.f32 %v2446_v13, %v2448_v14  ;;  %v2466_v27 = vmul.f32 14.285714, %v597_v12  ;;  %3677 = vst [vmem:[#allocation24_spill] sm:$0xff] %v2503_v4  ;;  %vm2520_vm3 = vmand %vm825_vm0, %vm2509_vm1 }
 0x15b   : > { %v559_v17 = vpop.f32.mrf.mxu0  ;;  %v599_v18 = vpop.f32.mrf.mxu1  ;;  %v3680_v7 = vsel %vm2509_vm1, 4294967295, %v3679_v7  ;;  %v799_v12 = vadd.s32 64, %v2501_v1  ;;  %vm2530_vm4 = vmand %vm825_vm0, %vm2513_vm2  ;;  %v2614_v59 = vadd.s32 40, %v2501_v1 }
 0x15c   : > { %v2456_v20 = vmul.f32 14.285714, %v559_v17  ;;  %678 = vmax.xlane.f32.xlu1 %v677_v15  ;;  %657 = vmax.xlane.f32.xlu0 %v656_v16  ;;  %v2458_v23 = vmul.f32 14.285714, %v599_v18  ;;  %v2505_v6 = vpop.permute.xlu0 %1290  ;;  %v2524_v16 = vld [vmem:[#allocation7] sm:$0xff]   ;;  %v2526_v17 = vpop.permute.xlu1 %1288 }
 0x15d   : > { %v563_v21 = vpop.f32.mrf.mxu0  ;;  %v603_v22 = vpop.f32.mrf.mxu1  ;;  %3678 = vst [vmem:[#allocation25_spill] sm:$0xff] %v2505_v6  ;;  %3685 = vst [vmem:[#allocation26_spill] sm:$0xff] %v2526_v17  ;;  %vm833_vm5 = vcmp.eq.s32.totalorder %v2499_v62, %v799_v12  ;;  %v2574_v12 = vld [vmem:[#allocation7 + $0x8] sm:$0xff]  }
 0x15e   : > { %v2460_v24 = vmul.f32 14.285714, %v563_v21  ;;  %v659_v26 = vmax.f32 %v2454_v19, %v2456_v20  ;;  %v2470_v31 = vmul.f32 14.285714, %v603_v22  ;;  %v683_v40 = vmax.f32 %v2466_v27, %v2458_v23  ;;  %vm2552_vm7 = vmand %vm833_vm5, %vm2509_vm1 }
 0x15f   : > { %v565_v28 = vpop.f32.mrf.mxu0  ;;  %v605_v29 = vpop.f32.mrf.mxu1  ;;  %v800_v22 = vadd.s32 72, %v2501_v1  ;;  %vm2558_vm8 = vmand %vm833_vm5, %vm2513_vm2 }
 0x160   : > { %v2468_v30 = vmul.f32 14.285714, %v565_v28  ;;  %681 = vmax.xlane.f32.xlu0 %v680_v25  ;;  %660 = vmax.xlane.f32.xlu1 %v659_v26  ;;  %3670 = vst [vmem:[#allocation17_spill] sm:$0xff] %v2470_v31  ;;  %v2472_v32 = vmul.f32 14.285714, %v605_v29  ;;  %v792_v28 = vadd.s32 8, %v2501_v1 }
 0x161   : > { %v567_v33 = vpop.f32.mrf.mxu0  ;;  %v607_v36 = vpop.f32.mrf.mxu1  ;;  %v2540_v29 = vadd.s32 16, %v2501_v1  ;;  %vm834_vm6 = vcmp.eq.s32.totalorder %v2499_v62, %v800_v22  ;;  %v2611_v22 = vadd.s32 96, %v2501_v1 }
 0x162   : > { %3669 = vst [vmem:[#allocation16_spill] sm:$0xff] %v2468_v30  ;;  %3671 = vst [vmem:[#allocation18_spill] sm:$0xff] %v2472_v32  ;;  %v2474_v37 = vmul.f32 14.285714, %v567_v33  ;;  %v662_v41 = vmax.f32 %v2460_v24, %v2468_v30  ;;  %v2482_v48 = vmul.f32 14.285714, %v607_v36  ;;  %v686_v50 = vmax.f32 %v2470_v31, %v2472_v32 }
 0x163   : > { %v569_v42 = vpop.f32.mrf.mxu0  ;;  %v609_v45 = vpop.f32.mrf.mxu1  ;;  %v1622_v33 = vunpack.c.l.bf16 %v2524_v16  ;;  %v2543_v36 = vld [vmem:[#allocation7 + $0x20] sm:$0xff]   ;;  %vm826_vm9 = vcmp.eq.s32.totalorder %v2499_v62, %v792_v28  ;;  %vm827_vm10 = vcmp.eq.s32.totalorder %v2499_v62, %v2540_v29  ;;  %vm2580_vm11 = vmand %vm834_vm6, %vm2509_vm1 }
 0x164   : > { %v2480_v46 = vmul.f32 14.285714, %v569_v42  ;;  %684 = vmax.xlane.f32.xlu1 %v683_v40  ;;  %663 = vmax.xlane.f32.xlu0 %v662_v41  ;;  %3672 = vst [vmem:[#allocation19_spill] sm:$0xff] %v2482_v48  ;;  %v2484_v49 = vmul.f32 14.285714, %v609_v45  ;;  %vm2596_vm12 = vmand %vm834_vm6, %vm2513_vm2 }
 0x165   : > { %vm2632_vm14 = vmand %vm826_vm9, %vm2509_vm1 }
 0x166   : > { %3673 = vst [vmem:[#allocation20_spill] sm:$0xff] %v2484_v49  ;;  %v665_v51 = vmax.f32 %v2474_v37, %v2480_v46  ;;  %v689_v55 = vmax.f32 %v2482_v48, %v2484_v49  ;;  %v2641_v48 = vadd.s32 48, %v2501_v1  ;;  %vm2648_vm0 = vmand %vm826_vm9, %vm2513_vm2 }
 0x167   : > { %vm2676_vm6 = vmand %vm827_vm10, %vm2509_vm1 }
 0x168   : > { %687 = vmax.xlane.f32.xlu0 %v686_v50  ;;  %666 = vmax.xlane.f32.xlu1 %v665_v51  ;;  %v3691_v50 = vmov 0  ;;  %3703 = vst [vmem:[#allocation32_spill] sm:$0xff] %v2641_v48  ;;  %vm2691_vm5 = vmand %vm827_vm10, %vm2513_vm2 }
 0x169   : > { %v3692_v50 = vsel %vm2558_vm8, 4294967295, %v3691_v50 }
 0x16a   : > { %3693 = vst [vmem:[#allocation28_spill] sm:$0xff] %v3692_v50 }
 0x16c   : > { %690 = vmax.xlane.f32.xlu1 %v689_v55  ;;  %v2565_v55 = vadd.s32 80, %v2501_v1 }
 0x16e   : > { %vm835_vm13 = vcmp.eq.s32.totalorder %v2499_v62, %v2565_v55  ;;  %v3717_v55 = vmov 0 }
 0x16f   : > { %vm2712_vm10 = vmand %vm835_vm13, %vm2509_vm1 }
 0x170   : > { %vm2730_vm15 = vmand %vm835_vm13, %vm2513_vm2  ;;  %vm3716_vm13 = vcmp.eq.s32.totalorder %v2499_v62, %v2572_v5 }
 0x171   : > { %vm2746_vm9 = vmand %vm3716_vm13, %vm2509_vm1 }
 0x172   : > { %v3718_v55 = vsel %vm2746_vm9, 4294967295, %v3717_v55 }
 0x17e   : > { %1292 = vrot.lane.b32.xlu0 %v1015_v56, %s2191_s24  ;;  %v1638_v56 = vunpack.c.l.bf16 %v2543_v36 }
 0x1d5   : > { %v646_v21 = vpop.xlane.xlu0 %645 }
 0x1d6   : > { %v692_v25 = vsub.f32 %v2396_v34, %v646_v21  ;;  %v693_v26 = vsub.f32 %v2398_v35, %v646_v21  ;;  %v3688_v35 = vmov 0 }
 0x1d7   : > { %v3689_v35 = vsel %vm2552_vm7, 4294967295, %v3688_v35 }
 0x1d8   : > { %v862_v40 = vsel %vm2520_vm3, 0.0, %v692_v25  ;;  %v930_v41 = vsel %vm2530_vm4, 0.0, %v693_v26  ;;  %3690 = vst [vmem:[#allocation27_spill] sm:$0xff] %v3689_v35  ;;  %v724_v17 = vmul.f32 1.442695, %v692_v25  ;;  %v2622_v25 = vld [vmem:[#allocation7 + $0x30] sm:$0xff]  }
 0x1d9   : > { %v673_v34 = vpop.xlane.xlu1 %672  ;;  %v670_v42 = vpop.xlane.xlu0 %669  ;;  %v978_v45 = vadd.f32 %v930_v41, %v862_v40  ;;  %v2590_v41 = vld [vmem:[#allocation7 + $0x28] sm:$0xff]   ;;  %v2605_v40 = vadd.s32 32, %v2501_v1  ;;  %v726_v4 = vmul.f32 1.442695, %v693_v26  ;;  %3700 = vst [vmem:[#allocation31_spill] sm:$0xff] %v2622_v25 }
 0x1da   : > { %v708_v51 = vsub.f32 %v2400_v38, %v670_v42  ;;  %v709_v60 = vsub.f32 %v2402_v39, %v670_v42  ;;  %v710_v21 = vsub.f32 %v2406_v43, %v673_v34  ;;  %v711_v39 = vsub.f32 %v2408_v44, %v673_v34 }
 0x1db   : > { %v1058_v2 = vmul.f32 %v1622_v33, %v978_v45  ;;  %v2588_v33 = vadd.s32 88, %v2501_v1  ;;  %v3696_v42 = vmov 0  ;;  %1859 = vpow2.f32 %v724_v17 }
 0x1dc   : > { %v3697_v42 = vsel %vm2596_vm12, 4294967295, %v3696_v42  ;;  %v870_v43 = vsel %vm2552_vm7, 0.0, %v708_v51  ;;  %v938_v44 = vsel %vm2558_vm8, 0.0, %v709_v60  ;;  %v760_v31 = vmul.f32 1.442695, %v710_v21 }
 0x1dd   : > { %3698 = vst [vmem:[#allocation29_spill] sm:$0xff] %v3697_v42  ;;  %v649_v34 = vpop.xlane.xlu0 %648  ;;  %v652_v45 = vpop.xlane.xlu1 %651  ;;  %1074 = vadd.xlane.f32.xlu1 %v1058_v2  ;;  %v2618_v2 = vadd.s32 104, %v2501_v1  ;;  %v871_v50 = vsel %vm2580_vm11, 0.0, %v710_v21  ;;  %v939_v49 = vsel %vm2596_vm12, 0.0, %v711_v39  ;;  %v986_v35 = vadd.f32 %v938_v44, %v870_v43 }
 0x1de   : > { %v694_v6 = vsub.f32 %v2416_v52, %v649_v34  ;;  %v695_v32 = vsub.f32 %v2410_v47, %v649_v34  ;;  %v762_v44 = vmul.f32 1.442695, %v711_v39  ;;  %v2654_v34 = vadd.s32 56, %v2501_v1 }
 0x1df   : > { %3699 = vst [vmem:[#allocation30_spill] sm:$0xff] %v2618_v2  ;;  %1861 = vpow2.f32 %v726_v4  ;;  %v756_v2 = vmul.f32 1.442695, %v708_v51  ;;  %v696_v48 = vsub.f32 %v2418_v53, %v652_v45  ;;  %v987_v43 = vadd.f32 %v939_v49, %v871_v50  ;;  %v2669_v50 = vld [vmem:[#allocation8] sm:$0xff]  }
 0x1e0   : > { %1863 = vpow2.f32 %v760_v31  ;;  %v758_v17 = vmul.f32 1.442695, %v709_v60  ;;  %v697_v28 = vsub.f32 %v2420_v54, %v652_v45  ;;  %v1066_v39 = vmul.f32 %v1638_v56, %v986_v35 }
 0x1e1   : > { %v676_v61 = vpop.xlane.xlu0 %675  ;;  %v655_v21 = vpop.xlane.xlu1 %654  ;;  %v728_v42 = vmul.f32 1.442695, %v694_v6  ;;  %v863_v47 = vsel %vm2632_vm14, 0.0, %v694_v6  ;;  %v931_v30 = vsel %vm2648_vm0, 0.0, %v695_v32  ;;  %1865 = vpow2.f32 %v762_v44 }
 0x1e2   : > { %v2665_v4 = vsub.f32 %v2422_v57, %v676_v61  ;;  %v730_v31 = vmul.f32 1.442695, %v695_v32  ;;  %v3706_v54 = vmov 0  ;;  %v2681_v6 = vsub.f32 %v2430_v63, %v655_v21  ;;  %1090 = vadd.xlane.f32.xlu0 %v1066_v39  ;;  %v2754_v39 = vld [vmem:[#allocation8 + $0x20] sm:$0xff]  }
 0x1e3   : > { %v3707_v54 = vsel %vm2676_vm6, 4294967295, %v3706_v54  ;;  %1867 = vpow2.f32 %v756_v2  ;;  %v3708_v32 = vmov 0  ;;  %v732_v35 = vmul.f32 1.442695, %v696_v48 }
 0x1e4   : > { %v3709_v32 = vsel %vm2691_vm5, 4294967295, %v3708_v32  ;;  %v2696_v63 = vsub.f32 %v2432_v0, %v655_v21  ;;  %v3710_v51 = vunpack.c.h.bf16 %v2543_v36  ;;  %1869 = vpow2.f32 %v758_v17 }
 0x1e5   : > { %v679_v53 = vpop.xlane.xlu1 %678  ;;  %v2667_v49 = vpop.xlane.xlu0 %657  ;;  %v734_v60 = vmul.f32 1.442695, %v697_v28  ;;  %v979_v29 = vadd.f32 %v931_v30, %v863_v47  ;;  %1871 = vpow2.f32 %v728_v42  ;;  %v864_v2 = vsel %vm2676_vm6, 0.0, %v696_v48 }
 0x1e6   : > { %v1067_v56 = vmul.f32 %v3710_v51, %v987_v43  ;;  %v2701_v45 = vsub.f32 %v2440_v8, %v679_v53  ;;  %v3711_v0 = vmov 0  ;;  %v764_v8 = vmul.f32 1.442695, %v2665_v4 }
 0x1e7   : > { %v3712_v0 = vsel %vm2712_vm10, 4294967295, %v3711_v0  ;;  %v2718_v36 = vsub.f32 %v2434_v3, %v679_v53  ;;  %1873 = vpow2.f32 %v730_v31  ;;  %v932_v48 = vsel %vm2691_vm5, 0.0, %v697_v28 }
 0x1e8   : > { %1092 = vadd.xlane.f32.xlu1 %v1067_v56  ;;  %v713_v42 = vsub.f32 %v2424_v58, %v676_v61  ;;  %v736_v21 = vmul.f32 1.442695, %v2681_v6  ;;  %1875 = vpow2.f32 %v732_v35  ;;  %v3713_v3 = vmov 0 }
 0x1e9   : > { %v661_v30 = vpop.xlane.xlu1 %660  ;;  %v3714_v3 = vsel %vm2730_vm15, 4294967295, %v3713_v3  ;;  %v738_v43 = vmul.f32 1.442695, %v2696_v63  ;;  %v3715_v44 = vunpack.c.h.bf16 %v2524_v16  ;;  %v682_v17 = vpop.xlane.xlu0 %681  ;;  %1877 = vpow2.f32 %v734_v60 }
 0x1ea   : > { %v872_v61 = vsel %vm2712_vm10, 0.0, %v2665_v4  ;;  %v768_v16 = vmul.f32 1.442695, %v2701_v45  ;;  %v2752_v28 = vadd.s32 120, %v2501_v1  ;;  %1879 = vpow2.f32 %v764_v8  ;;  %vm3719_vm10 = vmmov %vm3716_vm13 }
 0x1eb   : > { %v1059_v47 = vmul.f32 %v3715_v44, %v979_v29  ;;  %vm2761_vm5 = vmand %vm3719_vm10, %vm2513_vm2  ;;  %v3720_v4 = vmov 0  ;;  %v770_v53 = vmul.f32 1.442695, %v2718_v36  ;;  %v2768_v31 = vsub.f32 %v2442_v9, %v2667_v49  ;;  %v2787_v29 = vpop.eup %1859 }
 0x1ec   : > { %v3721_v4 = vsel %vm2761_vm5, 4294967295, %v3720_v4  ;;  %v980_v35 = vadd.f32 %v932_v48, %v864_v2  ;;  %v940_v5 = vsel %vm2730_vm15, 0.0, %v713_v42  ;;  %1881 = vpow2.f32 %v736_v21 }
 0x1ed   : > { %1076 = vadd.xlane.f32.xlu0 %v1059_v47  ;;  %v2772_v51 = vpop.xlane.xlu1 %684  ;;  %vm3722_vm10 = vcmp.eq.s32.totalorder %v2499_v62, %v2611_v22  ;;  %v3723_v56 = vmov 0  ;;  %v716_v9 = vsub.f32 %v2446_v13, %v682_v17  ;;  %v717_v60 = vsub.f32 %v2448_v14, %v682_v17  ;;  %v2804_v14 = vpop.eup %1861 }
 0x1ee   : > { %vm2781_vm6 = vmand %vm3722_vm10, %vm2509_vm1  ;;  %v766_v2 = vmul.f32 1.442695, %v713_v42  ;;  %1883 = vpow2.f32 %v738_v43  ;;  %v865_v8 = vsel %vm2746_vm9, 0.0, %v2681_v6  ;;  %v3726_v48 = vmov 0  ;;  %v2814_v43 = vpop.eup %1863 }
 0x1ef   : > { %v3724_v56 = vsel %vm2781_vm6, 4294967295, %v3723_v56  ;;  %vm2797_vm13 = vmand %vm3722_vm10, %vm2513_vm2  ;;  %v933_v6 = vsel %vm2761_vm5, 0.0, %v2696_v63  ;;  %1885 = vpow2.f32 %v768_v16  ;;  %v2810_v42 = vsub.f32 %v2454_v19, %v661_v30 }
 0x1f0   : > { %3725 = vst [vmem:[#allocation33_spill] sm:$0xff] %v3724_v56  ;;  %v3727_v48 = vsel %vm2797_vm13, 4294967295, %v3726_v48  ;;  %v3729_v22 = vunpack.c.l.bf16 %v2574_v12  ;;  %vm3730_vm10 = vcmp.eq.s32.totalorder %v2499_v62, %v2588_v33  ;;  %v3731_v44 = vmov 0 }
 0x1f1   : > { %3728 = vst [vmem:[#allocation34_spill] sm:$0xff] %v3727_v48  ;;  %vm2821_vm15 = vmand %vm3730_vm10, %vm2509_vm1  ;;  %1887 = vpow2.f32 %v770_v53  ;;  %v2827_v63 = vsub.f32 %v2444_v10, %v2667_v49  ;;  %v740_v19 = vmul.f32 1.442695, %v2768_v31  ;;  %v988_v47 = vadd.f32 %v940_v5, %v872_v61  ;;  %v667_v17 = vpop.xlane.xlu1 %666  ;;  %v2846_v61 = vld [vmem:[#allocation8 + $0x8] sm:$0xff]   ;;  %v2848_v5 = vpop.eup %1865 }
 0x1f2   : > { %v1060_v21 = vmul.f32 %v3729_v22, %v980_v35  ;;  %v3732_v44 = vsel %vm2821_vm15, 4294967295, %v3731_v44  ;;  %vm3733_vm5 = vmmov %vm3730_vm10  ;;  %v772_v35 = vmul.f32 1.442695, %v716_v9  ;;  %v874_v53 = vsel %vm2781_vm6, 0.0, %v716_v9 }
 0x1f3   : > { %vm2835_vm9 = vmand %vm3733_vm5, %vm2513_vm2  ;;  %v942_v10 = vsel %vm2797_vm13, 0.0, %v717_v60  ;;  %v2844_v49 = vsub.f32 %v2456_v20, %v661_v30  ;;  %1889 = vpow2.f32 %v766_v2  ;;  %vm3736_vm5 = vcmp.eq.s32.totalorder %v2499_v62, %v2605_v40  ;;  %v2861_v30 = vpop.eup %1867 }
 0x1f4   : > { %1078 = vadd.xlane.f32.xlu0 %v1060_v21  ;;  %vm2855_vm10 = vmand %vm3736_vm5, %vm2509_vm1  ;;  %v3737_v33 = vmov 0  ;;  %v774_v9 = vmul.f32 1.442695, %v717_v60  ;;  %v873_v2 = vsel %vm2821_vm15, 0.0, %v2701_v45  ;;  %v744_v21 = vmul.f32 1.442695, %v2810_v42  ;;  %v2877_v20 = vpop.eup %1869 }
 0x1f5   : > { %v3738_v33 = vsel %vm2855_vm10, 4294967295, %v3737_v33  ;;  %v3739_v13 = vunpack.c.l.bf16 %v2590_v41  ;;  %v981_v57 = vadd.f32 %v933_v6, %v865_v8  ;;  %vm3740_vm5 = vcmp.ge.s32.totalorder %v2499_v62, 8  ;;  %v1872_v8 = vpop.eup %1871 }
 0x1f6   : > { %vm2873_vm13 = vmor %vm2520_vm3, %vm3740_vm5  ;;  %v941_v45 = vsel %vm2835_vm9, 0.0, %v2718_v36  ;;  %1891 = vpow2.f32 %v740_v19  ;;  %v2883_v22 = vmul.f32 1.442695, %v2827_v63  ;;  %vm3746_vm3 = vcmp.eq.s32.totalorder %v2499_v62, %v2605_v40  ;;  %v664_v19 = vpop.xlane.xlu0 %663 }
 0x1f7   : > { %v1068_v58 = vmul.f32 %v3739_v13, %v988_v47  ;;  %v990_v13 = vadd.f32 %v942_v10, %v874_v53  ;;  %vm3743_vm6 = vmmov %vm3740_vm5  ;;  %v3747_v36 = vmov 0  ;;  %1893 = vpow2.f32 %v772_v35  ;;  %v1874_v53 = vpop.eup %1873 }
 0x1f8   : > { %vm2889_vm15 = vmor %vm2530_vm4, %vm3743_vm6  ;;  %v746_v6 = vmul.f32 1.442695, %v2844_v49  ;;  %v2904_v18 = vsub.f32 %v2474_v37, %v667_v17  ;;  %v2907_v47 = vsub.f32 %v2480_v46, %v667_v17  ;;  %1895 = vpow2.f32 %v774_v9  ;;  %v691_v17 = vpop.xlane.xlu1 %690  ;;  %v2938_v35 = vpop.eup %1875 }
 0x1f9   : > { %vm2898_vm5 = vmand %vm3746_vm3, %vm2513_vm2  ;;  %1094 = vadd.xlane.f32.xlu0 %v1068_v58  ;;  %v2922_v37 = vsub.f32 %v2466_v27, %v2772_v51  ;;  %v2926_v46 = vsub.f32 %v2458_v23, %v2772_v51  ;;  %3756 = vst [vmem:[#allocation36_spill] sm:$0xff] %v2938_v35  ;;  %vm3757_vm10 = vcmp.eq.s32.totalorder %v2499_v62, %v2614_v59  ;;  %v3758_v23 = vmov 0  ;;  %v2971_v59 = vpop.eup %1877  ;;  %v3784_v35 = vld [vmem:[#allocation20_spill] sm:$0xff] }
 0x1fa   : > { %v3748_v36 = vsel %vm2898_vm5, 4294967295, %v3747_v36  ;;  %vm3749_vm4 = vmmov %vm3743_vm6  ;;  %v3761_v27 = vmov 0  ;;  %1897 = vpow2.f32 %v744_v21  ;;  %v3763_v52 = vunpack.c.h.bf16 %v2574_v12  ;;  %3768 = vst [vmem:[#allocation37_spill] sm:$0xff] %v2971_v59  ;;  %v3769_v12 = vld [vmem:[#allocation16_spill] sm:$0xff]  ;;  %v3775_v59 = vld [vmem:[#allocation30_spill] sm:$0xff] }
 0x1fb   : > { %vm2913_vm6 = vmor %vm2632_vm14, %vm3749_vm4  ;;  %3752 = vst [vmem:[#allocation35_spill] sm:$0xff] %v2922_v37  ;;  %v3764_v10 = vunpack.c.l.bf16 %v2622_v25  ;;  %v752_v58 = vmul.f32 1.442695, %v2904_v18  ;;  %v2974_v21 = vsub.f32 %v2460_v24, %v664_v19  ;;  %v2988_v25 = vpop.eup %1879  ;;  %1899 = vpow2.f32 %v746_v6  ;;  %v3776_v24 = vld [vmem:[#allocation32_spill] sm:$0xff] }
 0x1fc   : > { %vm3753_vm3 = vmmov %vm3749_vm4  ;;  %v1061_v51 = vmul.f32 %v3763_v52, %v981_v57  ;;  %v2977_v57 = vsub.f32 %v3769_v12, %v664_v19  ;;  %v989_v52 = vadd.f32 %v941_v45, %v873_v2  ;;  %3774 = vst [vmem:[#allocation16_spill] sm:$0xff] %v2988_v25  ;;  %v895_v45 = vsel %vm2913_vm6, 0.0, %v1872_v8  ;;  %v3780_v19 = vld [vmem:[#allocation19_spill] sm:$0xff] }
 0x1fd   : > { %vm2932_vm14 = vmor %vm2648_vm0, %vm3753_vm3  ;;  %v1070_v9 = vmul.f32 %v3764_v10, %v990_v13  ;;  %v754_v13 = vmul.f32 1.442695, %v2907_v47  ;;  %v3008_v12 = vsub.f32 %v3780_v19, %v691_v17  ;;  %v1882_v10 = vpop.eup %1881  ;;  %v776_v25 = vmul.f32 1.442695, %v2922_v37 }
 0x1fe   : > { %vm2945_vm5 = vmand %vm3757_vm10, %vm2509_vm1  ;;  %1080 = vadd.xlane.f32.xlu0 %v1061_v51  ;;  %v963_v6 = vsel %vm2932_vm14, 0.0, %v1874_v53  ;;  %v778_v40 = vmul.f32 1.442695, %v2926_v46  ;;  %v3021_v26 = vsub.f32 %v3784_v35, %v691_v17  ;;  %v1884_v51 = vpop.eup %1883  ;;  %1901 = vpow2.f32 %v752_v58 }
 0x1ff   : > { %v3759_v23 = vsel %vm2945_vm5, 4294967295, %v3758_v23  ;;  %vm3760_vm0 = vmmov %vm3757_vm10  ;;  %1098 = vadd.xlane.f32.xlu1 %v1070_v9  ;;  %vm3777_vm5 = vcmp.eq.s32.totalorder %v2499_v62, %v2654_v34  ;;  %v995_v8 = vadd.f32 %v963_v6, %v895_v45  ;;  %v3789_v48 = vunpack.c.h.bf16 %v2590_v41  ;;  %v1886_v45 = vpop.eup %1885 }
 0x200   : > { %vm2954_vm3 = vmand %vm3760_vm0, %vm2513_vm2  ;;  %v784_v37 = vmul.f32 1.442695, %v3008_v12  ;;  %v894_v17 = vsel %vm2873_vm13, 0.0, %v2787_v29  ;;  %vm3791_vm14 = vnez %v3718_v55  ;;  %1903 = vpow2.f32 %v754_v13  ;;  %v1888_v29 = vpop.eup %1887 }
 0x201   : > { %v3762_v27 = vsel %vm2954_vm3, 4294967295, %v3761_v27  ;;  %vm3765_vm10 = vmmov %vm3749_vm4  ;;  %v1069_v56 = vmul.f32 %v3789_v48, %v989_v52  ;;  %v3794_v58 = vunpack.c.h.bf16 %v2669_v50  ;;  %v786_v48 = vmul.f32 1.442695, %v3021_v26  ;;  %v3089_v15 = vpop.eup %1889 }
 0x202   : > { %vm2967_vm4 = vmor %vm2580_vm11, %vm3765_vm10  ;;  %v962_v60 = vsel %vm2889_vm15, 0.0, %v2804_v14  ;;  %vm3796_vm13 = vnez %v3721_v4  ;;  %1905 = vpow2.f32 %v784_v37 }
 0x203   : > { %vm3770_vm0 = vmmov %vm3765_vm10  ;;  %v1139_v41 = vmul.f32 %v3794_v58, %v995_v8  ;;  %1096 = vadd.xlane.f32.xlu0 %v1069_v56  ;;  %v994_v13 = vadd.f32 %v962_v60, %v894_v17  ;;  %v903_v52 = vsel %vm2967_vm4, 0.0, %v2814_v43  ;;  %1907 = vpow2.f32 %v786_v48 }
 0x204   : > { %vm2984_vm3 = vmor %vm2596_vm12, %vm3770_vm0  ;;  %1909 = vpow2.f32 %v776_v25  ;;  %v748_v58 = vmul.f32 1.442695, %v2974_v21  ;;  %v3454_v25 = vld [vmem:[#allocation10 + $0x58] sm:$0xff] }
 0x205   : > { %vm2999_vm12 = vmand %vm3777_vm5, %vm2509_vm1  ;;  %v971_v14 = vsel %vm2984_vm3, 0.0, %v2848_v5  ;;  %1156 = vadd.xlane.f32.xlu1 %v1139_v41  ;;  %v3079_v5 = vld [vmem:[#allocation7 + $0x10] sm:$0xff]   ;;  %1911 = vpow2.f32 %v778_v40  ;;  %v3832_v41 = vunpack.c.l.bf16 %v2754_v39 }
 0x206   : > { %vm3014_vm10 = vmor %vm2552_vm7, %vm3770_vm0  ;;  %v1003_v56 = vadd.f32 %v971_v14, %v903_v52  ;;  %1913 = vpow2.f32 %v2883_v22  ;;  %v3845_v52 = vunpack.c.h.bf16 %v2846_v61 }
 0x207   : > { %vm3785_vm5 = vmmov %vm3770_vm0  ;;  %v902_v1 = vsel %vm3014_vm10, 0.0, %v2861_v30  ;;  %vm3806_vm10 = vcmp.eq.s32.totalorder %v2499_v62, %v2654_v34  ;;  %v3811_v34 = vunpack.c.h.bf16 %v2754_v39  ;;  %v3840_v39 = vmov 0 }
 0x208   : > { %vm3027_vm6 = vmor %vm2558_vm8, %vm3785_vm5  ;;  %1915 = vpow2.f32 %v748_v58 }
 0x209   : > { %vm3790_vm7 = vmmov %vm3770_vm0  ;;  %v970_v43 = vsel %vm3027_vm6, 0.0, %v2877_v20  ;;  %v3809_v20 = vunpack.c.l.bf16 %v2669_v50  ;;  %v1147_v8 = vmul.f32 %v3811_v34, %v1003_v56  ;;  %v3847_v56 = vld [vmem:[#allocation33_spill] sm:$0xff] }
 0x20a   : > { %vm3041_vm0 = vmor %vm3791_vm14, %vm3790_vm7  ;;  %v1002_v38 = vadd.f32 %v970_v43, %v902_v1  ;;  %v3855_v43 = vld [vmem:[#allocation34_spill] sm:$0xff]  ;;  %v3251_v34 = vld [vmem:[#allocation8 + $0x30] sm:$0xff]  }
 0x20b   : > { %vm3795_vm8 = vmmov %vm3785_vm5  ;;  %v1138_v37 = vmul.f32 %v3809_v20, %v994_v13  ;;  %v897_v16 = vsel %vm3041_vm0, 0.0, %v1882_v10  ;;  %v3119_v10 = vpop.eup %1891  ;;  %vm3816_vm0 = vcmp.eq.s32.totalorder %v2499_v62, %v2752_v28  ;;  %1172 = vadd.xlane.f32.xlu1 %v1147_v8  ;;  %v750_v28 = vmul.f32 1.442695, %v2977_v57  ;;  %v1692_v1 = vld [vmem:[#allocation8 + $0x10] sm:$0xff]  }
 0x20c   : > { %vm3055_vm5 = vmor %vm3796_vm13, %vm3795_vm8  ;;  %vm3813_vm13 = vnez %v3707_v54  ;;  %v1894_v17 = vpop.eup %1893  ;;  %v1146_v48 = vmul.f32 %v3832_v41, %v1002_v38  ;;  %v1678_v58 = vunpack.c.l.bf16 %v3251_v34 }
 0x20d   : > { %vm3799_vm15 = vmmov %vm3790_vm7  ;;  %vm3800_vm7 = vnez %v3732_v44  ;;  %v965_v6 = vsel %vm3055_vm5, 0.0, %v1884_v51  ;;  %1154 = vadd.xlane.f32.xlu0 %v1138_v37  ;;  %v3135_v51 = vld [vmem:[#allocation8 + $0x28] sm:$0xff]   ;;  %v1631_v37 = vunpack.c.h.bf16 %v3079_v5  ;;  %1917 = vpow2.f32 %v750_v28  ;;  %v3289_v28 = vld [vmem:[#allocation8 + $0x18] sm:$0xff]  }
 0x20e   : > { %vm3069_vm14 = vmor %vm3800_vm7, %vm3799_vm15  ;;  %v997_v53 = vadd.f32 %v965_v6, %v897_v16  ;;  %v1675_v22 = vunpack.c.h.bf16 %v3135_v51  ;;  %v1674_v44 = vunpack.c.l.bf16 %v3135_v51 }
 0x20f   : > { %vm3803_vm4 = vmmov %vm3795_vm8  ;;  %v905_v54 = vsel %vm3069_vm14, 0.0, %v1886_v45  ;;  %vm3824_vm14 = vnez %v3762_v27 }
 0x210   : > { %vm3085_vm3 = vmor %vm2835_vm9, %vm3803_vm4  ;;  %vm3810_vm9 = vnez %v3748_v36  ;;  %v935_v45 = vsel %vm3824_vm14, 0.0, %v2844_v49  ;;  %v1896_v49 = vpop.eup %1895  ;;  %v1141_v14 = vmul.f32 %v3845_v52, %v997_v53  ;;  %v3865_v53 = vld [vmem:[#allocation36_spill] sm:$0xff] }
 0x211   : > { %vm3096_vm8 = vmand %vm3806_vm10, %vm2513_vm2  ;;  %v934_v9 = vsel %vm3810_vm9, 0.0, %v2827_v63  ;;  %v1630_v63 = vunpack.c.l.bf16 %v3079_v5  ;;  %v973_v19 = vsel %vm3085_vm3, 0.0, %v1888_v29  ;;  %v3186_v29 = vpop.eup %1897  ;;  %vm3839_vm9 = vcmp.eq.s32.totalorder %v2499_v62, %v3775_v59  ;;  %1170 = vadd.xlane.f32.xlu0 %v1146_v48 }
 0x212   : > { %vm3812_vm6 = vmmov %vm3803_vm4  ;;  %v937_v13 = vsel %vm3096_vm8, 0.0, %v2907_v47  ;;  %v1005_v4 = vadd.f32 %v973_v19, %v905_v54  ;;  %v3231_v47 = vld [vmem:[#allocation7 + $0x18] sm:$0xff]   ;;  %v1900_v20 = vpop.eup %1899  ;;  %1160 = vadd.xlane.f32.xlu1 %v1141_v14 }
 0x213   : > { %vm3115_vm15 = vmor %vm3813_vm13, %vm3812_vm6  ;;  %vm3823_vm6 = vnez %v3759_v23  ;;  %v1902_v8 = vpop.eup %1901 }
 0x214   : > { %vm3126_vm5 = vmand %vm3816_vm0, %vm2509_vm1  ;;  %v867_v35 = vsel %vm3823_vm6, 0.0, %v2810_v42  ;;  %v3830_v42 = vmov 0  ;;  %v1149_v23 = vmul.f32 %v1675_v22, %v1005_v4  ;;  %v896_v54 = vsel %vm3115_vm15, 0.0, %v3865_v53 }
 0x215   : > { %vm3819_vm7 = vmmov %vm3803_vm4  ;;  %vm3820_vm4 = vnez %v3709_v32  ;;  %v983_v6 = vadd.f32 %v935_v45, %v867_v35  ;;  %v1904_v35 = vpop.eup %1903  ;;  %v1658_v22 = vunpack.c.l.bf16 %v2846_v61  ;;  %v3458_v32 = vld [vmem:[#allocation10 + $0x60] sm:$0xff] }
 0x216   : > { %vm3141_vm10 = vmor %vm3820_vm4, %vm3819_vm7  ;;  %v1906_v2 = vpop.eup %1905  ;;  %1176 = vadd.xlane.f32.xlu1 %v1149_v23 }
 0x217   : > { %vm3825_vm3 = vmmov %vm3816_vm0  ;;  %v1908_v30 = vpop.eup %1907 }
 0x218   : > { %vm3157_vm13 = vmand %vm3825_vm3, %vm2513_vm2  ;;  %vm3833_vm3 = vnez %v3738_v33 }
 0x219   : > { %vm3828_vm0 = vmmov %vm3819_vm7  ;;  %vm3829_vm7 = vnez %v3712_v0  ;;  %v3834_v60 = vsel %vm3833_vm3, 0.0, %v2768_v31  ;;  %v3837_v0 = vmov 0  ;;  %vm3842_vm3 = vcmp.eq.s32.totalorder %v2499_v62, %v3776_v24 }
 0x21a   : > { %vm3166_vm4 = vmor %vm3829_vm7, %vm3828_vm0  ;;  %v982_v55 = vadd.f32 %v934_v9, %v3834_v60  ;;  %v869_v31 = vsel %vm2999_vm12, 0.0, %v2904_v18  ;;  %v1667_v60 = vunpack.c.h.bf16 %v3289_v28 }
 0x21b   : > { %v3831_v42 = vsel %vm3166_vm4, 4294967295, %v3830_v42  ;;  %vm3835_vm11 = vmmov %vm3828_vm0  ;;  %vm3836_vm0 = vnez %v3714_v3  ;;  %v3843_v3 = vmov 0  ;;  %v985_v9 = vadd.f32 %v937_v13, %v869_v31  ;;  %v3882_v13 = vld [vmem:[#allocation16_spill] sm:$0xff] }
 0x21c   : > { %vm3182_vm7 = vmor %vm3836_vm0, %vm3835_vm11  ;;  %vm3848_vm0 = vnez %v3847_v56  ;;  %v1062_v16 = vmul.f32 %v1630_v63, %v982_v55  ;;  %v3866_v63 = vld [vmem:[#allocation37_spill] sm:$0xff]  ;;  %v1910_v56 = vpop.eup %1909  ;;  %v3906_v55 = vld [vmem:[#allocation35_spill] sm:$0xff] }
 0x21d   : > { %v3838_v0 = vsel %vm3182_vm7, 4294967295, %v3837_v0  ;;  %vm3193_vm4 = vmand %vm3839_vm9, %vm2509_vm1  ;;  %vm3846_vm9 = vcmp.ge.s32.totalorder %v2499_v62, 8  ;;  %vm3856_vm7 = vnez %v3855_v43  ;;  %v964_v19 = vsel %vm3141_vm10, 0.0, %v3866_v63  ;;  %v1912_v43 = vpop.eup %1911 }
 0x21e   : > { %v3841_v39 = vsel %vm3193_vm4, 4294967295, %v3840_v39  ;;  %vm3202_vm11 = vmand %vm3842_vm3, %vm2509_vm1  ;;  %vm3851_vm1 = vcmp.eq.s32.totalorder %v2499_v62, %v3775_v59  ;;  %v1635_v59 = vunpack.c.h.bf16 %v3231_v47  ;;  %1082 = vadd.xlane.f32.xlu0 %v1062_v16  ;;  %v996_v48 = vadd.f32 %v964_v19, %v896_v54  ;;  %v1914_v16 = vpop.eup %1913 }
 0x21f   : > { %v3844_v3 = vsel %vm3202_vm11, 4294967295, %v3843_v3  ;;  %vm3218_vm3 = vmor %vm3848_vm0, %vm3846_vm9 }
 0x220   : > { %vm3227_vm11 = vmand %vm3851_vm1, %vm2513_vm2  ;;  %v906_v45 = vsel %vm3218_vm3, 0.0, %v1894_v17  ;;  %v1065_v41 = vmul.f32 %v1635_v59, %v985_v9  ;;  %v1140_v9 = vmul.f32 %v1658_v22, %v996_v48 }
 0x221   : > { %vm3854_vm4 = vmmov %vm3846_vm9 }
 0x222   : > { %vm3237_vm9 = vmor %vm3856_vm7, %vm3854_vm4  ;;  %1088 = vadd.xlane.f32.xlu1 %v1065_v41 }
 0x223   : > { %vm3859_vm1 = vmmov %vm3854_vm4  ;;  %v974_v50 = vsel %vm3237_vm9, 0.0, %v1896_v49  ;;  %v1063_v49 = vmul.f32 %v1631_v37, %v983_v6  ;;  %vm3879_vm9 = vcmp.eq.s32.totalorder %v2499_v62, %v3776_v24  ;;  %v945_v37 = vsel %vm3157_vm13, 0.0, %v3021_v26  ;;  %v3450_v26 = vld [vmem:[#allocation10 + $0x50] sm:$0xff] }
 0x224   : > { %vm3247_vm0 = vmor %vm3823_vm6, %vm3859_vm1  ;;  %v1006_v31 = vadd.f32 %v974_v50, %v906_v45  ;;  %v1679_v45 = vunpack.c.h.bf16 %v3251_v34  ;;  %v1916_v50 = vpop.eup %1915  ;;  %v3904_v34 = vld [vmem:[#allocation23_spill] sm:$0xff] }
 0x225   : > { %vm3862_vm4 = vmmov %vm3859_vm1  ;;  %v899_v4 = vsel %vm3247_vm0, 0.0, %v3186_v29  ;;  %1084 = vadd.xlane.f32.xlu0 %v1063_v49  ;;  %v805_v17 = vadd.s32 112, %v3904_v34  ;;  %v1662_v49 = vunpack.c.l.bf16 %v1692_v1 }
 0x226   : > { %vm3257_vm7 = vmor %vm3824_vm14, %vm3862_vm4  ;;  %v1150_v23 = vmul.f32 %v1678_v58, %v1006_v31 }
 0x227   : > { %vm3867_vm6 = vmmov %vm3859_vm1  ;;  %v967_v24 = vsel %vm3257_vm7, 0.0, %v1900_v20  ;;  %v1663_v20 = vunpack.c.h.bf16 %v1692_v1  ;;  %v3911_v1 = vld [vmem:[#allocation18_spill] sm:$0xff] }
 0x228   : > { %vm3271_vm1 = vmor %vm2999_vm12, %vm3867_vm6  ;;  %vm3883_vm6 = vnez %v3831_v42  ;;  %v999_v53 = vadd.f32 %v967_v24, %v899_v4  ;;  %1178 = vadd.xlane.f32.xlu1 %v1150_v23  ;;  %v3464_v23 = vld [vmem:[#allocation10 + $0x48] sm:$0xff] }
 0x229   : > { %vm3870_vm15 = vmmov %vm3862_vm4  ;;  %v904_v52 = vsel %vm3883_vm6, 0.0, %v3882_v13  ;;  %1158 = vadd.xlane.f32.xlu0 %v1140_v9  ;;  %v1666_v13 = vunpack.c.l.bf16 %v3289_v28 }
 0x22a   : > { %vm3283_vm10 = vmor %vm3096_vm8, %vm3870_vm15  ;;  %vm3884_vm15 = vnez %v3838_v0  ;;  %v1143_v40 = vmul.f32 %v1663_v20, %v999_v53  ;;  %v877_v20 = vsel %vm3126_vm5, 0.0, %v3008_v12  ;;  %v3446_v12 = vld [vmem:[#allocation10 + $0x40] sm:$0xff] }
 0x22b   : > { %vm3873_vm12 = vmmov %vm3862_vm4  ;;  %v972_v14 = vsel %vm3884_vm15, 0.0, %v3089_v15  ;;  %v901_v15 = vsel %vm3271_vm1, 0.0, %v1902_v8  ;;  %v969_v0 = vsel %vm3283_vm10, 0.0, %v1904_v35  ;;  %vm3892_vm1 = vnez %v3844_v3 }
 0x22c   : > { %vm3295_vm14 = vmor %vm3126_vm5, %vm3873_vm12  ;;  %v1001_v59 = vadd.f32 %v969_v0, %v901_v15  ;;  %v868_v6 = vsel %vm3892_vm1, 0.0, %v2974_v21  ;;  %v1004_v51 = vadd.f32 %v972_v14, %v904_v52  ;;  %vm3898_vm15 = vnez %v3748_v36  ;;  %1164 = vadd.xlane.f32.xlu1 %v1143_v40 }
 0x22d   : > { %vm3876_vm8 = vmmov %vm3862_vm4  ;;  %v909_v29 = vsel %vm3295_vm14, 0.0, %v1906_v2  ;;  %vm3894_vm14 = vnez %v3738_v33  ;;  %v1634_v35 = vunpack.c.l.bf16 %v3231_v47  ;;  %v1918_v47 = vpop.eup %1917  ;;  %v943_v14 = vsel %vm3227_vm11, 0.0, %v2926_v46  ;;  %v3914_v46 = vld [vmem:[#allocation31_spill] sm:$0xff] }
 0x22e   : > { %vm3304_vm3 = vmor %vm3157_vm13, %vm3876_vm8  ;;  %v3369_v63 = vmul.f32 %v1667_v60, %v1001_v59  ;;  %v1148_v33 = vmul.f32 %v1674_v44, %v1004_v51  ;;  %v688_v60 = vpop.xlane.xlu0 %687  ;;  %v1647_v15 = vunpack.c.h.bf16 %v3914_v46  ;;  %v3442_v51 = vld [vmem:[#allocation10 + $0x38] sm:$0xff] }
 0x22f   : > { %vm3313_vm4 = vmand %vm3879_vm9, %vm2513_vm2  ;;  %v977_v38 = vsel %vm3304_vm3, 0.0, %v1908_v30  ;;  %v721_v42 = vsub.f32 %v3911_v1, %v688_v60 }
 0x230   : > { %vm3885_vm12 = vmmov %vm3876_vm8  ;;  %vm3886_vm8 = vnez %v3841_v39  ;;  %v3356_v5 = vadd.f32 %v977_v38, %v909_v29  ;;  %v936_v8 = vsel %vm3313_vm4, 0.0, %v2977_v57  ;;  %1174 = vadd.xlane.f32.xlu0 %v1148_v33  ;;  %v1690_v29 = vld [vmem:[#allocation7 + $0x38] sm:$0xff]   ;;  %v993_v38 = vadd.f32 %v945_v37, %v877_v20 }
 0x231   : > { %vm3332_vm9 = vmor %vm3886_vm8, %vm3885_vm12  ;;  %v984_v27 = vadd.f32 %v936_v8, %v868_v6  ;;  %v875_v52 = vsel %vm3886_vm8, 0.0, %v3906_v55  ;;  %v1650_v11 = vunpack.c.l.bf16 %v1690_v29  ;;  %v3438_v6 = vld [vmem:[#allocation10 + $0x30] sm:$0xff]  ;;  %v3462_v8 = vld [vmem:[#allocation10 + $0x68] sm:$0xff]  ;;  %v782_v54 = vmul.f32 1.442695, %v721_v42 }
 0x232   : > { %vm3889_vm0 = vmmov %vm3885_vm12  ;;  %v907_v21 = vsel %vm3332_vm9, 0.0, %v1910_v56  ;;  %v3910_v56 = vld [vmem:[#allocation17_spill] sm:$0xff]  ;;  %v991_v18 = vadd.f32 %v943_v14, %v875_v52  ;;  %v3478_v40 = vpop.permute.xlu0 %1292  ;;  %vm1410_vm8 = vcmask 7168  }
 0x233   : > { %vm3347_vm7 = vmor %vm3227_vm11, %vm3889_vm0  ;;  %v720_v24 = vsub.f32 %v3910_v56, %v688_v60 }
 0x234   : > { %vm3893_vm10 = vmmov %vm3889_vm0  ;;  %v975_v19 = vsel %vm3347_vm7, 0.0, %v1912_v43  ;;  %v1071_v43 = vmul.f32 %v1647_v15, %v991_v18 }
 0x235   : > { %vm3365_vm3 = vmor %vm3894_vm14, %vm3893_vm10  ;;  %v1007_v2 = vadd.f32 %v975_v19, %v907_v21  ;;  %v780_v53 = vmul.f32 1.442695, %v720_v24 }
 0x236   : > { %vm3897_vm6 = vmmov %vm3889_vm0  ;;  %v898_v22 = vsel %vm3365_vm3, 0.0, %v3119_v10  ;;  %v1064_v10 = vmul.f32 %v1634_v35, %v984_v27  ;;  %v1697_v27 = vld [vmem:[#allocation8 + $0x38] sm:$0xff]  }
 0x237   : > { %vm3379_vm12 = vmor %vm3898_vm15, %vm3897_vm6  ;;  %v1151_v41 = vmul.f32 %v1679_v45, %v1007_v2  ;;  %1919 = vpow2.f32 %v780_v53  ;;  %v1682_v45 = vunpack.c.l.bf16 %v1697_v27 }
 0x238   : > { %v966_v36 = vsel %vm3379_vm12, 0.0, %v1914_v16  ;;  %vm3901_vm9 = vmmov %vm3889_vm0  ;;  %1086 = vadd.xlane.f32.xlu0 %v1064_v10  ;;  %v1651_v16 = vunpack.c.h.bf16 %v1690_v29  ;;  %1921 = vpow2.f32 %v782_v54 }
 0x239   : > { %vm3394_vm0 = vmor %vm3892_vm1, %vm3901_vm9  ;;  %v998_v30 = vadd.f32 %v966_v36, %v898_v22  ;;  %vm839_vm1 = vcmp.eq.s32.totalorder %v2499_v62, %v805_v17  ;;  %1180 = vadd.xlane.f32.xlu1 %v1151_v41  ;;  %v3485_v62 = vld [vmem:[#allocation10 + $0x70] sm:$0xff] }
 0x23a   : > { %vm3905_vm7 = vmmov %vm3897_vm6  ;;  %v900_v3 = vsel %vm3394_vm0, 0.0, %v1916_v50  ;;  %v1073_v9 = vmul.f32 %v1651_v16, %v993_v38  ;;  %v3917_v38 = vld [vmem:[#allocation24_spill] sm:$0xff] }
 0x23b   : > { %vm952_vm10 = vmor %vm3313_vm4, %vm3905_vm7  ;;  %v1142_v61 = vmul.f32 %v1662_v49, %v998_v30  ;;  %vm3907_vm4 = vnez %v3680_v7 }
 0x23c   : > { %v968_v48 = vsel %vm952_vm10, 0.0, %v1918_v47  ;;  %vm3415_vm14 = vmand %vm839_vm1, %vm3907_vm4 }
 0x23d   : > { %v1000_v31 = vadd.f32 %v968_v48, %v900_v3  ;;  %vm3423_vm3 = vmand %vm839_vm1, %vm2513_vm2  ;;  %1162 = vadd.xlane.f32.xlu0 %v1142_v61  ;;  %v876_v7 = vsel %vm3415_vm14, 0.0, %v720_v24 }
 0x23e   : > { %v944_v0 = vsel %vm3423_vm3, 0.0, %v721_v42  ;;  %vm3915_vm2 = vmmov %vm3897_vm6  ;;  %v1683_v42 = vunpack.c.h.bf16 %v1697_v27 }
 0x23f   : > { %v1144_v39 = vmul.f32 %v1666_v13, %v1000_v31  ;;  %v992_v44 = vadd.f32 %v944_v0, %v876_v7  ;;  %vm892_vm5 = vmor %vm3415_vm14, %vm3915_vm2  ;;  %v1955_v7 = vld [vmem:[#allocation10] sm:$0xff] }
 0x240   : > { %vm3916_vm13 = vmmov %vm3915_vm2 }
 0x241   : > { %1166 = vadd.xlane.f32.xlu0 %v1144_v39  ;;  %v1072_v59 = vmul.f32 %v1650_v11, %v992_v44  ;;  %vm960_vm11 = vmor %vm3423_vm3, %vm3916_vm13 }
 0x244   : > { %v1920_v21 = vpop.eup %1919 }
 0x245   : > { %1100 = vadd.xlane.f32.xlu0 %v1071_v43  ;;  %v1922_v19 = vpop.eup %1921  ;;  %v908_v57 = vsel %vm892_vm5, 0.0, %v1920_v21  ;;  %v1153_v43 = vmul.f32 %v1683_v42, %v3356_v5 }
 0x246   : > { %v976_v33 = vsel %vm960_vm11, 0.0, %v1922_v19 }
 0x247   : > { %v1008_v35 = vadd.f32 %v976_v33, %v908_v57 }
 0x249   : > { %1102 = vadd.xlane.f32.xlu0 %v1072_v59  ;;  %v1152_v50 = vmul.f32 %v1682_v45, %v1008_v35 }
 0x24a   : > { %1294 = vrot.lane.b32.xlu1 %v3438_v6, %s2191_s24 }
 0x24d   : > { %1104 = vadd.xlane.f32.xlu0 %v1073_v9 }
 0x24e   : > { %1296 = vrot.lane.b32.xlu1 %v3442_v51, %s2191_s24 }
 0x252   : > { %1298 = vrot.lane.b32.xlu1 %v3446_v12, %s2191_s24 }
 0x256   : > { %1302 = vrot.lane.b32.xlu1 %v3450_v26, %s2191_s24 }
 0x25a   : > { %1304 = vrot.lane.b32.xlu1 %v3454_v25, %s2191_s24 }
 0x25e   : > { %1306 = vrot.lane.b32.xlu1 %v3458_v32, %s2191_s24 }
 0x262   : > { %1308 = vrot.lane.b32.xlu1 %v3462_v8, %s2191_s24 }
 0x263   : > { %1300 = vrot.lane.b32.xlu0 %v3464_v23, %s2191_s24 }
 0x266   : > { %v1075_v36 = vpop.xlane.xlu1 %1074 }
 0x26b   : > { %v3481_v2 = vpop.xlane.xlu0 %1090 }
 0x271   : > { %v3491_v47 = vpop.xlane.xlu1 %1092 }
 0x276   : > { %v3483_v22 = vpop.xlane.xlu0 %1076 }
 0x27d   : > { %v3487_v58 = vpop.xlane.xlu0 %1078 }
 0x282   : > { %v3493_v34 = vpop.xlane.xlu0 %1094 }
 0x286   : > { %1182 = vadd.xlane.f32.xlu1 %v1152_v50 }
 0x287   : > { %v3495_v17 = vpop.xlane.xlu0 %1080 }
 0x288   : > { %v3497_v10 = vpop.xlane.xlu1 %1098 }
 0x28a   : > { %1168 = vadd.xlane.f32.xlu1 %v3369_v63 }
 0x28c   : > { %v3499_v63 = vpop.xlane.xlu0 %1096 }
 0x28e   : > { %v1157_v30 = vpop.xlane.xlu1 %1156 }
 0x28f   : > { %v1187_v13 = vmax.f32 %v1157_v30, 1e-30 }
 0x294   : > { %v1173_v3 = vpop.xlane.xlu1 %1172 }
 0x295   : > { %v1195_v48 = vmax.f32 %v1173_v3, 1e-30 }
 0x296   : > { %v1155_v49 = vpop.xlane.xlu0 %1154 }
 0x297   : > { %v1186_v41 = vmax.f32 %v1155_v49, 1e-30 }
 0x299   : > { %1923 = vlog2.f32 %v1186_v41  ;;  %v1956_v41 = vld [vmem:[#allocation10 + $0x8] sm:$0xff] }
 0x29a   : > { %1925 = vlog2.f32 %v1195_v48  ;;  %v1171_v60 = vpop.xlane.xlu0 %1170 }
 0x29b   : > { %1310 = vrot.lane.b32.xlu1 %v3485_v62, %s2191_s24  ;;  %v1161_v61 = vpop.xlane.xlu1 %1160  ;;  %v1194_v21 = vmax.f32 %v1171_v60, 1e-30 }
 0x29c   : > { %v1189_v4 = vmax.f32 %v1161_v61, 1e-30 }
 0x29f   : > { %v1177_v55 = vpop.xlane.xlu1 %1176 }
 0x2a0   : > { %v1197_v52 = vmax.f32 %v1177_v55, 1e-30 }
 0x2a2   : > { %1927 = vlog2.f32 %v1197_v52  ;;  %v3523_v52 = vld [vmem:[#allocation10 + $0x78] sm:$0xff] }
 0x2a3   : > { %1929 = vlog2.f32 %v1187_v13 }
 0x2a4   : > { %1931 = vlog2.f32 %v1189_v4 }
 0x2a6   : > { %v1924_v24 = vpop.eup %1923 }
 0x2a7   : > { %v3501_v31 = vpop.xlane.xlu0 %1082  ;;  %v1926_v28 = vpop.eup %1925  ;;  %v1203_v39 = vmul.f32 0.6931472, %v1924_v24  ;;  %v1958_v24 = vld [vmem:[#allocation10 + $0x18] sm:$0xff] }
 0x2a8   : > { %v1221_v15 = vmul.f32 0.6931472, %v1926_v28 }
 0x2a9   : > { %v1234_v0 = vmul.f32 %v1955_v7, %v1203_v39 }
 0x2aa   : > { %v3509_v44 = vmul.f32 %v1221_v15, %v3464_v23  ;;  %v3918_v15 = vld [vmem:[#allocation22_spill] sm:$0xff] }
 0x2ab   : > { %v3505_v56 = vpop.xlane.xlu1 %1088  ;;  %v1250_v20 = vsub.f32 %v1075_v36, %v1234_v0  ;;  %v1959_v0 = vld [vmem:[#allocation10 + $0x28] sm:$0xff] }
 0x2ac   : > { %v1259_v59 = vsub.f32 %v3491_v47, %v3509_v44 }
 0x2ad   : > { %v1330_v16 = vmul.f32 %v3917_v38, %v1250_v20 }
 0x2ae   : > { %v3503_v14 = vpop.xlane.xlu0 %1084 }
 0x2af   : > { %v1928_v53 = vpop.eup %1927  ;;  %1362 = vrot.lane.b32.xlu0 %v1330_v16, %s2192_s27  ;;  %v3920_v16 = vld [vmem:[#allocation26_spill] sm:$0xff] }
 0x2b0   : > { %v1930_v5 = vpop.eup %1929  ;;  %v1225_v23 = vmul.f32 0.6931472, %v1928_v53 }
 0x2b1   : > { %v1179_v46 = vpop.xlane.xlu1 %1178  ;;  %v1205_v33 = vmul.f32 0.6931472, %v1930_v5  ;;  %v1932_v45 = vpop.eup %1931 }
 0x2b2   : > { %v1159_v1 = vpop.xlane.xlu0 %1158  ;;  %v1245_v57 = vmul.f32 %v1225_v23, %v3454_v25  ;;  %v1209_v48 = vmul.f32 0.6931472, %v1932_v45  ;;  %v1957_v25 = vld [vmem:[#allocation10 + $0x10] sm:$0xff] }
 0x2b3   : > { %v1188_v18 = vmax.f32 %v1159_v1, 1e-30  ;;  %v1235_v3 = vmul.f32 %v1956_v41, %v1205_v33  ;;  %v1198_v1 = vmax.f32 %v1179_v46, 1e-30 }
 0x2b4   : > { %v1261_v36 = vsub.f32 %v3499_v63, %v1245_v57  ;;  %v1237_v63 = vmul.f32 %v1958_v24, %v1209_v48 }
 0x2b5   : > { %1933 = vlog2.f32 %v1188_v18  ;;  %v1165_v11 = vpop.xlane.xlu1 %1164  ;;  %v1251_v39 = vsub.f32 %v3483_v22, %v1235_v3 }
 0x2b6   : > { %v1191_v37 = vmax.f32 %v1165_v11, 1e-30  ;;  %v3919_v11 = vld [vmem:[#allocation21_spill] sm:$0xff]  ;;  %v1253_v46 = vsub.f32 %v3495_v17, %v1237_v63 }
 0x2b7   : > { %v1331_v20 = vmul.f32 %v3919_v11, %v1251_v39 }
 0x2b8   : > { %1935 = vlog2.f32 %v1191_v37  ;;  %v1333_v53 = vmul.f32 %v3920_v16, %v1253_v46 }
 0x2b9   : > { %v1175_v29 = vpop.xlane.xlu0 %1174 }
 0x2ba   : > { %v1196_v50 = vmax.f32 %v1175_v29, 1e-30 }
 0x2bf   : > { %1184 = vadd.xlane.f32.xlu1 %v1153_v43 }
 0x2c1   : > { %v3514_v9 = vpop.xlane.xlu0 %1086 }
 0x2c2   : > { %v3516_v54 = vpop.xlane.xlu1 %1180  ;;  %v1934_v30 = vpop.eup %1933 }
 0x2c3   : > { %v1207_v61 = vmul.f32 0.6931472, %v1934_v30 }
 0x2c5   : > { %v1236_v55 = vmul.f32 %v1957_v25, %v1207_v61  ;;  %v1936_v4 = vpop.eup %1935 }
 0x2c6   : > { %v1163_v19 = vpop.xlane.xlu0 %1162  ;;  %v1295_v35 = vpop.permute.xlu1 %1294  ;;  %v1213_v18 = vmul.f32 0.6931472, %v1936_v4 }
 0x2c7   : > { %v1190_v27 = vmax.f32 %v1163_v19, 1e-30  ;;  %v1252_v28 = vsub.f32 %v3487_v58, %v1236_v55  ;;  %v1960_v19 = vld [vmem:[#allocation10 + $0x20] sm:$0xff] }
 0x2c8   : > { %v1239_v29 = vmul.f32 %v1959_v0, %v1213_v18 }
 0x2c9   : > { %1937 = vlog2.f32 %v1190_v27  ;;  %v1332_v7 = vmul.f32 %v3918_v15, %v1252_v28 }
 0x2ca   : > { %1939 = vlog2.f32 %v1194_v21  ;;  %v1167_v49 = vpop.xlane.xlu0 %1166  ;;  %v3521_v60 = vpop.permute.xlu1 %1296  ;;  %v1255_v5 = vsub.f32 %v3503_v14, %v1239_v29  ;;  %v3921_v14 = vld [vmem:[#allocation25_spill] sm:$0xff] }
 0x2cb   : > { %v1192_v13 = vmax.f32 %v1167_v49, 1e-30  ;;  %1941 = vlog2.f32 %v1196_v50  ;;  %1366 = vrot.lane.b32.xlu0 %v1332_v7, %s2192_s27 }
 0x2cc   : > { %v1335_v45 = vmul.f32 %v3478_v40, %v1255_v5 }
 0x2cd   : > { %1943 = vlog2.f32 %v1192_v13 }
 0x2ce   : > { %v1299_v42 = vpop.permute.xlu1 %1298  ;;  %1945 = vlog2.f32 %v1198_v1 }
 0x2d0   : > { %1312 = vrot.lane.b32.xlu1 %v3523_v52, %s2191_s24 }
 0x2d2   : > { %v1303_v43 = vpop.permute.xlu1 %1302 }
 0x2d4   : > { %1364 = vrot.lane.b32.xlu1 %v1331_v20, %s2192_s27 }
 0x2d6   : > { %v1938_v58 = vpop.eup %1937  ;;  %v1305_v38 = vpop.permute.xlu1 %1304 }
 0x2d7   : > { %v1940_v22 = vpop.eup %1939  ;;  %v1211_v37 = vmul.f32 0.6931472, %v1938_v58  ;;  %v3536_v23 = vmul.f32 %v1305_v38, %v1261_v36 }
 0x2d8   : > { %v1942_v21 = vpop.eup %1941  ;;  %1368 = vrot.lane.b32.xlu1 %v1333_v53, %s2192_s27  ;;  %v1219_v27 = vmul.f32 0.6931472, %v1940_v22 }
 0x2d9   : > { %v1238_v57 = vmul.f32 %v1960_v19, %v1211_v37  ;;  %v1223_v30 = vmul.f32 0.6931472, %v1942_v21 }
 0x2da   : > { %v1944_v33 = vpop.eup %1943  ;;  %v1242_v41 = vmul.f32 %v1219_v27, %v3446_v12  ;;  %v1307_v4 = vpop.permute.xlu1 %1306 }
 0x2db   : > { %v1215_v17 = vmul.f32 0.6931472, %v1944_v33  ;;  %v1254_v50 = vsub.f32 %v3501_v31, %v1238_v57  ;;  %v1946_v48 = vpop.eup %1945  ;;  %v1244_v61 = vmul.f32 %v1223_v30, %v3450_v26 }
 0x2dc   : > { %1372 = vrot.lane.b32.xlu1 %v1335_v45, %s2192_s27  ;;  %v1227_v40 = vmul.f32 0.6931472, %v1946_v48  ;;  %v1258_v31 = vsub.f32 %v3481_v2, %v1242_v41 }
 0x2dd   : > { %v1240_v49 = vmul.f32 %v1215_v17, %v3438_v6  ;;  %v1334_v36 = vmul.f32 %v3921_v14, %v1254_v50  ;;  %v1260_v25 = vsub.f32 %v3493_v34, %v1244_v61  ;;  %v1101_v34 = vpop.xlane.xlu0 %1100 }
 0x2de   : > { %v1338_v6 = vmul.f32 %v1299_v42, %v1258_v31  ;;  %v1246_v55 = vmul.f32 %v1227_v40, %v3458_v32  ;;  %v1199_v32 = vmax.f32 %v3516_v54, 1e-30 }
 0x2df   : > { %1370 = vrot.lane.b32.xlu0 %v1334_v36, %s2192_s27  ;;  %v1256_v3 = vsub.f32 %v3514_v9, %v1240_v49  ;;  %v1340_v12 = vmul.f32 %v1303_v43, %v1260_v25 }
 0x2e0   : > { %v1262_v9 = vsub.f32 %v3497_v10, %v1246_v55 }
 0x2e1   : > { %v1336_v13 = vmul.f32 %v1295_v35, %v1256_v3  ;;  %v1309_v35 = vpop.permute.xlu1 %1308  ;;  %v1103_v28 = vpop.xlane.xlu0 %1102 }
 0x2e2   : > { %v1342_v26 = vmul.f32 %v1307_v4, %v1262_v9 }
 0x2e3   : > { %1374 = vrot.lane.b32.xlu0 %v1336_v13, %s2192_s27 }
 0x2e5   : > { %v1105_v0 = vpop.xlane.xlu0 %1104 }
 0x2e7   : > { %1378 = vrot.lane.b32.xlu0 %v1338_v6, %s2192_s27 }
 0x2e9   : > { %v1301_v58 = vpop.permute.xlu0 %1300 }
 0x2eb   : > { %1382 = vrot.lane.b32.xlu0 %v1340_v12, %s2192_s27 }
 0x2ef   : > { %1386 = vrot.lane.b32.xlu0 %v1342_v26, %s2192_s27 }
 0x30f   : > { %v1183_v2 = vpop.xlane.xlu1 %1182 }
 0x310   : > { %v1200_v24 = vmax.f32 %v1183_v2, 1e-30 }
 0x312   : > { %1947 = vlog2.f32 %v1200_v24 }
 0x313   : > { %v1169_v63 = vpop.xlane.xlu1 %1168 }
 0x314   : > { %v1193_v1 = vmax.f32 %v1169_v63, 1e-30 }
 0x316   : > { %1949 = vlog2.f32 %v1193_v1 }
 0x317   : > { %1951 = vlog2.f32 %v1199_v32  ;;  %v1311_v29 = vpop.permute.xlu1 %1310 }
 0x31f   : > { %v1948_v42 = vpop.eup %1947 }
 0x320   : > { %v1231_v39 = vmul.f32 0.6931472, %v1948_v42 }
 0x321   : > { %v1363_v21 = vpop.permute.xlu0 %1362 }
 0x322   : > { %v1248_v10 = vmul.f32 %v1231_v39, %v3485_v62  ;;  %v1339_v62 = vmul.f32 %v1301_v58, %v1259_v59  ;;  %v1411_v19 = vsel %vm1410_vm8, %v1363_v21, 0.0 }
 0x323   : > { %v1950_v18 = vpop.eup %1949 }
 0x324   : > { %v1217_v15 = vmul.f32 0.6931472, %v1950_v18  ;;  %v1264_v7 = vsub.f32 %v1103_v28, %v1248_v10  ;;  %v1952_v54 = vpop.eup %1951 }
 0x325   : > { %v1229_v22 = vmul.f32 0.6931472, %v1952_v54 }
 0x326   : > { %v1241_v43 = vmul.f32 %v1217_v15, %v3442_v51  ;;  %v1344_v11 = vmul.f32 %v1311_v29, %v1264_v7 }
 0x327   : > { %v1247_v37 = vmul.f32 %v1229_v22, %v3462_v8 }
 0x328   : > { %1390 = vrot.lane.b32.xlu0 %v1344_v11, %s2192_s27  ;;  %v1257_v20 = vsub.f32 %v3505_v56, %v1241_v43 }
 0x329   : > { %v1263_v51 = vsub.f32 %v1101_v34, %v1247_v37 }
 0x32a   : > { %v1337_v46 = vmul.f32 %v3521_v60, %v1257_v20 }
 0x32b   : > { %v1343_v56 = vmul.f32 %v1309_v35, %v1263_v51 }
 0x32c   : > { %1376 = vrot.lane.b32.xlu1 %v1337_v46, %s2192_s27 }
 0x330   : > { %1380 = vrot.lane.b32.xlu1 %v1339_v62, %s2192_s27 }
 0x334   : > { %1384 = vrot.lane.b32.xlu1 %v3536_v23, %s2192_s27 }
 0x338   : > { %1388 = vrot.lane.b32.xlu1 %v1343_v56, %s2192_s27 }
 0x33d   : > { %v1367_v57 = vpop.permute.xlu0 %1366 }
 0x33e   : > { %v1414_v17 = vsel %vm1410_vm8, %v1367_v57, 0.0 }
 0x348   : > { %v1185_v60 = vpop.xlane.xlu1 %1184 }
 0x349   : > { %v1201_v38 = vmax.f32 %v1185_v60, 1e-30 }
 0x34b   : > { %1953 = vlog2.f32 %v1201_v38 }
 0x34c   : > { %v1313_v44 = vpop.permute.xlu1 %1312 }
 0x350   : > { %v1365_v8 = vpop.permute.xlu1 %1364 }
 0x351   : > { %v1412_v23 = vsel %vm1410_vm8, %v1365_v8, 0.0  ;;  %v1371_v50 = vpop.permute.xlu0 %1370 }
 0x352   : > { %v1413_v33 = vadd.f32 %v1412_v23, %v1411_v19  ;;  %v1418_v14 = vsel %vm1410_vm8, %v1371_v50, 0.0 }
 0x354   : > { %v1369_v27 = vpop.permute.xlu1 %1368  ;;  %v1415_v45 = vadd.f32 %v1414_v17, %v1413_v33 }
 0x355   : > { %v1375_v3 = vpop.permute.xlu0 %1374 }
 0x356   : > { %v1422_v13 = vsel %vm1410_vm8, %v1375_v3, 0.0 }
 0x358   : > { %v1954_v16 = vpop.eup %1953  ;;  %v1373_v49 = vpop.permute.xlu1 %1372 }
 0x359   : > { %v1233_v53 = vmul.f32 0.6931472, %v1954_v16  ;;  %v1420_v41 = vsel %vm1410_vm8, %v1373_v49, 0.0  ;;  %v1379_v6 = vpop.permute.xlu0 %1378 }
 0x35a   : > { %v1426_v12 = vsel %vm1410_vm8, %v1379_v6, 0.0 }
 0x35b   : > { %v1249_v5 = vmul.f32 %v1233_v53, %v3523_v52  ;;  %v1416_v52 = vsel %vm1410_vm8, %v1369_v27, 0.0 }
 0x35c   : > { %v1417_v30 = vadd.f32 %v1416_v52, %v1415_v45 }
 0x35d   : > { %v1265_v47 = vsub.f32 %v1105_v0, %v1249_v5  ;;  %v1383_v26 = vpop.permute.xlu0 %1382 }
 0x35e   : > { %v1419_v36 = vadd.f32 %v1418_v14, %v1417_v30  ;;  %v1430_v24 = vsel %vm1410_vm8, %v1383_v26, 0.0 }
 0x35f   : > { %v1345_v59 = vmul.f32 %v1313_v44, %v1265_v47 }
 0x360   : > { %v1421_v48 = vadd.f32 %v1420_v41, %v1419_v36 }
 0x361   : > { %1392 = vrot.lane.b32.xlu1 %v1345_v59, %s2192_s27  ;;  %v1387_v32 = vpop.permute.xlu0 %1386 }
 0x362   : > { %v1423_v31 = vadd.f32 %v1422_v13, %v1421_v48  ;;  %v1434_v28 = vsel %vm1410_vm8, %v1387_v32, 0.0 }
 0x39a   : > { %v1391_v18 = vpop.permute.xlu0 %1390 }
 0x39b   : > { %v1438_v7 = vsel %vm1410_vm8, %v1391_v18, 0.0 }
 0x39e   : > { %v1377_v61 = vpop.permute.xlu1 %1376 }
 0x39f   : > { %v1424_v40 = vsel %vm1410_vm8, %v1377_v61, 0.0 }
 0x3a0   : > { %v1425_v25 = vadd.f32 %v1424_v40, %v1423_v31 }
 0x3a2   : > { %v1381_v55 = vpop.permute.xlu1 %1380  ;;  %v1427_v4 = vadd.f32 %v1426_v12, %v1425_v25 }
 0x3a3   : > { %v1428_v9 = vsel %vm1410_vm8, %v1381_v55, 0.0 }
 0x3a4   : > { %v1429_v35 = vadd.f32 %v1428_v9, %v1427_v4 }
 0x3a6   : > { %v1385_v2 = vpop.permute.xlu1 %1384  ;;  %v1431_v63 = vadd.f32 %v1430_v24, %v1429_v35 }
 0x3a7   : > { %v1432_v1 = vsel %vm1410_vm8, %v1385_v2, 0.0 }
 0x3a8   : > { %v1433_v34 = vadd.f32 %v1432_v1, %v1431_v63 }
 0x3aa   : > { %v1389_v42 = vpop.permute.xlu1 %1388  ;;  %v1435_v39 = vadd.f32 %v1434_v28, %v1433_v34 }
 0x3ab   : > { %v1436_v10 = vsel %vm1410_vm8, %v1389_v42, 0.0 }
 0x3ac   : > { %v1437_v15 = vadd.f32 %v1436_v10, %v1435_v39 }
 0x3ae   : > { %v1439_v29 = vadd.f32 %v1438_v7, %v1437_v15 }
 0x3d3   : > { %v1393_v0 = vpop.permute.xlu1 %1392 }
 0x3d4   : > { %v1440_v43 = vsel %vm1410_vm8, %v1393_v0, 0.0 }
 0x3d5   : > { %v1441_v11 = vadd.f32 %v1440_v43, %v1439_v29 }
 0x3d7   : > { %1442 = vadd.xlane.f32.xlu0 %v1441_v11 }
 0x460   : > { %v1443_v20 = vpop.xlane.xlu0 %1442 }
 0x461   : > { %v1444_v54 = vrot.slane %v1443_v20, 4 }
 0x463   : > { %v1445_v46 = vadd.f32 %v1444_v54, %v1443_v20 }
 0x465   : > { %v1446_v58 = vrot.slane %v1445_v46, 2 }
 0x467   : > { %v1447_v22 = vadd.f32 %v1446_v58, %v1445_v46 }
 0x469   : > { %v1448_v62 = vrot.slane %v1447_v22, 1 }
 0x46b   : > { %v1449_v37 = vadd.f32 %v1448_v62, %v1447_v22 }
 0x46d   : > { %1714 = vpush %v1449_v37 }
 0x49a   : > { %1453 = sbr.rel (%p1614_p5) target bundleno = 1185 (0x4a1), region = 64 }
 0x49e   : > { %s1715_s16 = spop %1714 }
 0x49f   : > { %v2193_v51 = vmov 0.0  }
 0x4a0   : > { %1454 = vst [vmem:[#allocation11] sm:$0xff] %v2193_v51 }
 0x4a1 PF: > { %v1456_v60 = vstv %s1715_s16  ;;  %s3922_s17 = sadd.s32 4294967295, %s2179_s23   ;;  %s2194_s11 = smov [#allocation11]  }
 0x4a2   : > { %p3592_p12 = scmp.eq.s32.totalorder %s3922_s17, 1  ;;  %s1468_s12 = sshll.u32 %s2194_s11, 4  ;;  %s1469_s12 = int_to_ptr.vmem [resolvable:$true] %s1468_s12 }
 0x4a3   : > { %s2093_s13 = scalar_lea.vmem %s1469_s12, 128  ;;  %p2100_p3 = scmp.lt.s32.totalorder %s1469_s12, %s1469_s12 }
 0x4a4   : > { %p2094_p13 = scmp.ne.s32.totalorder %s1469_s12, %s2093_s13  ;;  %p2101_p6 = scmp.lt.s32.totalorder %s2093_s13, %s2093_s13 }
 0x4a6   : > { %p2095_p7 = pnand %p2094_p13, %p3592_p12  ;;  %p2102_p9 = por %p2101_p6, %p2100_p3 }
 0x4a7   : > { %v1455_v56 = vld [vmem:[#allocation11] sm:$0xff] }
 0x4a8   : > { %v1457_v38 = vadd.f32 %v1456_v60, %v1455_v56  ;;  %p2096_p2 = pneg %p2095_p7 }
 0x4aa   : > { %1458 = vst [vmem:[#allocation11] sm:$0xff] %v1457_v38  ;;  %p2103_p8 = pnand %p2102_p9, %p2096_p2 }
 0x4ac   : > { %2106 = shalt.err (!%p2103_p8)
}
 0x4ad   : > { %1735 = dma.vmem_to_hbm [thread:$0]  (%p3592_p12), %s1469_s12, 128, %s3630_s5, [#allocation4]  }
 0x4ae   : > { %2154 = dma.done.wait (%p3592_p12), [#allocation4], 128  }
 0x4af   : > { %2156 = vsyncadd (%p3592_p12), [#allocation4], 4294967168 }
 0x4b0 PF: > { %s21_s23 = sadd.s32 1, %s2179_s23   ;;  %s3924_s18 = smov %s2163_s19 }
 0x4b1   : > { %p18_p10 = scmp.ge.s32.totalorder %s21_s23, 4   ;;  %s3925_s19 = smov %s2167_s20 }
 0x4b2   : > { %s3926_s20 = smov %s2340_s8  ;;  %s3927_s21 = smov %s2175_s22 }
 0x4b3   : > { %s3928_s22 = smov %s3930_s15  ;;  %20 = sbr.rel (!%p18_p10) target bundleno = 7 (0x7), region = 101 }
 0x4b8   :  { %1481 = vsyncpa [#allocation3], 1 }
 0x4b9   :  { %1483 = vsyncpa [#allocation3 + $0x1], 1 }
 0x4ba   :  { %1484 = vsyncpa [#allocation6], 1 }
 0x4bb   :  { %1485 = vsyncpa [#allocation9], 1 }
 0x4bc   :  { %1486 = vsyncpa [#allocation4], 1 }
 0x4bd   :  { %1488 = vsyncpa [#allocation4 + $0x1], 1 }

// kernel: tpu_custom_call.1
= control target key start
LH: loop header
LB: loop body
LE: loop exit
PB: predicated region body
PF: predicated region fallthrough
CT: control target
= control target key end

     0   :  { %10 = vsyncpa [#allocation3], 0  ;;  %s3625_s0 = inlined_call_operand.hbm [shape: bf16[256,128], index: 0, kind: input, shape index: {}]   ;;  %s3626_s1 = inlined_call_operand.hbm [shape: bf16[128,256], index: 1, kind: input, shape index: {}]   ;;  %s3627_s2 = inlined_call_operand.hbm [shape: bf16[128,128], index: 2, kind: input, shape index: {}]   ;;  %s3628_s3 = inlined_call_operand.hbm [shape: bf16[128,128], index: 3, kind: input, shape index: {}]   ;;  %s3629_s4 = inlined_call_operand.hbm [shape: f32[128,128], index: 4, kind: input, shape index: {}]   ;;  %s3630_s5 = inlined_call_operand.hbm [shape: f32[8,128], index: 5, kind: output, shape index: {}]  }
   0x1   :  { %12 = vsyncpa [#allocation3 + $0x1], 0 }
   0x2   :  { %13 = vsyncpa [#allocation6], 0 }
   0x3   :  { %14 = vsyncpa [#allocation9], 0 }
   0x4   :  { %15 = vsyncpa [#allocation4], 0  ;;  %s2225_s18 = smov 0   ;;  %s2227_s19 = smov 0  }
   0x5   :  { %s2229_s20 = smov 0   ;;  %s2231_s21 = smov 0  }
   0x6   :  { %s2233_s22 = smov 0   ;;  %s2235_s23 = smov 0  }
   0x7 LB: > { %s3631_s24 = sadd.s32 4294967295, %s2179_s23   ;;  %p55_p0 = scmp.ne.s32.totalorder %s2163_s19, %s2159_s18  ;;  %s2179_s23 = sphi %s2235_s23, %s21_s23   ;;  %s2175_s22 = sphi %s2233_s22, %s3928_s22   ;;  %s2171_s21 = sphi %s2231_s21, %s3927_s21   ;;  %s2167_s20 = sphi %s2229_s20, %s3926_s20   ;;  %s2163_s19 = sphi %s2227_s19, %s3925_s19   ;;  %s2159_s18 = sphi %s2225_s18, %s3924_s18  }
   0x8   : > { %p2257_p1 = scmp.eq.s32.totalorder %s3631_s24, 0  ;;  %p1575_p2 = scmp.ge.s32.totalorder %s2179_s23, 1 }
   0x9   : > { %p191_p3 = scmp.lt.s32.totalorder %s2179_s23, 3  ;;  %s2181_s28 = smov [#allocation5]  }
   0xa   : > { %p2265_p4 = por %p2257_p1, %p55_p0  ;;  %s203_s29 = sshll.u32 %s2181_s28, 4  ;;  %s204_s29 = int_to_ptr.vmem [resolvable:$true] %s203_s29 }
   0xb   : > { %p2269_p5 = pnand %p1575_p2, %p191_p3  ;;  %s2182_s6 = smov [#allocation8]  }
   0xc   : > { %s235_s7 = sshll.u32 %s2182_s6, 4  ;;  %s1972_s8 = scalar_lea.vmem %s204_s29, 2048  ;;  %s236_s7 = int_to_ptr.vmem [resolvable:$true] %s235_s7 }
   0xd   : > { %p1738_p6 = pneg %p2269_p5  ;;  %p1973_p9 = scmp.ne.s32.totalorder %s204_s29, %s1972_s8 }
   0xe   : > { %p1980_p12 = scmp.lt.s32.totalorder %s204_s29, %s204_s29  ;;  %p1981_p13 = scmp.lt.s32.totalorder %s1972_s8, %s1972_s8 }
   0xf   : > { %p2277_p7 = pnand %p1738_p6, %p2257_p1 }
  0x10   : > { %p1982_p0 = por %p1981_p13, %p1980_p12 }
  0x11   : > { %p1963_p8 = pneg %p2277_p7 }
  0x13   : > { %p1975_p10 = pnand %p1973_p9, %p1963_p8 }
  0x15   : > { %p1976_p11 = pneg %p1975_p10 }
  0x17   : > { %p1983_p2 = pnand %p1982_p0, %p1976_p11 }
  0x19   : > { %1986 = shalt.err (!%p1983_p2)
}
  0x1a   : > { %s2183_s9 = smov 128   ;;  %s2184_s10 = smov 8  }
  0x1b   : > { %1741 = dma.hbm_to_vmem [thread:$0]  (!%p2277_p7), %s3626_s1, 2048, %s204_s29, [#allocation6], %s2183_s9, %s2183_s9, %s2184_s10  }
  0x1c   : > { %s2185_s13 = smov [#allocation7]   ;;  %s1998_s15 = scalar_lea.vmem %s236_s7, 1024 }
  0x1d   : > { %s219_s14 = sshll.u32 %s2185_s13, 4  ;;  %p1999_p3 = scmp.ne.s32.totalorder %s236_s7, %s1998_s15  ;;  %s220_s14 = int_to_ptr.vmem [resolvable:$true] %s219_s14 }
  0x1e   : > { %p2006_p10 = scmp.lt.s32.totalorder %s236_s7, %s236_s7  ;;  %p2007_p11 = scmp.lt.s32.totalorder %s1998_s15, %s1998_s15 }
  0x1f   : > { %p2001_p6 = pnand %p1999_p3, %p1963_p8 }
  0x20   : > { %p2008_p12 = por %p2007_p11, %p2006_p10 }
  0x21   : > { %p2002_p9 = pneg %p2001_p6 }
  0x23   : > { %p2009_p13 = pnand %p2008_p12, %p2002_p9 }
  0x25   : > { %2012 = shalt.err (!%p2009_p13)
}
  0x26   : > { %s2186_s16 = smov 64   ;;  %s2187_s17 = smov 4  }
  0x27   : > { %1747 = dma.hbm_to_vmem [thread:$0]  (!%p2277_p7), %s3628_s3, 1024, %s236_s7, [#allocation9], %s2186_s16, %s2186_s16, %s2187_s17  }
  0x28   : > { %s2024_s29 = scalar_lea.vmem %s220_s14, 1024  ;;  %p2032_p6 = scmp.lt.s32.totalorder %s220_s14, %s220_s14 }
  0x29   : > { %p2025_p0 = scmp.ne.s32.totalorder %s220_s14, %s2024_s29  ;;  %p2033_p9 = scmp.lt.s32.totalorder %s2024_s29, %s2024_s29 }
  0x2b   : > { %p2027_p2 = pnand %p2025_p0, %p1963_p8  ;;  %p2034_p10 = por %p2033_p9, %p2032_p6 }
  0x2d   : > { %p2028_p3 = pneg %p2027_p2 }
  0x2f   : > { %p2035_p11 = pnand %p2034_p10, %p2028_p3 }
  0x31   : > { %2038 = shalt.err (!%p2035_p11)
}
  0x32   : > { %1744 = dma.hbm_to_vmem [thread:$0]  (!%p2277_p7), %s3627_s2, 1024, %s220_s14, [#allocation6], %s2186_s16, %s2186_s16, %s2187_s17  }
  0x33   : > { %s2188_s7 = smov [#allocation10]  }
  0x34   : > { %s251_s11 = sshll.u32 %s2188_s7, 4  ;;  %s252_s11 = int_to_ptr.vmem [resolvable:$true] %s251_s11 }
  0x35   : > { %s2050_s12 = scalar_lea.vmem %s252_s11, 2048  ;;  %p2058_p2 = scmp.lt.s32.totalorder %s252_s11, %s252_s11 }
  0x36   : > { %p2051_p12 = scmp.ne.s32.totalorder %s252_s11, %s2050_s12  ;;  %p2059_p3 = scmp.lt.s32.totalorder %s2050_s12, %s2050_s12 }
  0x38   : > { %p2053_p13 = pnand %p2051_p12, %p1963_p8  ;;  %p2060_p6 = por %p2059_p3, %p2058_p2 }
  0x3a   : > { %p2054_p0 = pneg %p2053_p13 }
  0x3c   : > { %p2061_p9 = pnand %p2060_p6, %p2054_p0 }
  0x3e   : > { %2064 = shalt.err (!%p2061_p9)
}
  0x3f   : > { %1750 = dma.hbm_to_vmem [thread:$0]  (!%p2277_p7), %s3629_s4, 2048, %s252_s11, [#allocation9], %s2183_s9, %s2183_s9, %s2184_s10  }
  0x40   : > { %s30_s15 = sadd.s32 1, %s2175_s22  ;;  %s42_s18 = sadd.s32 1, %s2167_s20 }
  0x41   : > { %p31_p8 = scmp.ge.s32.totalorder %s30_s15, 2  ;;  %p49_p10 = scmp.ne.s32.totalorder %s2167_s20, %s2163_s19 }
  0x42   : > { %p50_p11 = scmp.eq.s32.totalorder %s2179_s23, 0  ;;  %p1759_p12 = scmp.lt.s32.totalorder %s2179_s23, 2 }
  0x43   : > { %s3930_s15 = smov (%p31_p8, %s30_s15), 0  ;;  %s265_s30 = sand.u32 1, %s2167_s20  }
  0x44   : > { %p51_p13 = por %p50_p11, %p49_p10  ;;  %s39_s28 = ssub.s32 %s2175_s22, %s3930_s15 }
  0x45   : > { %p40_p0 = scmp.eq.s32.totalorder %s39_s28, 0  ;;  %s1581_s29 = sshll.u32 %s265_s30, 6 }
  0x46   : > { %s1619_s6 = sshll.u32 %s2175_s22, 10  ;;  %s269_s11 = scalar_lea.vmem [#allocation2], %s1581_s29 }
  0x47   : > { %s2340_s8 = scalar_select %p40_p0, %s2167_s20, %s42_s18  }
  0x48   : > { %s276_s10 = scalar_lea.hbm %s3625_s0, %s1619_s6  ;;  %s277_s12 = sshll.u32 %s269_s11, 4  ;;  %s278_s12 = int_to_ptr.vmem [resolvable:$true] %s277_s12 }
  0x49   : > { %p2347_p7 = pnand %p1759_p12, %p51_p13  ;;  %s266_s14 = scalar_lea.sflag [#allocation3], %s265_s30 }
  0x4a   : > { %s2078_s28 = scalar_lea.vmem %s278_s12, 1024  ;;  %s2189_s18 = smov [#allocation2]  }
  0x4b   : > { %p2067_p2 = pneg %p2347_p7  ;;  %p2079_p3 = scmp.ne.s32.totalorder %s278_s12, %s2078_s28 }
  0x4c   : > { %s2083_s24 = sshll.u32 %s2189_s18, 4  ;;  %s2084_s24 = int_to_ptr.vmem [resolvable:$false] %s2083_s24 }
  0x4d   : > { %p2081_p6 = pnand %p2079_p3, %p2067_p2  ;;  %s2085_s6 = scalar_lea.vmem %s2084_s24, 2048 }
  0x4e   : > { %p2086_p8 = scmp.lt.s32.totalorder %s278_s12, %s2084_s24  ;;  %p2087_p10 = scmp.lt.s32.totalorder %s2085_s6, %s2078_s28 }
  0x4f   : > { %p2082_p9 = pneg %p2081_p6 }
  0x50   : > { %p2088_p11 = por %p2087_p10, %p2086_p8 }
  0x52   : > { %p2089_p0 = pnand %p2088_p11, %p2082_p9 }
  0x54   : > { %2092 = shalt.err (!%p2089_p0)
}
  0x55   : > { %1754 = dma.hbm_to_vmem [thread:$0]  (!%p2347_p7), %s276_s10, 1024, %s278_s12, %s266_s14, %s2186_s16, %s2186_s16, %s2187_s17  }
  0x56   : > { %289 = sbr.rel (%p2269_p5) target bundleno = 1200 (0x4b0), region = 40 }
  0x5b   : > { %s291_s30 = sand.u32 1, %s2163_s19  }
  0x5c   : > { %s1585_s29 = sshll.u32 %s291_s30, 6  ;;  %s292_s7 = scalar_lea.sflag [#allocation3], %s291_s30 }
  0x5d   : > { %s2361_s9 = scalar_lea.vmem [#allocation2], %s1585_s29 }
  0x5e   : > { %2142 = dma.done.wait (%p2265_p4), %s292_s7, 1024  }
  0x5f   : > { %2144 = vsyncadd (%p2265_p4), %s292_s7, 4294966272 }
  0x60   : > { %2146 = dma.done.wait (%p2257_p1), [#allocation6], 3072  }
  0x61   : > { %2148 = vsyncadd (%p2257_p1), [#allocation6], 4294964224 }
  0x62   : > { %2150 = dma.done.wait (%p2257_p1), [#allocation9], 3072  }
  0x63   : > { %2152 = vsyncadd (%p2257_p1), [#allocation9], 4294964224  ;;  %v2190_v0 = vmov 0   ;;  %v1827_v1 = vld [vmem:[#allocation5 + $0x74] ss:$8 sps:$4 sm:$0xff]   ;;  %v1011_v12 = vld [vmem:[#allocation10 + $0x8] sm:$0xff] }
  0x64   : > { %531 = vmatprep.mubr.bf16.mxu0 %v2190_v0  ;;  %571 = vmatprep.mubr.bf16.mxu1 %v2190_v0  ;;  %v1829_v2 = vld [vmem:[#allocation5 + $0x70] ss:$8 sps:$4 sm:$0xff]   ;;  %v1830_v3 = vld [vmem:[#allocation5 + $0x64] ss:$8 sps:$4 sm:$0xff]   ;;  %v1832_v4 = vld [vmem:[#allocation5 + $0x60] ss:$8 sps:$4 sm:$0xff]  }
  0x65   : > { %499 = vmatprep.subr.bf16.mxu0 %v1827_v1  ;;  %1698 = vmatprep.subr.bf16.mxu1 %v1827_v1  ;;  %v1833_v5 = vld [vmem:[#allocation5 + $0x54] ss:$8 sps:$4 sm:$0xff]   ;;  %v1835_v6 = vld [vmem:[#allocation5 + $0x50] ss:$8 sps:$4 sm:$0xff]   ;;  %v1836_v7 = vld [vmem:[#allocation5 + $0x44] ss:$8 sps:$4 sm:$0xff]  }
  0x66   : > { %500 = vmatpush1.bf16.msra.mxu0 %v1829_v2  ;;  %1706 = vmatpush1.bf16.msra.mxu1 %v1829_v2  ;;  %v1838_v8 = vld [vmem:[#allocation5 + $0x40] ss:$8 sps:$4 sm:$0xff]   ;;  %v1839_v9 = vld [vmem:[#allocation5 + $0x34] ss:$8 sps:$4 sm:$0xff]   ;;  %v1841_v10 = vld [vmem:[#allocation5 + $0x30] ss:$8 sps:$4 sm:$0xff]  }
  0x67   : > { %501 = vmatprep.subr.bf16.mxu0 %v1830_v3  ;;  %1699 = vmatprep.subr.bf16.mxu1 %v1830_v3  ;;  %v1842_v11 = vld [vmem:[#allocation5 + $0x24] ss:$8 sps:$4 sm:$0xff]   ;;  %v1844_v13 = vld [vmem:[#allocation5 + $0x20] ss:$8 sps:$4 sm:$0xff]   ;;  %v1845_v15 = vld [vmem:[#allocation5 + $0x14] ss:$8 sps:$4 sm:$0xff]  }
  0x68   : > { %v1010_v14 = vld [vmem:[#allocation10] sm:$0xff]  ;;  %s2191_s24 = smov 1   ;;  %v1012_v16 = vld [vmem:[#allocation10 + $0x10] sm:$0xff]  ;;  %v1013_v17 = vld [vmem:[#allocation10 + $0x18] sm:$0xff]  ;;  %p842_p1 = scmp.eq.s32.totalorder %s2171_s21, 0 }
  0x69   : > { %1284 = vrot.lane.b32.xlu0 %v1011_v12, %s2191_s24  ;;  %1282 = vrot.lane.b32.xlu1 %v1010_v14, %s2191_s24  ;;  %v1847_v18 = vld [vmem:[#allocation5 + $0x10] ss:$8 sps:$4 sm:$0xff]   ;;  %v1848_v19 = vld [vmem:[#allocation5 + $0x4] ss:$8 sps:$4 sm:$0xff]   ;;  %v1850_v21 = vld [vmem:[#allocation5] ss:$8 sps:$4 sm:$0xff]  }
  0x6a   : > { %502 = vmatpush1.bf16.msra.mxu0 %v1832_v4  ;;  %1707 = vmatpush1.bf16.msra.mxu1 %v1832_v4  ;;  %v1014_v20 = vld [vmem:[#allocation10 + $0x20] sm:$0xff]  ;;  %v1853_v24 = vld [vmem:[%s2361_s9 + $0x8] sm:$0xff]   ;;  %v1855_v26 = vld [vmem:[%s2361_s9 + $0x10] sm:$0xff]   ;;  %p910_p4 = scmp.eq.s32.totalorder %s2171_s21, 1  ;;  %s2192_s27 = smov 127  }
  0x6b   : > { %503 = vmatprep.subr.bf16.mxu0 %v1833_v5  ;;  %1700 = vmatprep.subr.bf16.mxu1 %v1833_v5  ;;  %v1851_v22 = vld [vmem:[%s2361_s9] sm:$0xff]   ;;  %v1854_v25 = vld [vmem:[%s2361_s9 + $0x28] sm:$0xff]   ;;  %v1856_v27 = vld [vmem:[%s2361_s9 + $0x30] sm:$0xff]   ;;  %s843_s25 = scalar_select %p842_p1, 1, 0 }
  0x6c   : > { %v1852_v23 = vld [vmem:[%s2361_s9 + $0x20] sm:$0xff]   ;;  %v1857_v28 = vld [vmem:[%s2361_s9 + $0x18] sm:$0xff]   ;;  %s911_s26 = scalar_select %p910_p4, 1, 0 }
  0x6d   : > { %1286 = vrot.lane.b32.xlu0 %v1012_v16, %s2191_s24  ;;  %1288 = vrot.lane.b32.xlu1 %v1013_v17, %s2191_s24  ;;  %v1858_v29 = vld [vmem:[%s2361_s9 + $0x38] sm:$0xff]   ;;  %p1614_p5 = scmp.ne.s32.totalorder %s2171_s21, 0 }
  0x6e   : > { %504 = vmatpush1.bf16.msra.mxu0 %v1835_v6  ;;  %1708 = vmatpush1.bf16.msra.mxu1 %v1835_v6 }
  0x6f   : > { %505 = vmatprep.subr.bf16.mxu0 %v1836_v7  ;;  %1701 = vmatprep.subr.bf16.mxu1 %v1836_v7 }
  0x71   : > { %1290 = vrot.lane.b32.xlu0 %v1014_v20, %s2191_s24 }
  0x72   : > { %506 = vmatpush1.bf16.msra.mxu0 %v1838_v8  ;;  %1709 = vmatpush1.bf16.msra.mxu1 %v1838_v8 }
  0x73   : > { %507 = vmatprep.subr.bf16.mxu0 %v1839_v9  ;;  %1702 = vmatprep.subr.bf16.mxu1 %v1839_v9 }
  0x76   : > { %508 = vmatpush1.bf16.msra.mxu0 %v1841_v10  ;;  %1710 = vmatpush1.bf16.msra.mxu1 %v1841_v10 }
  0x77   : > { %509 = vmatprep.subr.bf16.mxu0 %v1842_v11  ;;  %1703 = vmatprep.subr.bf16.mxu1 %v1842_v11 }
  0x7a   : > { %510 = vmatpush1.bf16.msra.mxu0 %v1844_v13  ;;  %1711 = vmatpush1.bf16.msra.mxu1 %v1844_v13 }
  0x7b   : > { %511 = vmatprep.subr.bf16.mxu0 %v1845_v15  ;;  %1704 = vmatprep.subr.bf16.mxu1 %v1845_v15 }
  0x7e   : > { %512 = vmatpush1.bf16.msra.mxu0 %v1847_v18  ;;  %1712 = vmatpush1.bf16.msra.mxu1 %v1847_v18 }
  0x7f   : > { %513 = vmatprep.subr.bf16.mxu0 %v1848_v19  ;;  %1705 = vmatprep.subr.bf16.mxu1 %v1848_v19 }
  0x82   : > { %514 = vmatpush1.bf16.msra.mxu0 %v1850_v21  ;;  %1713 = vmatpush1.bf16.msra.mxu1 %v1850_v21 }
  0x85   : > { %532 = vmatmul.mubr.bf16.vlgmr.msra.gmra.mxu0 %v1851_v22  ;;  %572 = vmatmul.mubr.bf16.vlgmr.msra.gmra.mxu1 %v1852_v23 }
  0x86   : > { %541 = vmatprep.mubr.bf16.mxu0 %v2190_v0  ;;  %581 = vmatprep.mubr.bf16.mxu1 %v2190_v0 }
  0x8d   : > { %542 = vmatmul.mubr.bf16.gmra.mxu0 %v1853_v24  ;;  %582 = vmatmul.mubr.bf16.gmra.mxu1 %v1854_v25 }
  0x8e   : > { %551 = vmatprep.mubr.bf16.mxu0 %v2190_v0  ;;  %591 = vmatprep.mubr.bf16.mxu1 %v2190_v0 }
  0x95   : > { %552 = vmatmul.mubr.bf16.gmra.mxu0 %v1855_v26  ;;  %592 = vmatmul.mubr.bf16.gmra.mxu1 %v1856_v27 }
  0x96   : > { %561 = vmatprep.mubr.bf16.mxu0 %v2190_v0  ;;  %601 = vmatprep.mubr.bf16.mxu1 %v2190_v0 }
  0x9d   : > { %562 = vmatmul.mubr.bf16.gmra.mxu0 %v1857_v28  ;;  %602 = vmatmul.mubr.bf16.gmra.mxu1 %v1858_v29 }
 0x145   : > { %v533_v30 = vpop.f32.mrf.mxu0  ;;  %v573_v31 = vpop.f32.mrf.mxu1 }
 0x146   : > { %v2396_v34 = vmul.f32 14.285714, %v533_v30  ;;  %v2400_v38 = vmul.f32 14.285714, %v573_v31 }
 0x147   : > { %v535_v32 = vpop.f32.mrf.mxu0  ;;  %v575_v33 = vpop.f32.mrf.mxu1 }
 0x148   : > { %v2398_v35 = vmul.f32 14.285714, %v535_v32  ;;  %v2402_v39 = vmul.f32 14.285714, %v575_v33 }
 0x149   : > { %v537_v36 = vpop.f32.mrf.mxu0  ;;  %v577_v37 = vpop.f32.mrf.mxu1 }
 0x14a   : > { %v644_v40 = vmax.f32 %v2396_v34, %v2398_v35  ;;  %v2406_v43 = vmul.f32 14.285714, %v577_v37  ;;  %v668_v49 = vmax.f32 %v2400_v38, %v2402_v39  ;;  %v2416_v52 = vmul.f32 14.285714, %v537_v36 }
 0x14b   : > { %v539_v41 = vpop.f32.mrf.mxu0  ;;  %v579_v42 = vpop.f32.mrf.mxu1 }
 0x14c   : > { %v2408_v44 = vmul.f32 14.285714, %v579_v42  ;;  %645 = vmax.xlane.f32.xlu0 %v644_v40  ;;  %v2410_v47 = vmul.f32 14.285714, %v539_v41 }
 0x14d   : > { %v543_v45 = vpop.f32.mrf.mxu0  ;;  %v583_v46 = vpop.f32.mrf.mxu1 }
 0x14e   : > { %v671_v48 = vmax.f32 %v2406_v43, %v2408_v44  ;;  %v2418_v53 = vmul.f32 14.285714, %v543_v45  ;;  %v2422_v57 = vmul.f32 14.285714, %v583_v46  ;;  %v647_v59 = vmax.f32 %v2416_v52, %v2410_v47 }
 0x14f   : > { %v545_v50 = vpop.f32.mrf.mxu0  ;;  %v585_v51 = vpop.f32.mrf.mxu1 }
 0x150   : > { %v2420_v54 = vmul.f32 14.285714, %v545_v50  ;;  %672 = vmax.xlane.f32.xlu1 %v671_v48  ;;  %669 = vmax.xlane.f32.xlu0 %v668_v49  ;;  %v2424_v58 = vmul.f32 14.285714, %v585_v51 }
 0x151   : > { %v547_v55 = vpop.f32.mrf.mxu0  ;;  %v587_v56 = vpop.f32.mrf.mxu1 }
 0x152   : > { %v650_v60 = vmax.f32 %v2418_v53, %v2420_v54  ;;  %v2430_v63 = vmul.f32 14.285714, %v547_v55  ;;  %v674_v4 = vmax.f32 %v2422_v57, %v2424_v58  ;;  %v2440_v8 = vmul.f32 14.285714, %v587_v56  ;;  %v1015_v56 = vld [vmem:[#allocation10 + $0x28] sm:$0xff] }
 0x153   : > { %v549_v61 = vpop.f32.mrf.mxu0  ;;  %v589_v62 = vpop.f32.mrf.mxu1 }
 0x154   : > { %v2432_v0 = vmul.f32 14.285714, %v549_v61  ;;  %648 = vmax.xlane.f32.xlu0 %v647_v59  ;;  %651 = vmax.xlane.f32.xlu1 %v650_v60  ;;  %v2434_v3 = vmul.f32 14.285714, %v589_v62  ;;  %v2493_v59 = vpop.permute.xlu0 %1284  ;;  %v788_v60 = vlaneseq }
 0x155   : > { %v553_v1 = vpop.f32.mrf.mxu0  ;;  %v593_v2 = vpop.f32.mrf.mxu1  ;;  %3674 = vst [vmem:[#allocation21_spill] sm:$0xff] %v2493_v59 }
 0x156   : > { %v653_v5 = vmax.f32 %v2430_v63, %v2432_v0  ;;  %v2442_v9 = vmul.f32 14.285714, %v553_v1  ;;  %v2446_v13 = vmul.f32 14.285714, %v593_v2  ;;  %v677_v15 = vmax.f32 %v2440_v8, %v2434_v3 }
 0x157   : > { %v555_v6 = vpop.f32.mrf.mxu0  ;;  %v595_v7 = vpop.f32.mrf.mxu1  ;;  %v2499_v62 = vand.u32 127, %v788_v60  ;;  %v2501_v1 = vshrl.u32 %v788_v60, 7  ;;  %v844_v2 = vstv %s843_s25 }
 0x158   : > { %v2444_v10 = vmul.f32 14.285714, %v555_v6  ;;  %675 = vmax.xlane.f32.xlu0 %v674_v4  ;;  %654 = vmax.xlane.f32.xlu1 %v653_v5  ;;  %v2448_v14 = vmul.f32 14.285714, %v595_v7  ;;  %v2497_v61 = vpop.permute.xlu0 %1286  ;;  %v2503_v4 = vpop.permute.xlu1 %1282  ;;  %v912_v5 = vstv %s911_s26  ;;  %vm2509_vm1 = vcmp.eq.s32.totalorder %v844_v2, 1 }
 0x159   : > { %v557_v11 = vpop.f32.mrf.mxu0  ;;  %v597_v12 = vpop.f32.mrf.mxu1  ;;  %3675 = vst [vmem:[#allocation22_spill] sm:$0xff] %v2497_v61  ;;  %3676 = vst [vmem:[#allocation23_spill] sm:$0xff] %v2501_v1  ;;  %vm825_vm0 = vcmp.eq.s32.totalorder %v2499_v62, %v2501_v1  ;;  %v3679_v7 = vmov 0  ;;  %vm2513_vm2 = vcmp.eq.s32.totalorder %v912_v5, 1  ;;  %v2572_v5 = vadd.s32 24, %v2501_v1 }
 0x15a   : > { %v656_v16 = vmax.f32 %v2442_v9, %v2444_v10  ;;  %v2454_v19 = vmul.f32 14.285714, %v557_v11  ;;  %v680_v25 = vmax.f32 %v2446_v13, %v2448_v14  ;;  %v2466_v27 = vmul.f32 14.285714, %v597_v12  ;;  %3677 = vst [vmem:[#allocation24_spill] sm:$0xff] %v2503_v4  ;;  %vm2520_vm3 = vmand %vm825_vm0, %vm2509_vm1 }
 0x15b   : > { %v559_v17 = vpop.f32.mrf.mxu0  ;;  %v599_v18 = vpop.f32.mrf.mxu1  ;;  %v3680_v7 = vsel %vm2509_vm1, 4294967295, %v3679_v7  ;;  %v799_v12 = vadd.s32 64, %v2501_v1  ;;  %vm2530_vm4 = vmand %vm825_vm0, %vm2513_vm2  ;;  %v2614_v59 = vadd.s32 40, %v2501_v1 }
 0x15c   : > { %v2456_v20 = vmul.f32 14.285714, %v559_v17  ;;  %678 = vmax.xlane.f32.xlu1 %v677_v15  ;;  %657 = vmax.xlane.f32.xlu0 %v656_v16  ;;  %v2458_v23 = vmul.f32 14.285714, %v599_v18  ;;  %v2505_v6 = vpop.permute.xlu0 %1290  ;;  %v2524_v16 = vld [vmem:[#allocation7] sm:$0xff]   ;;  %v2526_v17 = vpop.permute.xlu1 %1288 }
 0x15d   : > { %v563_v21 = vpop.f32.mrf.mxu0  ;;  %v603_v22 = vpop.f32.mrf.mxu1  ;;  %3678 = vst [vmem:[#allocation25_spill] sm:$0xff] %v2505_v6  ;;  %3685 = vst [vmem:[#allocation26_spill] sm:$0xff] %v2526_v17  ;;  %vm833_vm5 = vcmp.eq.s32.totalorder %v2499_v62, %v799_v12  ;;  %v2574_v12 = vld [vmem:[#allocation7 + $0x8] sm:$0xff]  }
 0x15e   : > { %v2460_v24 = vmul.f32 14.285714, %v563_v21  ;;  %v659_v26 = vmax.f32 %v2454_v19, %v2456_v20  ;;  %v2470_v31 = vmul.f32 14.285714, %v603_v22  ;;  %v683_v40 = vmax.f32 %v2466_v27, %v2458_v23  ;;  %vm2552_vm7 = vmand %vm833_vm5, %vm2509_vm1 }
 0x15f   : > { %v565_v28 = vpop.f32.mrf.mxu0  ;;  %v605_v29 = vpop.f32.mrf.mxu1  ;;  %v800_v22 = vadd.s32 72, %v2501_v1  ;;  %vm2558_vm8 = vmand %vm833_vm5, %vm2513_vm2 }
 0x160   : > { %v2468_v30 = vmul.f32 14.285714, %v565_v28  ;;  %681 = vmax.xlane.f32.xlu0 %v680_v25  ;;  %660 = vmax.xlane.f32.xlu1 %v659_v26  ;;  %3670 = vst [vmem:[#allocation17_spill] sm:$0xff] %v2470_v31  ;;  %v2472_v32 = vmul.f32 14.285714, %v605_v29  ;;  %v792_v28 = vadd.s32 8, %v2501_v1 }
 0x161   : > { %v567_v33 = vpop.f32.mrf.mxu0  ;;  %v607_v36 = vpop.f32.mrf.mxu1  ;;  %v2540_v29 = vadd.s32 16, %v2501_v1  ;;  %vm834_vm6 = vcmp.eq.s32.totalorder %v2499_v62, %v800_v22  ;;  %v2611_v22 = vadd.s32 96, %v2501_v1 }
 0x162   : > { %3669 = vst [vmem:[#allocation16_spill] sm:$0xff] %v2468_v30  ;;  %3671 = vst [vmem:[#allocation18_spill] sm:$0xff] %v2472_v32  ;;  %v2474_v37 = vmul.f32 14.285714, %v567_v33  ;;  %v662_v41 = vmax.f32 %v2460_v24, %v2468_v30  ;;  %v2482_v48 = vmul.f32 14.285714, %v607_v36  ;;  %v686_v50 = vmax.f32 %v2470_v31, %v2472_v32 }
 0x163   : > { %v569_v42 = vpop.f32.mrf.mxu0  ;;  %v609_v45 = vpop.f32.mrf.mxu1  ;;  %v1622_v33 = vunpack.c.l.bf16 %v2524_v16  ;;  %v2543_v36 = vld [vmem:[#allocation7 + $0x20] sm:$0xff]   ;;  %vm826_vm9 = vcmp.eq.s32.totalorder %v2499_v62, %v792_v28  ;;  %vm827_vm10 = vcmp.eq.s32.totalorder %v2499_v62, %v2540_v29  ;;  %vm2580_vm11 = vmand %vm834_vm6, %vm2509_vm1 }
 0x164   : > { %v2480_v46 = vmul.f32 14.285714, %v569_v42  ;;  %684 = vmax.xlane.f32.xlu1 %v683_v40  ;;  %663 = vmax.xlane.f32.xlu0 %v662_v41  ;;  %3672 = vst [vmem:[#allocation19_spill] sm:$0xff] %v2482_v48  ;;  %v2484_v49 = vmul.f32 14.285714, %v609_v45  ;;  %vm2596_vm12 = vmand %vm834_vm6, %vm2513_vm2 }
 0x165   : > { %vm2632_vm14 = vmand %vm826_vm9, %vm2509_vm1 }
 0x166   : > { %3673 = vst [vmem:[#allocation20_spill] sm:$0xff] %v2484_v49  ;;  %v665_v51 = vmax.f32 %v2474_v37, %v2480_v46  ;;  %v689_v55 = vmax.f32 %v2482_v48, %v2484_v49  ;;  %v2641_v48 = vadd.s32 48, %v2501_v1  ;;  %vm2648_vm0 = vmand %vm826_vm9, %vm2513_vm2 }
 0x167   : > { %vm2676_vm6 = vmand %vm827_vm10, %vm2509_vm1 }
 0x168   : > { %687 = vmax.xlane.f32.xlu0 %v686_v50  ;;  %666 = vmax.xlane.f32.xlu1 %v665_v51  ;;  %v3691_v50 = vmov 0  ;;  %3703 = vst [vmem:[#allocation32_spill] sm:$0xff] %v2641_v48  ;;  %vm2691_vm5 = vmand %vm827_vm10, %vm2513_vm2 }
 0x169   : > { %v3692_v50 = vsel %vm2558_vm8, 4294967295, %v3691_v50 }
 0x16a   : > { %3693 = vst [vmem:[#allocation28_spill] sm:$0xff] %v3692_v50 }
 0x16c   : > { %690 = vmax.xlane.f32.xlu1 %v689_v55  ;;  %v2565_v55 = vadd.s32 80, %v2501_v1 }
 0x16e   : > { %vm835_vm13 = vcmp.eq.s32.totalorder %v2499_v62, %v2565_v55  ;;  %v3717_v55 = vmov 0 }
 0x16f   : > { %vm2712_vm10 = vmand %vm835_vm13, %vm2509_vm1 }
 0x170   : > { %vm2730_vm15 = vmand %vm835_vm13, %vm2513_vm2  ;;  %vm3716_vm13 = vcmp.eq.s32.totalorder %v2499_v62, %v2572_v5 }
 0x171   : > { %vm2746_vm9 = vmand %vm3716_vm13, %vm2509_vm1 }
 0x172   : > { %v3718_v55 = vsel %vm2746_vm9, 4294967295, %v3717_v55 }
 0x17e   : > { %1292 = vrot.lane.b32.xlu0 %v1015_v56, %s2191_s24  ;;  %v1638_v56 = vunpack.c.l.bf16 %v2543_v36 }
 0x1d5   : > { %v646_v21 = vpop.xlane.xlu0 %645 }
 0x1d6   : > { %v692_v25 = vsub.f32 %v2396_v34, %v646_v21  ;;  %v693_v26 = vsub.f32 %v2398_v35, %v646_v21  ;;  %v3688_v35 = vmov 0 }
 0x1d7   : > { %v3689_v35 = vsel %vm2552_vm7, 4294967295, %v3688_v35 }
 0x1d8   : > { %v862_v40 = vsel %vm2520_vm3, 0.0, %v692_v25  ;;  %v930_v41 = vsel %vm2530_vm4, 0.0, %v693_v26  ;;  %3690 = vst [vmem:[#allocation27_spill] sm:$0xff] %v3689_v35  ;;  %v724_v17 = vmul.f32 1.442695, %v692_v25  ;;  %v2622_v25 = vld [vmem:[#allocation7 + $0x30] sm:$0xff]  }
 0x1d9   : > { %v673_v34 = vpop.xlane.xlu1 %672  ;;  %v670_v42 = vpop.xlane.xlu0 %669  ;;  %v978_v45 = vadd.f32 %v930_v41, %v862_v40  ;;  %v2590_v41 = vld [vmem:[#allocation7 + $0x28] sm:$0xff]   ;;  %v2605_v40 = vadd.s32 32, %v2501_v1  ;;  %v726_v4 = vmul.f32 1.442695, %v693_v26  ;;  %3700 = vst [vmem:[#allocation31_spill] sm:$0xff] %v2622_v25 }
 0x1da   : > { %v708_v51 = vsub.f32 %v2400_v38, %v670_v42  ;;  %v709_v60 = vsub.f32 %v2402_v39, %v670_v42  ;;  %v710_v21 = vsub.f32 %v2406_v43, %v673_v34  ;;  %v711_v39 = vsub.f32 %v2408_v44, %v673_v34 }
 0x1db   : > { %v1058_v2 = vmul.f32 %v1622_v33, %v978_v45  ;;  %v2588_v33 = vadd.s32 88, %v2501_v1  ;;  %v3696_v42 = vmov 0  ;;  %1859 = vpow2.f32 %v724_v17 }
 0x1dc   : > { %v3697_v42 = vsel %vm2596_vm12, 4294967295, %v3696_v42  ;;  %v870_v43 = vsel %vm2552_vm7, 0.0, %v708_v51  ;;  %v938_v44 = vsel %vm2558_vm8, 0.0, %v709_v60  ;;  %v760_v31 = vmul.f32 1.442695, %v710_v21 }
 0x1dd   : > { %3698 = vst [vmem:[#allocation29_spill] sm:$0xff] %v3697_v42  ;;  %v649_v34 = vpop.xlane.xlu0 %648  ;;  %v652_v45 = vpop.xlane.xlu1 %651  ;;  %1074 = vadd.xlane.f32.xlu1 %v1058_v2  ;;  %v2618_v2 = vadd.s32 104, %v2501_v1  ;;  %v871_v50 = vsel %vm2580_vm11, 0.0, %v710_v21  ;;  %v939_v49 = vsel %vm2596_vm12, 0.0, %v711_v39  ;;  %v986_v35 = vadd.f32 %v938_v44, %v870_v43 }
 0x1de   : > { %v694_v6 = vsub.f32 %v2416_v52, %v649_v34  ;;  %v695_v32 = vsub.f32 %v2410_v47, %v649_v34  ;;  %v762_v44 = vmul.f32 1.442695, %v711_v39  ;;  %v2654_v34 = vadd.s32 56, %v2501_v1 }
 0x1df   : > { %3699 = vst [vmem:[#allocation30_spill] sm:$0xff] %v2618_v2  ;;  %1861 = vpow2.f32 %v726_v4  ;;  %v756_v2 = vmul.f32 1.442695, %v708_v51  ;;  %v696_v48 = vsub.f32 %v2418_v53, %v652_v45  ;;  %v987_v43 = vadd.f32 %v939_v49, %v871_v50  ;;  %v2669_v50 = vld [vmem:[#allocation8] sm:$0xff]  }
 0x1e0   : > { %1863 = vpow2.f32 %v760_v31  ;;  %v758_v17 = vmul.f32 1.442695, %v709_v60  ;;  %v697_v28 = vsub.f32 %v2420_v54, %v652_v45  ;;  %v1066_v39 = vmul.f32 %v1638_v56, %v986_v35 }
 0x1e1   : > { %v676_v61 = vpop.xlane.xlu0 %675  ;;  %v655_v21 = vpop.xlane.xlu1 %654  ;;  %v728_v42 = vmul.f32 1.442695, %v694_v6  ;;  %v863_v47 = vsel %vm2632_vm14, 0.0, %v694_v6  ;;  %v931_v30 = vsel %vm2648_vm0, 0.0, %v695_v32  ;;  %1865 = vpow2.f32 %v762_v44 }
 0x1e2   : > { %v2665_v4 = vsub.f32 %v2422_v57, %v676_v61  ;;  %v730_v31 = vmul.f32 1.442695, %v695_v32  ;;  %v3706_v54 = vmov 0  ;;  %v2681_v6 = vsub.f32 %v2430_v63, %v655_v21  ;;  %1090 = vadd.xlane.f32.xlu0 %v1066_v39  ;;  %v2754_v39 = vld [vmem:[#allocation8 + $0x20] sm:$0xff]  }
 0x1e3   : > { %v3707_v54 = vsel %vm2676_vm6, 4294967295, %v3706_v54  ;;  %1867 = vpow2.f32 %v756_v2  ;;  %v3708_v32 = vmov 0  ;;  %v732_v35 = vmul.f32 1.442695, %v696_v48 }
 0x1e4   : > { %v3709_v32 = vsel %vm2691_vm5, 4294967295, %v3708_v32  ;;  %v2696_v63 = vsub.f32 %v2432_v0, %v655_v21  ;;  %v3710_v51 = vunpack.c.h.bf16 %v2543_v36  ;;  %1869 = vpow2.f32 %v758_v17 }
 0x1e5   : > { %v679_v53 = vpop.xlane.xlu1 %678  ;;  %v2667_v49 = vpop.xlane.xlu0 %657  ;;  %v734_v60 = vmul.f32 1.442695, %v697_v28  ;;  %v979_v29 = vadd.f32 %v931_v30, %v863_v47  ;;  %1871 = vpow2.f32 %v728_v42  ;;  %v864_v2 = vsel %vm2676_vm6, 0.0, %v696_v48 }
 0x1e6   : > { %v1067_v56 = vmul.f32 %v3710_v51, %v987_v43  ;;  %v2701_v45 = vsub.f32 %v2440_v8, %v679_v53  ;;  %v3711_v0 = vmov 0  ;;  %v764_v8 = vmul.f32 1.442695, %v2665_v4 }
 0x1e7   : > { %v3712_v0 = vsel %vm2712_vm10, 4294967295, %v3711_v0  ;;  %v2718_v36 = vsub.f32 %v2434_v3, %v679_v53  ;;  %1873 = vpow2.f32 %v730_v31  ;;  %v932_v48 = vsel %vm2691_vm5, 0.0, %v697_v28 }
 0x1e8   : > { %1092 = vadd.xlane.f32.xlu1 %v1067_v56  ;;  %v713_v42 = vsub.f32 %v2424_v58, %v676_v61  ;;  %v736_v21 = vmul.f32 1.442695, %v2681_v6  ;;  %1875 = vpow2.f32 %v732_v35  ;;  %v3713_v3 = vmov 0 }
 0x1e9   : > { %v661_v30 = vpop.xlane.xlu1 %660  ;;  %v3714_v3 = vsel %vm2730_vm15, 4294967295, %v3713_v3  ;;  %v738_v43 = vmul.f32 1.442695, %v2696_v63  ;;  %v3715_v44 = vunpack.c.h.bf16 %v2524_v16  ;;  %v682_v17 = vpop.xlane.xlu0 %681  ;;  %1877 = vpow2.f32 %v734_v60 }
 0x1ea   : > { %v872_v61 = vsel %vm2712_vm10, 0.0, %v2665_v4  ;;  %v768_v16 = vmul.f32 1.442695, %v2701_v45  ;;  %v2752_v28 = vadd.s32 120, %v2501_v1  ;;  %1879 = vpow2.f32 %v764_v8  ;;  %vm3719_vm10 = vmmov %vm3716_vm13 }
 0x1eb   : > { %v1059_v47 = vmul.f32 %v3715_v44, %v979_v29  ;;  %vm2761_vm5 = vmand %vm3719_vm10, %vm2513_vm2  ;;  %v3720_v4 = vmov 0  ;;  %v770_v53 = vmul.f32 1.442695, %v2718_v36  ;;  %v2768_v31 = vsub.f32 %v2442_v9, %v2667_v49  ;;  %v2787_v29 = vpop.eup %1859 }
 0x1ec   : > { %v3721_v4 = vsel %vm2761_vm5, 4294967295, %v3720_v4  ;;  %v980_v35 = vadd.f32 %v932_v48, %v864_v2  ;;  %v940_v5 = vsel %vm2730_vm15, 0.0, %v713_v42  ;;  %1881 = vpow2.f32 %v736_v21 }
 0x1ed   : > { %1076 = vadd.xlane.f32.xlu0 %v1059_v47  ;;  %v2772_v51 = vpop.xlane.xlu1 %684  ;;  %vm3722_vm10 = vcmp.eq.s32.totalorder %v2499_v62, %v2611_v22  ;;  %v3723_v56 = vmov 0  ;;  %v716_v9 = vsub.f32 %v2446_v13, %v682_v17  ;;  %v717_v60 = vsub.f32 %v2448_v14, %v682_v17  ;;  %v2804_v14 = vpop.eup %1861 }
 0x1ee   : > { %vm2781_vm6 = vmand %vm3722_vm10, %vm2509_vm1  ;;  %v766_v2 = vmul.f32 1.442695, %v713_v42  ;;  %1883 = vpow2.f32 %v738_v43  ;;  %v865_v8 = vsel %vm2746_vm9, 0.0, %v2681_v6  ;;  %v3726_v48 = vmov 0  ;;  %v2814_v43 = vpop.eup %1863 }
 0x1ef   : > { %v3724_v56 = vsel %vm2781_vm6, 4294967295, %v3723_v56  ;;  %vm2797_vm13 = vmand %vm3722_vm10, %vm2513_vm2  ;;  %v933_v6 = vsel %vm2761_vm5, 0.0, %v2696_v63  ;;  %1885 = vpow2.f32 %v768_v16  ;;  %v2810_v42 = vsub.f32 %v2454_v19, %v661_v30 }
 0x1f0   : > { %3725 = vst [vmem:[#allocation33_spill] sm:$0xff] %v3724_v56  ;;  %v3727_v48 = vsel %vm2797_vm13, 4294967295, %v3726_v48  ;;  %v3729_v22 = vunpack.c.l.bf16 %v2574_v12  ;;  %vm3730_vm10 = vcmp.eq.s32.totalorder %v2499_v62, %v2588_v33  ;;  %v3731_v44 = vmov 0 }
 0x1f1   : > { %3728 = vst [vmem:[#allocation34_spill] sm:$0xff] %v3727_v48  ;;  %vm2821_vm15 = vmand %vm3730_vm10, %vm2509_vm1  ;;  %1887 = vpow2.f32 %v770_v53  ;;  %v2827_v63 = vsub.f32 %v2444_v10, %v2667_v49  ;;  %v740_v19 = vmul.f32 1.442695, %v2768_v31  ;;  %v988_v47 = vadd.f32 %v940_v5, %v872_v61  ;;  %v667_v17 = vpop.xlane.xlu1 %666  ;;  %v2846_v61 = vld [vmem:[#allocation8 + $0x8] sm:$0xff]   ;;  %v2848_v5 = vpop.eup %1865 }
 0x1f2   : > { %v1060_v21 = vmul.f32 %v3729_v22, %v980_v35  ;;  %v3732_v44 = vsel %vm2821_vm15, 4294967295, %v3731_v44  ;;  %vm3733_vm5 = vmmov %vm3730_vm10  ;;  %v772_v35 = vmul.f32 1.442695, %v716_v9  ;;  %v874_v53 = vsel %vm2781_vm6, 0.0, %v716_v9 }
 0x1f3   : > { %vm2835_vm9 = vmand %vm3733_vm5, %vm2513_vm2  ;;  %v942_v10 = vsel %vm2797_vm13, 0.0, %v717_v60  ;;  %v2844_v49 = vsub.f32 %v2456_v20, %v661_v30  ;;  %1889 = vpow2.f32 %v766_v2  ;;  %vm3736_vm5 = vcmp.eq.s32.totalorder %v2499_v62, %v2605_v40  ;;  %v2861_v30 = vpop.eup %1867 }
 0x1f4   : > { %1078 = vadd.xlane.f32.xlu0 %v1060_v21  ;;  %vm2855_vm10 = vmand %vm3736_vm5, %vm2509_vm1  ;;  %v3737_v33 = vmov 0  ;;  %v774_v9 = vmul.f32 1.442695, %v717_v60  ;;  %v873_v2 = vsel %vm2821_vm15, 0.0, %v2701_v45  ;;  %v744_v21 = vmul.f32 1.442695, %v2810_v42  ;;  %v2877_v20 = vpop.eup %1869 }
 0x1f5   : > { %v3738_v33 = vsel %vm2855_vm10, 4294967295, %v3737_v33  ;;  %v3739_v13 = vunpack.c.l.bf16 %v2590_v41  ;;  %v981_v57 = vadd.f32 %v933_v6, %v865_v8  ;;  %vm3740_vm5 = vcmp.ge.s32.totalorder %v2499_v62, 8  ;;  %v1872_v8 = vpop.eup %1871 }
 0x1f6   : > { %vm2873_vm13 = vmor %vm2520_vm3, %vm3740_vm5  ;;  %v941_v45 = vsel %vm2835_vm9, 0.0, %v2718_v36  ;;  %1891 = vpow2.f32 %v740_v19  ;;  %v2883_v22 = vmul.f32 1.442695, %v2827_v63  ;;  %vm3746_vm3 = vcmp.eq.s32.totalorder %v2499_v62, %v2605_v40  ;;  %v664_v19 = vpop.xlane.xlu0 %663 }
 0x1f7   : > { %v1068_v58 = vmul.f32 %v3739_v13, %v988_v47  ;;  %v990_v13 = vadd.f32 %v942_v10, %v874_v53  ;;  %vm3743_vm6 = vmmov %vm3740_vm5  ;;  %v3747_v36 = vmov 0  ;;  %1893 = vpow2.f32 %v772_v35  ;;  %v1874_v53 = vpop.eup %1873 }
 0x1f8   : > { %vm2889_vm15 = vmor %vm2530_vm4, %vm3743_vm6  ;;  %v746_v6 = vmul.f32 1.442695, %v2844_v49  ;;  %v2904_v18 = vsub.f32 %v2474_v37, %v667_v17  ;;  %v2907_v47 = vsub.f32 %v2480_v46, %v667_v17  ;;  %1895 = vpow2.f32 %v774_v9  ;;  %v691_v17 = vpop.xlane.xlu1 %690  ;;  %v2938_v35 = vpop.eup %1875 }
 0x1f9   : > { %vm2898_vm5 = vmand %vm3746_vm3, %vm2513_vm2  ;;  %1094 = vadd.xlane.f32.xlu0 %v1068_v58  ;;  %v2922_v37 = vsub.f32 %v2466_v27, %v2772_v51  ;;  %v2926_v46 = vsub.f32 %v2458_v23, %v2772_v51  ;;  %3756 = vst [vmem:[#allocation36_spill] sm:$0xff] %v2938_v35  ;;  %vm3757_vm10 = vcmp.eq.s32.totalorder %v2499_v62, %v2614_v59  ;;  %v3758_v23 = vmov 0  ;;  %v2971_v59 = vpop.eup %1877  ;;  %v3784_v35 = vld [vmem:[#allocation20_spill] sm:$0xff] }
 0x1fa   : > { %v3748_v36 = vsel %vm2898_vm5, 4294967295, %v3747_v36  ;;  %vm3749_vm4 = vmmov %vm3743_vm6  ;;  %v3761_v27 = vmov 0  ;;  %1897 = vpow2.f32 %v744_v21  ;;  %v3763_v52 = vunpack.c.h.bf16 %v2574_v12  ;;  %3768 = vst [vmem:[#allocation37_spill] sm:$0xff] %v2971_v59  ;;  %v3769_v12 = vld [vmem:[#allocation16_spill] sm:$0xff]  ;;  %v3775_v59 = vld [vmem:[#allocation30_spill] sm:$0xff] }
 0x1fb   : > { %vm2913_vm6 = vmor %vm2632_vm14, %vm3749_vm4  ;;  %3752 = vst [vmem:[#allocation35_spill] sm:$0xff] %v2922_v37  ;;  %v3764_v10 = vunpack.c.l.bf16 %v2622_v25  ;;  %v752_v58 = vmul.f32 1.442695, %v2904_v18  ;;  %v2974_v21 = vsub.f32 %v2460_v24, %v664_v19  ;;  %v2988_v25 = vpop.eup %1879  ;;  %1899 = vpow2.f32 %v746_v6  ;;  %v3776_v24 = vld [vmem:[#allocation32_spill] sm:$0xff] }
 0x1fc   : > { %vm3753_vm3 = vmmov %vm3749_vm4  ;;  %v1061_v51 = vmul.f32 %v3763_v52, %v981_v57  ;;  %v2977_v57 = vsub.f32 %v3769_v12, %v664_v19  ;;  %v989_v52 = vadd.f32 %v941_v45, %v873_v2  ;;  %3774 = vst [vmem:[#allocation16_spill] sm:$0xff] %v2988_v25  ;;  %v895_v45 = vsel %vm2913_vm6, 0.0, %v1872_v8  ;;  %v3780_v19 = vld [vmem:[#allocation19_spill] sm:$0xff] }
 0x1fd   : > { %vm2932_vm14 = vmor %vm2648_vm0, %vm3753_vm3  ;;  %v1070_v9 = vmul.f32 %v3764_v10, %v990_v13  ;;  %v754_v13 = vmul.f32 1.442695, %v2907_v47  ;;  %v3008_v12 = vsub.f32 %v3780_v19, %v691_v17  ;;  %v1882_v10 = vpop.eup %1881  ;;  %v776_v25 = vmul.f32 1.442695, %v2922_v37 }
 0x1fe   : > { %vm2945_vm5 = vmand %vm3757_vm10, %vm2509_vm1  ;;  %1080 = vadd.xlane.f32.xlu0 %v1061_v51  ;;  %v963_v6 = vsel %vm2932_vm14, 0.0, %v1874_v53  ;;  %v778_v40 = vmul.f32 1.442695, %v2926_v46  ;;  %v3021_v26 = vsub.f32 %v3784_v35, %v691_v17  ;;  %v1884_v51 = vpop.eup %1883  ;;  %1901 = vpow2.f32 %v752_v58 }
 0x1ff   : > { %v3759_v23 = vsel %vm2945_vm5, 4294967295, %v3758_v23  ;;  %vm3760_vm0 = vmmov %vm3757_vm10  ;;  %1098 = vadd.xlane.f32.xlu1 %v1070_v9  ;;  %vm3777_vm5 = vcmp.eq.s32.totalorder %v2499_v62, %v2654_v34  ;;  %v995_v8 = vadd.f32 %v963_v6, %v895_v45  ;;  %v3789_v48 = vunpack.c.h.bf16 %v2590_v41  ;;  %v1886_v45 = vpop.eup %1885 }
 0x200   : > { %vm2954_vm3 = vmand %vm3760_vm0, %vm2513_vm2  ;;  %v784_v37 = vmul.f32 1.442695, %v3008_v12  ;;  %v894_v17 = vsel %vm2873_vm13, 0.0, %v2787_v29  ;;  %vm3791_vm14 = vnez %v3718_v55  ;;  %1903 = vpow2.f32 %v754_v13  ;;  %v1888_v29 = vpop.eup %1887 }
 0x201   : > { %v3762_v27 = vsel %vm2954_vm3, 4294967295, %v3761_v27  ;;  %vm3765_vm10 = vmmov %vm3749_vm4  ;;  %v1069_v56 = vmul.f32 %v3789_v48, %v989_v52  ;;  %v3794_v58 = vunpack.c.h.bf16 %v2669_v50  ;;  %v786_v48 = vmul.f32 1.442695, %v3021_v26  ;;  %v3089_v15 = vpop.eup %1889 }
 0x202   : > { %vm2967_vm4 = vmor %vm2580_vm11, %vm3765_vm10  ;;  %v962_v60 = vsel %vm2889_vm15, 0.0, %v2804_v14  ;;  %vm3796_vm13 = vnez %v3721_v4  ;;  %1905 = vpow2.f32 %v784_v37 }
 0x203   : > { %vm3770_vm0 = vmmov %vm3765_vm10  ;;  %v1139_v41 = vmul.f32 %v3794_v58, %v995_v8  ;;  %1096 = vadd.xlane.f32.xlu0 %v1069_v56  ;;  %v994_v13 = vadd.f32 %v962_v60, %v894_v17  ;;  %v903_v52 = vsel %vm2967_vm4, 0.0, %v2814_v43  ;;  %1907 = vpow2.f32 %v786_v48 }
 0x204   : > { %vm2984_vm3 = vmor %vm2596_vm12, %vm3770_vm0  ;;  %1909 = vpow2.f32 %v776_v25  ;;  %v748_v58 = vmul.f32 1.442695, %v2974_v21  ;;  %v3454_v25 = vld [vmem:[#allocation10 + $0x58] sm:$0xff] }
 0x205   : > { %vm2999_vm12 = vmand %vm3777_vm5, %vm2509_vm1  ;;  %v971_v14 = vsel %vm2984_vm3, 0.0, %v2848_v5  ;;  %1156 = vadd.xlane.f32.xlu1 %v1139_v41  ;;  %v3079_v5 = vld [vmem:[#allocation7 + $0x10] sm:$0xff]   ;;  %1911 = vpow2.f32 %v778_v40  ;;  %v3832_v41 = vunpack.c.l.bf16 %v2754_v39 }
 0x206   : > { %vm3014_vm10 = vmor %vm2552_vm7, %vm3770_vm0  ;;  %v1003_v56 = vadd.f32 %v971_v14, %v903_v52  ;;  %1913 = vpow2.f32 %v2883_v22  ;;  %v3845_v52 = vunpack.c.h.bf16 %v2846_v61 }
 0x207   : > { %vm3785_vm5 = vmmov %vm3770_vm0  ;;  %v902_v1 = vsel %vm3014_vm10, 0.0, %v2861_v30  ;;  %vm3806_vm10 = vcmp.eq.s32.totalorder %v2499_v62, %v2654_v34  ;;  %v3811_v34 = vunpack.c.h.bf16 %v2754_v39  ;;  %v3840_v39 = vmov 0 }
 0x208   : > { %vm3027_vm6 = vmor %vm2558_vm8, %vm3785_vm5  ;;  %1915 = vpow2.f32 %v748_v58 }
 0x209   : > { %vm3790_vm7 = vmmov %vm3770_vm0  ;;  %v970_v43 = vsel %vm3027_vm6, 0.0, %v2877_v20  ;;  %v3809_v20 = vunpack.c.l.bf16 %v2669_v50  ;;  %v1147_v8 = vmul.f32 %v3811_v34, %v1003_v56  ;;  %v3847_v56 = vld [vmem:[#allocation33_spill] sm:$0xff] }
 0x20a   : > { %vm3041_vm0 = vmor %vm3791_vm14, %vm3790_vm7  ;;  %v1002_v38 = vadd.f32 %v970_v43, %v902_v1  ;;  %v3855_v43 = vld [vmem:[#allocation34_spill] sm:$0xff]  ;;  %v3251_v34 = vld [vmem:[#allocation8 + $0x30] sm:$0xff]  }
 0x20b   : > { %vm3795_vm8 = vmmov %vm3785_vm5  ;;  %v1138_v37 = vmul.f32 %v3809_v20, %v994_v13  ;;  %v897_v16 = vsel %vm3041_vm0, 0.0, %v1882_v10  ;;  %v3119_v10 = vpop.eup %1891  ;;  %vm3816_vm0 = vcmp.eq.s32.totalorder %v2499_v62, %v2752_v28  ;;  %1172 = vadd.xlane.f32.xlu1 %v1147_v8  ;;  %v750_v28 = vmul.f32 1.442695, %v2977_v57  ;;  %v1692_v1 = vld [vmem:[#allocation8 + $0x10] sm:$0xff]  }
 0x20c   : > { %vm3055_vm5 = vmor %vm3796_vm13, %vm3795_vm8  ;;  %vm3813_vm13 = vnez %v3707_v54  ;;  %v1894_v17 = vpop.eup %1893  ;;  %v1146_v48 = vmul.f32 %v3832_v41, %v1002_v38  ;;  %v1678_v58 = vunpack.c.l.bf16 %v3251_v34 }
 0x20d   : > { %vm3799_vm15 = vmmov %vm3790_vm7  ;;  %vm3800_vm7 = vnez %v3732_v44  ;;  %v965_v6 = vsel %vm3055_vm5, 0.0, %v1884_v51  ;;  %1154 = vadd.xlane.f32.xlu0 %v1138_v37  ;;  %v3135_v51 = vld [vmem:[#allocation8 + $0x28] sm:$0xff]   ;;  %v1631_v37 = vunpack.c.h.bf16 %v3079_v5  ;;  %1917 = vpow2.f32 %v750_v28  ;;  %v3289_v28 = vld [vmem:[#allocation8 + $0x18] sm:$0xff]  }
 0x20e   : > { %vm3069_vm14 = vmor %vm3800_vm7, %vm3799_vm15  ;;  %v997_v53 = vadd.f32 %v965_v6, %v897_v16  ;;  %v1675_v22 = vunpack.c.h.bf16 %v3135_v51  ;;  %v1674_v44 = vunpack.c.l.bf16 %v3135_v51 }
 0x20f   : > { %vm3803_vm4 = vmmov %vm3795_vm8  ;;  %v905_v54 = vsel %vm3069_vm14, 0.0, %v1886_v45  ;;  %vm3824_vm14 = vnez %v3762_v27 }
 0x210   : > { %vm3085_vm3 = vmor %vm2835_vm9, %vm3803_vm4  ;;  %vm3810_vm9 = vnez %v3748_v36  ;;  %v935_v45 = vsel %vm3824_vm14, 0.0, %v2844_v49  ;;  %v1896_v49 = vpop.eup %1895  ;;  %v1141_v14 = vmul.f32 %v3845_v52, %v997_v53  ;;  %v3865_v53 = vld [vmem:[#allocation36_spill] sm:$0xff] }
 0x211   : > { %vm3096_vm8 = vmand %vm3806_vm10, %vm2513_vm2  ;;  %v934_v9 = vsel %vm3810_vm9, 0.0, %v2827_v63  ;;  %v1630_v63 = vunpack.c.l.bf16 %v3079_v5  ;;  %v973_v19 = vsel %vm3085_vm3, 0.0, %v1888_v29  ;;  %v3186_v29 = vpop.eup %1897  ;;  %vm3839_vm9 = vcmp.eq.s32.totalorder %v2499_v62, %v3775_v59  ;;  %1170 = vadd.xlane.f32.xlu0 %v1146_v48 }
 0x212   : > { %vm3812_vm6 = vmmov %vm3803_vm4  ;;  %v937_v13 = vsel %vm3096_vm8, 0.0, %v2907_v47  ;;  %v1005_v4 = vadd.f32 %v973_v19, %v905_v54  ;;  %v3231_v47 = vld [vmem:[#allocation7 + $0x18] sm:$0xff]   ;;  %v1900_v20 = vpop.eup %1899  ;;  %1160 = vadd.xlane.f32.xlu1 %v1141_v14 }
 0x213   : > { %vm3115_vm15 = vmor %vm3813_vm13, %vm3812_vm6  ;;  %vm3823_vm6 = vnez %v3759_v23  ;;  %v1902_v8 = vpop.eup %1901 }
 0x214   : > { %vm3126_vm5 = vmand %vm3816_vm0, %vm2509_vm1  ;;  %v867_v35 = vsel %vm3823_vm6, 0.0, %v2810_v42  ;;  %v3830_v42 = vmov 0  ;;  %v1149_v23 = vmul.f32 %v1675_v22, %v1005_v4  ;;  %v896_v54 = vsel %vm3115_vm15, 0.0, %v3865_v53 }
 0x215   : > { %vm3819_vm7 = vmmov %vm3803_vm4  ;;  %vm3820_vm4 = vnez %v3709_v32  ;;  %v983_v6 = vadd.f32 %v935_v45, %v867_v35  ;;  %v1904_v35 = vpop.eup %1903  ;;  %v1658_v22 = vunpack.c.l.bf16 %v2846_v61  ;;  %v3458_v32 = vld [vmem:[#allocation10 + $0x60] sm:$0xff] }
 0x216   : > { %vm3141_vm10 = vmor %vm3820_vm4, %vm3819_vm7  ;;  %v1906_v2 = vpop.eup %1905  ;;  %1176 = vadd.xlane.f32.xlu1 %v1149_v23 }
 0x217   : > { %vm3825_vm3 = vmmov %vm3816_vm0  ;;  %v1908_v30 = vpop.eup %1907 }
 0x218   : > { %vm3157_vm13 = vmand %vm3825_vm3, %vm2513_vm2  ;;  %vm3833_vm3 = vnez %v3738_v33 }
 0x219   : > { %vm3828_vm0 = vmmov %vm3819_vm7  ;;  %vm3829_vm7 = vnez %v3712_v0  ;;  %v3834_v60 = vsel %vm3833_vm3, 0.0, %v2768_v31  ;;  %v3837_v0 = vmov 0  ;;  %vm3842_vm3 = vcmp.eq.s32.totalorder %v2499_v62, %v3776_v24 }
 0x21a   : > { %vm3166_vm4 = vmor %vm3829_vm7, %vm3828_vm0  ;;  %v982_v55 = vadd.f32 %v934_v9, %v3834_v60  ;;  %v869_v31 = vsel %vm2999_vm12, 0.0, %v2904_v18  ;;  %v1667_v60 = vunpack.c.h.bf16 %v3289_v28 }
 0x21b   : > { %v3831_v42 = vsel %vm3166_vm4, 4294967295, %v3830_v42  ;;  %vm3835_vm11 = vmmov %vm3828_vm0  ;;  %vm3836_vm0 = vnez %v3714_v3  ;;  %v3843_v3 = vmov 0  ;;  %v985_v9 = vadd.f32 %v937_v13, %v869_v31  ;;  %v3882_v13 = vld [vmem:[#allocation16_spill] sm:$0xff] }
 0x21c   : > { %vm3182_vm7 = vmor %vm3836_vm0, %vm3835_vm11  ;;  %vm3848_vm0 = vnez %v3847_v56  ;;  %v1062_v16 = vmul.f32 %v1630_v63, %v982_v55  ;;  %v3866_v63 = vld [vmem:[#allocation37_spill] sm:$0xff]  ;;  %v1910_v56 = vpop.eup %1909  ;;  %v3906_v55 = vld [vmem:[#allocation35_spill] sm:$0xff] }
 0x21d   : > { %v3838_v0 = vsel %vm3182_vm7, 4294967295, %v3837_v0  ;;  %vm3193_vm4 = vmand %vm3839_vm9, %vm2509_vm1  ;;  %vm3846_vm9 = vcmp.ge.s32.totalorder %v2499_v62, 8  ;;  %vm3856_vm7 = vnez %v3855_v43  ;;  %v964_v19 = vsel %vm3141_vm10, 0.0, %v3866_v63  ;;  %v1912_v43 = vpop.eup %1911 }
 0x21e   : > { %v3841_v39 = vsel %vm3193_vm4, 4294967295, %v3840_v39  ;;  %vm3202_vm11 = vmand %vm3842_vm3, %vm2509_vm1  ;;  %vm3851_vm1 = vcmp.eq.s32.totalorder %v2499_v62, %v3775_v59  ;;  %v1635_v59 = vunpack.c.h.bf16 %v3231_v47  ;;  %1082 = vadd.xlane.f32.xlu0 %v1062_v16  ;;  %v996_v48 = vadd.f32 %v964_v19, %v896_v54  ;;  %v1914_v16 = vpop.eup %1913 }
 0x21f   : > { %v3844_v3 = vsel %vm3202_vm11, 4294967295, %v3843_v3  ;;  %vm3218_vm3 = vmor %vm3848_vm0, %vm3846_vm9 }
 0x220   : > { %vm3227_vm11 = vmand %vm3851_vm1, %vm2513_vm2  ;;  %v906_v45 = vsel %vm3218_vm3, 0.0, %v1894_v17  ;;  %v1065_v41 = vmul.f32 %v1635_v59, %v985_v9  ;;  %v1140_v9 = vmul.f32 %v1658_v22, %v996_v48 }
 0x221   : > { %vm3854_vm4 = vmmov %vm3846_vm9 }
 0x222   : > { %vm3237_vm9 = vmor %vm3856_vm7, %vm3854_vm4  ;;  %1088 = vadd.xlane.f32.xlu1 %v1065_v41 }
 0x223   : > { %vm3859_vm1 = vmmov %vm3854_vm4  ;;  %v974_v50 = vsel %vm3237_vm9, 0.0, %v1896_v49  ;;  %v1063_v49 = vmul.f32 %v1631_v37, %v983_v6  ;;  %vm3879_vm9 = vcmp.eq.s32.totalorder %v2499_v62, %v3776_v24  ;;  %v945_v37 = vsel %vm3157_vm13, 0.0, %v3021_v26  ;;  %v3450_v26 = vld [vmem:[#allocation10 + $0x50] sm:$0xff] }
 0x224   : > { %vm3247_vm0 = vmor %vm3823_vm6, %vm3859_vm1  ;;  %v1006_v31 = vadd.f32 %v974_v50, %v906_v45  ;;  %v1679_v45 = vunpack.c.h.bf16 %v3251_v34  ;;  %v1916_v50 = vpop.eup %1915  ;;  %v3904_v34 = vld [vmem:[#allocation23_spill] sm:$0xff] }
 0x225   : > { %vm3862_vm4 = vmmov %vm3859_vm1  ;;  %v899_v4 = vsel %vm3247_vm0, 0.0, %v3186_v29  ;;  %1084 = vadd.xlane.f32.xlu0 %v1063_v49  ;;  %v805_v17 = vadd.s32 112, %v3904_v34  ;;  %v1662_v49 = vunpack.c.l.bf16 %v1692_v1 }
 0x226   : > { %vm3257_vm7 = vmor %vm3824_vm14, %vm3862_vm4  ;;  %v1150_v23 = vmul.f32 %v1678_v58, %v1006_v31 }
 0x227   : > { %vm3867_vm6 = vmmov %vm3859_vm1  ;;  %v967_v24 = vsel %vm3257_vm7, 0.0, %v1900_v20  ;;  %v1663_v20 = vunpack.c.h.bf16 %v1692_v1  ;;  %v3911_v1 = vld [vmem:[#allocation18_spill] sm:$0xff] }
 0x228   : > { %vm3271_vm1 = vmor %vm2999_vm12, %vm3867_vm6  ;;  %vm3883_vm6 = vnez %v3831_v42  ;;  %v999_v53 = vadd.f32 %v967_v24, %v899_v4  ;;  %1178 = vadd.xlane.f32.xlu1 %v1150_v23  ;;  %v3464_v23 = vld [vmem:[#allocation10 + $0x48] sm:$0xff] }
 0x229   : > { %vm3870_vm15 = vmmov %vm3862_vm4  ;;  %v904_v52 = vsel %vm3883_vm6, 0.0, %v3882_v13  ;;  %1158 = vadd.xlane.f32.xlu0 %v1140_v9  ;;  %v1666_v13 = vunpack.c.l.bf16 %v3289_v28 }
 0x22a   : > { %vm3283_vm10 = vmor %vm3096_vm8, %vm3870_vm15  ;;  %vm3884_vm15 = vnez %v3838_v0  ;;  %v1143_v40 = vmul.f32 %v1663_v20, %v999_v53  ;;  %v877_v20 = vsel %vm3126_vm5, 0.0, %v3008_v12  ;;  %v3446_v12 = vld [vmem:[#allocation10 + $0x40] sm:$0xff] }
 0x22b   : > { %vm3873_vm12 = vmmov %vm3862_vm4  ;;  %v972_v14 = vsel %vm3884_vm15, 0.0, %v3089_v15  ;;  %v901_v15 = vsel %vm3271_vm1, 0.0, %v1902_v8  ;;  %v969_v0 = vsel %vm3283_vm10, 0.0, %v1904_v35  ;;  %vm3892_vm1 = vnez %v3844_v3 }
 0x22c   : > { %vm3295_vm14 = vmor %vm3126_vm5, %vm3873_vm12  ;;  %v1001_v59 = vadd.f32 %v969_v0, %v901_v15  ;;  %v868_v6 = vsel %vm3892_vm1, 0.0, %v2974_v21  ;;  %v1004_v51 = vadd.f32 %v972_v14, %v904_v52  ;;  %vm3898_vm15 = vnez %v3748_v36  ;;  %1164 = vadd.xlane.f32.xlu1 %v1143_v40 }
 0x22d   : > { %vm3876_vm8 = vmmov %vm3862_vm4  ;;  %v909_v29 = vsel %vm3295_vm14, 0.0, %v1906_v2  ;;  %vm3894_vm14 = vnez %v3738_v33  ;;  %v1634_v35 = vunpack.c.l.bf16 %v3231_v47  ;;  %v1918_v47 = vpop.eup %1917  ;;  %v943_v14 = vsel %vm3227_vm11, 0.0, %v2926_v46  ;;  %v3914_v46 = vld [vmem:[#allocation31_spill] sm:$0xff] }
 0x22e   : > { %vm3304_vm3 = vmor %vm3157_vm13, %vm3876_vm8  ;;  %v3369_v63 = vmul.f32 %v1667_v60, %v1001_v59  ;;  %v1148_v33 = vmul.f32 %v1674_v44, %v1004_v51  ;;  %v688_v60 = vpop.xlane.xlu0 %687  ;;  %v1647_v15 = vunpack.c.h.bf16 %v3914_v46  ;;  %v3442_v51 = vld [vmem:[#allocation10 + $0x38] sm:$0xff] }
 0x22f   : > { %vm3313_vm4 = vmand %vm3879_vm9, %vm2513_vm2  ;;  %v977_v38 = vsel %vm3304_vm3, 0.0, %v1908_v30  ;;  %v721_v42 = vsub.f32 %v3911_v1, %v688_v60 }
 0x230   : > { %vm3885_vm12 = vmmov %vm3876_vm8  ;;  %vm3886_vm8 = vnez %v3841_v39  ;;  %v3356_v5 = vadd.f32 %v977_v38, %v909_v29  ;;  %v936_v8 = vsel %vm3313_vm4, 0.0, %v2977_v57  ;;  %1174 = vadd.xlane.f32.xlu0 %v1148_v33  ;;  %v1690_v29 = vld [vmem:[#allocation7 + $0x38] sm:$0xff]   ;;  %v993_v38 = vadd.f32 %v945_v37, %v877_v20 }
 0x231   : > { %vm3332_vm9 = vmor %vm3886_vm8, %vm3885_vm12  ;;  %v984_v27 = vadd.f32 %v936_v8, %v868_v6  ;;  %v875_v52 = vsel %vm3886_vm8, 0.0, %v3906_v55  ;;  %v1650_v11 = vunpack.c.l.bf16 %v1690_v29  ;;  %v3438_v6 = vld [vmem:[#allocation10 + $0x30] sm:$0xff]  ;;  %v3462_v8 = vld [vmem:[#allocation10 + $0x68] sm:$0xff]  ;;  %v782_v54 = vmul.f32 1.442695, %v721_v42 }
 0x232   : > { %vm3889_vm0 = vmmov %vm3885_vm12  ;;  %v907_v21 = vsel %vm3332_vm9, 0.0, %v1910_v56  ;;  %v3910_v56 = vld [vmem:[#allocation17_spill] sm:$0xff]  ;;  %v991_v18 = vadd.f32 %v943_v14, %v875_v52  ;;  %v3478_v40 = vpop.permute.xlu0 %1292  ;;  %vm1410_vm8 = vcmask 7168  }
 0x233   : > { %vm3347_vm7 = vmor %vm3227_vm11, %vm3889_vm0  ;;  %v720_v24 = vsub.f32 %v3910_v56, %v688_v60 }
 0x234   : > { %vm3893_vm10 = vmmov %vm3889_vm0  ;;  %v975_v19 = vsel %vm3347_vm7, 0.0, %v1912_v43  ;;  %v1071_v43 = vmul.f32 %v1647_v15, %v991_v18 }
 0x235   : > { %vm3365_vm3 = vmor %vm3894_vm14, %vm3893_vm10  ;;  %v1007_v2 = vadd.f32 %v975_v19, %v907_v21  ;;  %v780_v53 = vmul.f32 1.442695, %v720_v24 }
 0x236   : > { %vm3897_vm6 = vmmov %vm3889_vm0  ;;  %v898_v22 = vsel %vm3365_vm3, 0.0, %v3119_v10  ;;  %v1064_v10 = vmul.f32 %v1634_v35, %v984_v27  ;;  %v1697_v27 = vld [vmem:[#allocation8 + $0x38] sm:$0xff]  }
 0x237   : > { %vm3379_vm12 = vmor %vm3898_vm15, %vm3897_vm6  ;;  %v1151_v41 = vmul.f32 %v1679_v45, %v1007_v2  ;;  %1919 = vpow2.f32 %v780_v53  ;;  %v1682_v45 = vunpack.c.l.bf16 %v1697_v27 }
 0x238   : > { %v966_v36 = vsel %vm3379_vm12, 0.0, %v1914_v16  ;;  %vm3901_vm9 = vmmov %vm3889_vm0  ;;  %1086 = vadd.xlane.f32.xlu0 %v1064_v10  ;;  %v1651_v16 = vunpack.c.h.bf16 %v1690_v29  ;;  %1921 = vpow2.f32 %v782_v54 }
 0x239   : > { %vm3394_vm0 = vmor %vm3892_vm1, %vm3901_vm9  ;;  %v998_v30 = vadd.f32 %v966_v36, %v898_v22  ;;  %vm839_vm1 = vcmp.eq.s32.totalorder %v2499_v62, %v805_v17  ;;  %1180 = vadd.xlane.f32.xlu1 %v1151_v41  ;;  %v3485_v62 = vld [vmem:[#allocation10 + $0x70] sm:$0xff] }
 0x23a   : > { %vm3905_vm7 = vmmov %vm3897_vm6  ;;  %v900_v3 = vsel %vm3394_vm0, 0.0, %v1916_v50  ;;  %v1073_v9 = vmul.f32 %v1651_v16, %v993_v38  ;;  %v3917_v38 = vld [vmem:[#allocation24_spill] sm:$0xff] }
 0x23b   : > { %vm952_vm10 = vmor %vm3313_vm4, %vm3905_vm7  ;;  %v1142_v61 = vmul.f32 %v1662_v49, %v998_v30  ;;  %vm3907_vm4 = vnez %v3680_v7 }
 0x23c   : > { %v968_v48 = vsel %vm952_vm10, 0.0, %v1918_v47  ;;  %vm3415_vm14 = vmand %vm839_vm1, %vm3907_vm4 }
 0x23d   : > { %v1000_v31 = vadd.f32 %v968_v48, %v900_v3  ;;  %vm3423_vm3 = vmand %vm839_vm1, %vm2513_vm2  ;;  %1162 = vadd.xlane.f32.xlu0 %v1142_v61  ;;  %v876_v7 = vsel %vm3415_vm14, 0.0, %v720_v24 }
 0x23e   : > { %v944_v0 = vsel %vm3423_vm3, 0.0, %v721_v42  ;;  %vm3915_vm2 = vmmov %vm3897_vm6  ;;  %v1683_v42 = vunpack.c.h.bf16 %v1697_v27 }
 0x23f   : > { %v1144_v39 = vmul.f32 %v1666_v13, %v1000_v31  ;;  %v992_v44 = vadd.f32 %v944_v0, %v876_v7  ;;  %vm892_vm5 = vmor %vm3415_vm14, %vm3915_vm2  ;;  %v1955_v7 = vld [vmem:[#allocation10] sm:$0xff] }
 0x240   : > { %vm3916_vm13 = vmmov %vm3915_vm2 }
 0x241   : > { %1166 = vadd.xlane.f32.xlu0 %v1144_v39  ;;  %v1072_v59 = vmul.f32 %v1650_v11, %v992_v44  ;;  %vm960_vm11 = vmor %vm3423_vm3, %vm3916_vm13 }
 0x244   : > { %v1920_v21 = vpop.eup %1919 }
 0x245   : > { %1100 = vadd.xlane.f32.xlu0 %v1071_v43  ;;  %v1922_v19 = vpop.eup %1921  ;;  %v908_v57 = vsel %vm892_vm5, 0.0, %v1920_v21  ;;  %v1153_v43 = vmul.f32 %v1683_v42, %v3356_v5 }
 0x246   : > { %v976_v33 = vsel %vm960_vm11, 0.0, %v1922_v19 }
 0x247   : > { %v1008_v35 = vadd.f32 %v976_v33, %v908_v57 }
 0x249   : > { %1102 = vadd.xlane.f32.xlu0 %v1072_v59  ;;  %v1152_v50 = vmul.f32 %v1682_v45, %v1008_v35 }
 0x24a   : > { %1294 = vrot.lane.b32.xlu1 %v3438_v6, %s2191_s24 }
 0x24d   : > { %1104 = vadd.xlane.f32.xlu0 %v1073_v9 }
 0x24e   : > { %1296 = vrot.lane.b32.xlu1 %v3442_v51, %s2191_s24 }
 0x252   : > { %1298 = vrot.lane.b32.xlu1 %v3446_v12, %s2191_s24 }
 0x256   : > { %1302 = vrot.lane.b32.xlu1 %v3450_v26, %s2191_s24 }
 0x25a   : > { %1304 = vrot.lane.b32.xlu1 %v3454_v25, %s2191_s24 }
 0x25e   : > { %1306 = vrot.lane.b32.xlu1 %v3458_v32, %s2191_s24 }
 0x262   : > { %1308 = vrot.lane.b32.xlu1 %v3462_v8, %s2191_s24 }
 0x263   : > { %1300 = vrot.lane.b32.xlu0 %v3464_v23, %s2191_s24 }
 0x266   : > { %v1075_v36 = vpop.xlane.xlu1 %1074 }
 0x26b   : > { %v3481_v2 = vpop.xlane.xlu0 %1090 }
 0x271   : > { %v3491_v47 = vpop.xlane.xlu1 %1092 }
 0x276   : > { %v3483_v22 = vpop.xlane.xlu0 %1076 }
 0x27d   : > { %v3487_v58 = vpop.xlane.xlu0 %1078 }
 0x282   : > { %v3493_v34 = vpop.xlane.xlu0 %1094 }
 0x286   : > { %1182 = vadd.xlane.f32.xlu1 %v1152_v50 }
 0x287   : > { %v3495_v17 = vpop.xlane.xlu0 %1080 }
 0x288   : > { %v3497_v10 = vpop.xlane.xlu1 %1098 }
 0x28a   : > { %1168 = vadd.xlane.f32.xlu1 %v3369_v63 }
 0x28c   : > { %v3499_v63 = vpop.xlane.xlu0 %1096 }
 0x28e   : > { %v1157_v30 = vpop.xlane.xlu1 %1156 }
 0x28f   : > { %v1187_v13 = vmax.f32 %v1157_v30, 1e-30 }
 0x294   : > { %v1173_v3 = vpop.xlane.xlu1 %1172 }
 0x295   : > { %v1195_v48 = vmax.f32 %v1173_v3, 1e-30 }
 0x296   : > { %v1155_v49 = vpop.xlane.xlu0 %1154 }
 0x297   : > { %v1186_v41 = vmax.f32 %v1155_v49, 1e-30 }
 0x299   : > { %1923 = vlog2.f32 %v1186_v41  ;;  %v1956_v41 = vld [vmem:[#allocation10 + $0x8] sm:$0xff] }
 0x29a   : > { %1925 = vlog2.f32 %v1195_v48  ;;  %v1171_v60 = vpop.xlane.xlu0 %1170 }
 0x29b   : > { %1310 = vrot.lane.b32.xlu1 %v3485_v62, %s2191_s24  ;;  %v1161_v61 = vpop.xlane.xlu1 %1160  ;;  %v1194_v21 = vmax.f32 %v1171_v60, 1e-30 }
 0x29c   : > { %v1189_v4 = vmax.f32 %v1161_v61, 1e-30 }
 0x29f   : > { %v1177_v55 = vpop.xlane.xlu1 %1176 }
 0x2a0   : > { %v1197_v52 = vmax.f32 %v1177_v55, 1e-30 }
 0x2a2   : > { %1927 = vlog2.f32 %v1197_v52  ;;  %v3523_v52 = vld [vmem:[#allocation10 + $0x78] sm:$0xff] }
 0x2a3   : > { %1929 = vlog2.f32 %v1187_v13 }
 0x2a4   : > { %1931 = vlog2.f32 %v1189_v4 }
 0x2a6   : > { %v1924_v24 = vpop.eup %1923 }
 0x2a7   : > { %v3501_v31 = vpop.xlane.xlu0 %1082  ;;  %v1926_v28 = vpop.eup %1925  ;;  %v1203_v39 = vmul.f32 0.6931472, %v1924_v24  ;;  %v1958_v24 = vld [vmem:[#allocation10 + $0x18] sm:$0xff] }
 0x2a8   : > { %v1221_v15 = vmul.f32 0.6931472, %v1926_v28 }
 0x2a9   : > { %v1234_v0 = vmul.f32 %v1955_v7, %v1203_v39 }
 0x2aa   : > { %v3509_v44 = vmul.f32 %v1221_v15, %v3464_v23  ;;  %v3918_v15 = vld [vmem:[#allocation22_spill] sm:$0xff] }
 0x2ab   : > { %v3505_v56 = vpop.xlane.xlu1 %1088  ;;  %v1250_v20 = vsub.f32 %v1075_v36, %v1234_v0  ;;  %v1959_v0 = vld [vmem:[#allocation10 + $0x28] sm:$0xff] }
 0x2ac   : > { %v1259_v59 = vsub.f32 %v3491_v47, %v3509_v44 }
 0x2ad   : > { %v1330_v16 = vmul.f32 %v3917_v38, %v1250_v20 }
 0x2ae   : > { %v3503_v14 = vpop.xlane.xlu0 %1084 }
 0x2af   : > { %v1928_v53 = vpop.eup %1927  ;;  %1362 = vrot.lane.b32.xlu0 %v1330_v16, %s2192_s27  ;;  %v3920_v16 = vld [vmem:[#allocation26_spill] sm:$0xff] }
 0x2b0   : > { %v1930_v5 = vpop.eup %1929  ;;  %v1225_v23 = vmul.f32 0.6931472, %v1928_v53 }
 0x2b1   : > { %v1179_v46 = vpop.xlane.xlu1 %1178  ;;  %v1205_v33 = vmul.f32 0.6931472, %v1930_v5  ;;  %v1932_v45 = vpop.eup %1931 }
 0x2b2   : > { %v1159_v1 = vpop.xlane.xlu0 %1158  ;;  %v1245_v57 = vmul.f32 %v1225_v23, %v3454_v25  ;;  %v1209_v48 = vmul.f32 0.6931472, %v1932_v45  ;;  %v1957_v25 = vld [vmem:[#allocation10 + $0x10] sm:$0xff] }
 0x2b3   : > { %v1188_v18 = vmax.f32 %v1159_v1, 1e-30  ;;  %v1235_v3 = vmul.f32 %v1956_v41, %v1205_v33  ;;  %v1198_v1 = vmax.f32 %v1179_v46, 1e-30 }
 0x2b4   : > { %v1261_v36 = vsub.f32 %v3499_v63, %v1245_v57  ;;  %v1237_v63 = vmul.f32 %v1958_v24, %v1209_v48 }
 0x2b5   : > { %1933 = vlog2.f32 %v1188_v18  ;;  %v1165_v11 = vpop.xlane.xlu1 %1164  ;;  %v1251_v39 = vsub.f32 %v3483_v22, %v1235_v3 }
 0x2b6   : > { %v1191_v37 = vmax.f32 %v1165_v11, 1e-30  ;;  %v3919_v11 = vld [vmem:[#allocation21_spill] sm:$0xff]  ;;  %v1253_v46 = vsub.f32 %v3495_v17, %v1237_v63 }
 0x2b7   : > { %v1331_v20 = vmul.f32 %v3919_v11, %v1251_v39 }
 0x2b8   : > { %1935 = vlog2.f32 %v1191_v37  ;;  %v1333_v53 = vmul.f32 %v3920_v16, %v1253_v46 }
 0x2b9   : > { %v1175_v29 = vpop.xlane.xlu0 %1174 }
 0x2ba   : > { %v1196_v50 = vmax.f32 %v1175_v29, 1e-30 }
 0x2bf   : > { %1184 = vadd.xlane.f32.xlu1 %v1153_v43 }
 0x2c1   : > { %v3514_v9 = vpop.xlane.xlu0 %1086 }
 0x2c2   : > { %v3516_v54 = vpop.xlane.xlu1 %1180  ;;  %v1934_v30 = vpop.eup %1933 }
 0x2c3   : > { %v1207_v61 = vmul.f32 0.6931472, %v1934_v30 }
 0x2c5   : > { %v1236_v55 = vmul.f32 %v1957_v25, %v1207_v61  ;;  %v1936_v4 = vpop.eup %1935 }
 0x2c6   : > { %v1163_v19 = vpop.xlane.xlu0 %1162  ;;  %v1295_v35 = vpop.permute.xlu1 %1294  ;;  %v1213_v18 = vmul.f32 0.6931472, %v1936_v4 }
 0x2c7   : > { %v1190_v27 = vmax.f32 %v1163_v19, 1e-30  ;;  %v1252_v28 = vsub.f32 %v3487_v58, %v1236_v55  ;;  %v1960_v19 = vld [vmem:[#allocation10 + $0x20] sm:$0xff] }
 0x2c8   : > { %v1239_v29 = vmul.f32 %v1959_v0, %v1213_v18 }
 0x2c9   : > { %1937 = vlog2.f32 %v1190_v27  ;;  %v1332_v7 = vmul.f32 %v3918_v15, %v1252_v28 }
 0x2ca   : > { %1939 = vlog2.f32 %v1194_v21  ;;  %v1167_v49 = vpop.xlane.xlu0 %1166  ;;  %v3521_v60 = vpop.permute.xlu1 %1296  ;;  %v1255_v5 = vsub.f32 %v3503_v14, %v1239_v29  ;;  %v3921_v14 = vld [vmem:[#allocation25_spill] sm:$0xff] }
 0x2cb   : > { %v1192_v13 = vmax.f32 %v1167_v49, 1e-30  ;;  %1941 = vlog2.f32 %v1196_v50  ;;  %1366 = vrot.lane.b32.xlu0 %v1332_v7, %s2192_s27 }
 0x2cc   : > { %v1335_v45 = vmul.f32 %v3478_v40, %v1255_v5 }
 0x2cd   : > { %1943 = vlog2.f32 %v1192_v13 }
 0x2ce   : > { %v1299_v42 = vpop.permute.xlu1 %1298  ;;  %1945 = vlog2.f32 %v1198_v1 }
 0x2d0   : > { %1312 = vrot.lane.b32.xlu1 %v3523_v52, %s2191_s24 }
 0x2d2   : > { %v1303_v43 = vpop.permute.xlu1 %1302 }
 0x2d4   : > { %1364 = vrot.lane.b32.xlu1 %v1331_v20, %s2192_s27 }
 0x2d6   : > { %v1938_v58 = vpop.eup %1937  ;;  %v1305_v38 = vpop.permute.xlu1 %1304 }
 0x2d7   : > { %v1940_v22 = vpop.eup %1939  ;;  %v1211_v37 = vmul.f32 0.6931472, %v1938_v58  ;;  %v3536_v23 = vmul.f32 %v1305_v38, %v1261_v36 }
 0x2d8   : > { %v1942_v21 = vpop.eup %1941  ;;  %1368 = vrot.lane.b32.xlu1 %v1333_v53, %s2192_s27  ;;  %v1219_v27 = vmul.f32 0.6931472, %v1940_v22 }
 0x2d9   : > { %v1238_v57 = vmul.f32 %v1960_v19, %v1211_v37  ;;  %v1223_v30 = vmul.f32 0.6931472, %v1942_v21 }
 0x2da   : > { %v1944_v33 = vpop.eup %1943  ;;  %v1242_v41 = vmul.f32 %v1219_v27, %v3446_v12  ;;  %v1307_v4 = vpop.permute.xlu1 %1306 }
 0x2db   : > { %v1215_v17 = vmul.f32 0.6931472, %v1944_v33  ;;  %v1254_v50 = vsub.f32 %v3501_v31, %v1238_v57  ;;  %v1946_v48 = vpop.eup %1945  ;;  %v1244_v61 = vmul.f32 %v1223_v30, %v3450_v26 }
 0x2dc   : > { %1372 = vrot.lane.b32.xlu1 %v1335_v45, %s2192_s27  ;;  %v1227_v40 = vmul.f32 0.6931472, %v1946_v48  ;;  %v1258_v31 = vsub.f32 %v3481_v2, %v1242_v41 }
 0x2dd   : > { %v1240_v49 = vmul.f32 %v1215_v17, %v3438_v6  ;;  %v1334_v36 = vmul.f32 %v3921_v14, %v1254_v50  ;;  %v1260_v25 = vsub.f32 %v3493_v34, %v1244_v61  ;;  %v1101_v34 = vpop.xlane.xlu0 %1100 }
 0x2de   : > { %v1338_v6 = vmul.f32 %v1299_v42, %v1258_v31  ;;  %v1246_v55 = vmul.f32 %v1227_v40, %v3458_v32  ;;  %v1199_v32 = vmax.f32 %v3516_v54, 1e-30 }
 0x2df   : > { %1370 = vrot.lane.b32.xlu0 %v1334_v36, %s2192_s27  ;;  %v1256_v3 = vsub.f32 %v3514_v9, %v1240_v49  ;;  %v1340_v12 = vmul.f32 %v1303_v43, %v1260_v25 }
 0x2e0   : > { %v1262_v9 = vsub.f32 %v3497_v10, %v1246_v55 }
 0x2e1   : > { %v1336_v13 = vmul.f32 %v1295_v35, %v1256_v3  ;;  %v1309_v35 = vpop.permute.xlu1 %1308  ;;  %v1103_v28 = vpop.xlane.xlu0 %1102 }
 0x2e2   : > { %v1342_v26 = vmul.f32 %v1307_v4, %v1262_v9 }
 0x2e3   : > { %1374 = vrot.lane.b32.xlu0 %v1336_v13, %s2192_s27 }
 0x2e5   : > { %v1105_v0 = vpop.xlane.xlu0 %1104 }
 0x2e7   : > { %1378 = vrot.lane.b32.xlu0 %v1338_v6, %s2192_s27 }
 0x2e9   : > { %v1301_v58 = vpop.permute.xlu0 %1300 }
 0x2eb   : > { %1382 = vrot.lane.b32.xlu0 %v1340_v12, %s2192_s27 }
 0x2ef   : > { %1386 = vrot.lane.b32.xlu0 %v1342_v26, %s2192_s27 }
 0x30f   : > { %v1183_v2 = vpop.xlane.xlu1 %1182 }
 0x310   : > { %v1200_v24 = vmax.f32 %v1183_v2, 1e-30 }
 0x312   : > { %1947 = vlog2.f32 %v1200_v24 }
 0x313   : > { %v1169_v63 = vpop.xlane.xlu1 %1168 }
 0x314   : > { %v1193_v1 = vmax.f32 %v1169_v63, 1e-30 }
 0x316   : > { %1949 = vlog2.f32 %v1193_v1 }
 0x317   : > { %1951 = vlog2.f32 %v1199_v32  ;;  %v1311_v29 = vpop.permute.xlu1 %1310 }
 0x31f   : > { %v1948_v42 = vpop.eup %1947 }
 0x320   : > { %v1231_v39 = vmul.f32 0.6931472, %v1948_v42 }
 0x321   : > { %v1363_v21 = vpop.permute.xlu0 %1362 }
 0x322   : > { %v1248_v10 = vmul.f32 %v1231_v39, %v3485_v62  ;;  %v1339_v62 = vmul.f32 %v1301_v58, %v1259_v59  ;;  %v1411_v19 = vsel %vm1410_vm8, %v1363_v21, 0.0 }
 0x323   : > { %v1950_v18 = vpop.eup %1949 }
 0x324   : > { %v1217_v15 = vmul.f32 0.6931472, %v1950_v18  ;;  %v1264_v7 = vsub.f32 %v1103_v28, %v1248_v10  ;;  %v1952_v54 = vpop.eup %1951 }
 0x325   : > { %v1229_v22 = vmul.f32 0.6931472, %v1952_v54 }
 0x326   : > { %v1241_v43 = vmul.f32 %v1217_v15, %v3442_v51  ;;  %v1344_v11 = vmul.f32 %v1311_v29, %v1264_v7 }
 0x327   : > { %v1247_v37 = vmul.f32 %v1229_v22, %v3462_v8 }
 0x328   : > { %1390 = vrot.lane.b32.xlu0 %v1344_v11, %s2192_s27  ;;  %v1257_v20 = vsub.f32 %v3505_v56, %v1241_v43 }
 0x329   : > { %v1263_v51 = vsub.f32 %v1101_v34, %v1247_v37 }
 0x32a   : > { %v1337_v46 = vmul.f32 %v3521_v60, %v1257_v20 }
 0x32b   : > { %v1343_v56 = vmul.f32 %v1309_v35, %v1263_v51 }
 0x32c   : > { %1376 = vrot.lane.b32.xlu1 %v1337_v46, %s2192_s27 }
 0x330   : > { %1380 = vrot.lane.b32.xlu1 %v1339_v62, %s2192_s27 }
 0x334   : > { %1384 = vrot.lane.b32.xlu1 %v3536_v23, %s2192_s27 }
 0x338   : > { %1388 = vrot.lane.b32.xlu1 %v1343_v56, %s2192_s27 }
 0x33d   : > { %v1367_v57 = vpop.permute.xlu0 %1366 }
 0x33e   : > { %v1414_v17 = vsel %vm1410_vm8, %v1367_v57, 0.0 }
 0x348   : > { %v1185_v60 = vpop.xlane.xlu1 %1184 }
 0x349   : > { %v1201_v38 = vmax.f32 %v1185_v60, 1e-30 }
 0x34b   : > { %1953 = vlog2.f32 %v1201_v38 }
 0x34c   : > { %v1313_v44 = vpop.permute.xlu1 %1312 }
 0x350   : > { %v1365_v8 = vpop.permute.xlu1 %1364 }
 0x351   : > { %v1412_v23 = vsel %vm1410_vm8, %v1365_v8, 0.0  ;;  %v1371_v50 = vpop.permute.xlu0 %1370 }
 0x352   : > { %v1413_v33 = vadd.f32 %v1412_v23, %v1411_v19  ;;  %v1418_v14 = vsel %vm1410_vm8, %v1371_v50, 0.0 }
 0x354   : > { %v1369_v27 = vpop.permute.xlu1 %1368  ;;  %v1415_v45 = vadd.f32 %v1414_v17, %v1413_v33 }
 0x355   : > { %v1375_v3 = vpop.permute.xlu0 %1374 }
 0x356   : > { %v1422_v13 = vsel %vm1410_vm8, %v1375_v3, 0.0 }
 0x358   : > { %v1954_v16 = vpop.eup %1953  ;;  %v1373_v49 = vpop.permute.xlu1 %1372 }
 0x359   : > { %v1233_v53 = vmul.f32 0.6931472, %v1954_v16  ;;  %v1420_v41 = vsel %vm1410_vm8, %v1373_v49, 0.0  ;;  %v1379_v6 = vpop.permute.xlu0 %1378 }
 0x35a   : > { %v1426_v12 = vsel %vm1410_vm8, %v1379_v6, 0.0 }
 0x35b   : > { %v1249_v5 = vmul.f32 %v1233_v53, %v3523_v52  ;;  %v1416_v52 = vsel %vm1410_vm8, %v1369_v27, 0.0 }
 0x35c   : > { %v1417_v30 = vadd.f32 %v1416_v52, %v1415_v45 }
 0x35d   : > { %v1265_v47 = vsub.f32 %v1105_v0, %v1249_v5  ;;  %v1383_v26 = vpop.permute.xlu0 %1382 }
 0x35e   : > { %v1419_v36 = vadd.f32 %v1418_v14, %v1417_v30  ;;  %v1430_v24 = vsel %vm1410_vm8, %v1383_v26, 0.0 }
 0x35f   : > { %v1345_v59 = vmul.f32 %v1313_v44, %v1265_v47 }
 0x360   : > { %v1421_v48 = vadd.f32 %v1420_v41, %v1419_v36 }
 0x361   : > { %1392 = vrot.lane.b32.xlu1 %v1345_v59, %s2192_s27  ;;  %v1387_v32 = vpop.permute.xlu0 %1386 }
 0x362   : > { %v1423_v31 = vadd.f32 %v1422_v13, %v1421_v48  ;;  %v1434_v28 = vsel %vm1410_vm8, %v1387_v32, 0.0 }
 0x39a   : > { %v1391_v18 = vpop.permute.xlu0 %1390 }
 0x39b   : > { %v1438_v7 = vsel %vm1410_vm8, %v1391_v18, 0.0 }
 0x39e   : > { %v1377_v61 = vpop.permute.xlu1 %1376 }
 0x39f   : > { %v1424_v40 = vsel %vm1410_vm8, %v1377_v61, 0.0 }
 0x3a0   : > { %v1425_v25 = vadd.f32 %v1424_v40, %v1423_v31 }
 0x3a2   : > { %v1381_v55 = vpop.permute.xlu1 %1380  ;;  %v1427_v4 = vadd.f32 %v1426_v12, %v1425_v25 }
 0x3a3   : > { %v1428_v9 = vsel %vm1410_vm8, %v1381_v55, 0.0 }
 0x3a4   : > { %v1429_v35 = vadd.f32 %v1428_v9, %v1427_v4 }
 0x3a6   : > { %v1385_v2 = vpop.permute.xlu1 %1384  ;;  %v1431_v63 = vadd.f32 %v1430_v24, %v1429_v35 }
 0x3a7   : > { %v1432_v1 = vsel %vm1410_vm8, %v1385_v2, 0.0 }
 0x3a8   : > { %v1433_v34 = vadd.f32 %v1432_v1, %v1431_v63 }
 0x3aa   : > { %v1389_v42 = vpop.permute.xlu1 %1388  ;;  %v1435_v39 = vadd.f32 %v1434_v28, %v1433_v34 }
 0x3ab   : > { %v1436_v10 = vsel %vm1410_vm8, %v1389_v42, 0.0 }
 0x3ac   : > { %v1437_v15 = vadd.f32 %v1436_v10, %v1435_v39 }
 0x3ae   : > { %v1439_v29 = vadd.f32 %v1438_v7, %v1437_v15 }
 0x3d3   : > { %v1393_v0 = vpop.permute.xlu1 %1392 }
 0x3d4   : > { %v1440_v43 = vsel %vm1410_vm8, %v1393_v0, 0.0 }
 0x3d5   : > { %v1441_v11 = vadd.f32 %v1440_v43, %v1439_v29 }
 0x3d7   : > { %1442 = vadd.xlane.f32.xlu0 %v1441_v11 }
 0x460   : > { %v1443_v20 = vpop.xlane.xlu0 %1442 }
 0x461   : > { %v1444_v54 = vrot.slane %v1443_v20, 4 }
 0x463   : > { %v1445_v46 = vadd.f32 %v1444_v54, %v1443_v20 }
 0x465   : > { %v1446_v58 = vrot.slane %v1445_v46, 2 }
 0x467   : > { %v1447_v22 = vadd.f32 %v1446_v58, %v1445_v46 }
 0x469   : > { %v1448_v62 = vrot.slane %v1447_v22, 1 }
 0x46b   : > { %v1449_v37 = vadd.f32 %v1448_v62, %v1447_v22 }
 0x46d   : > { %1714 = vpush %v1449_v37 }
 0x49a   : > { %1453 = sbr.rel (%p1614_p5) target bundleno = 1185 (0x4a1), region = 64 }
 0x49e   : > { %s1715_s16 = spop %1714 }
 0x49f   : > { %v2193_v51 = vmov 0.0  }
 0x4a0   : > { %1454 = vst [vmem:[#allocation11] sm:$0xff] %v2193_v51 }
 0x4a1 PF: > { %v1456_v60 = vstv %s1715_s16  ;;  %s3922_s17 = sadd.s32 4294967295, %s2179_s23   ;;  %s2194_s11 = smov [#allocation11]  }
 0x4a2   : > { %p3592_p12 = scmp.eq.s32.totalorder %s3922_s17, 1  ;;  %s1468_s12 = sshll.u32 %s2194_s11, 4  ;;  %s1469_s12 = int_to_ptr.vmem [resolvable:$true] %s1468_s12 }
 0x4a3   : > { %s2093_s13 = scalar_lea.vmem %s1469_s12, 128  ;;  %p2100_p3 = scmp.lt.s32.totalorder %s1469_s12, %s1469_s12 }
 0x4a4   : > { %p2094_p13 = scmp.ne.s32.totalorder %s1469_s12, %s2093_s13  ;;  %p2101_p6 = scmp.lt.s32.totalorder %s2093_s13, %s2093_s13 }
 0x4a6   : > { %p2095_p7 = pnand %p2094_p13, %p3592_p12  ;;  %p2102_p9 = por %p2101_p6, %p2100_p3 }
 0x4a7   : > { %v1455_v56 = vld [vmem:[#allocation11] sm:$0xff] }
 0x4a8   : > { %v1457_v38 = vadd.f32 %v1456_v60, %v1455_v56  ;;  %p2096_p2 = pneg %p2095_p7 }
 0x4aa   : > { %1458 = vst [vmem:[#allocation11] sm:$0xff] %v1457_v38  ;;  %p2103_p8 = pnand %p2102_p9, %p2096_p2 }
 0x4ac   : > { %2106 = shalt.err (!%p2103_p8)
}
 0x4ad   : > { %1735 = dma.vmem_to_hbm [thread:$0]  (%p3592_p12), %s1469_s12, 128, %s3630_s5, [#allocation4]  }
 0x4ae   : > { %2154 = dma.done.wait (%p3592_p12), [#allocation4], 128  }
 0x4af   : > { %2156 = vsyncadd (%p3592_p12), [#allocation4], 4294967168 }
 0x4b0 PF: > { %s21_s23 = sadd.s32 1, %s2179_s23   ;;  %s3924_s18 = smov %s2163_s19 }
 0x4b1   : > { %p18_p10 = scmp.ge.s32.totalorder %s21_s23, 4   ;;  %s3925_s19 = smov %s2167_s20 }
 0x4b2   : > { %s3926_s20 = smov %s2340_s8  ;;  %s3927_s21 = smov %s2175_s22 }
 0x4b3   : > { %s3928_s22 = smov %s3930_s15  ;;  %20 = sbr.rel (!%p18_p10) target bundleno = 7 (0x7), region = 101 }
 0x4b8   :  { %1481 = vsyncpa [#allocation3], 1 }
 0x4b9   :  { %1483 = vsyncpa [#allocation3 + $0x1], 1 }
 0x4ba   :  { %1484 = vsyncpa [#allocation6], 1 }
 0x4bb   :  { %1485 = vsyncpa [#allocation9], 1 }
 0x4bc   :  { %1486 = vsyncpa [#allocation4], 1 }
 0x4bd   :  { %1488 = vsyncpa [#allocation4 + $0x1], 1 }

</bundles_post_ra>
